<compile_context>
chip_gen: v7x
topology: tpu7x:2x2x1
jax: 0.10.0
libtpu: 0.0.40
codegen_flags: <defaults>
</compile_context>

<pallas_src>
import functools

import jax
import jax.numpy as jnp
from jax import lax
from jax.experimental import pallas as pl
from jax.experimental.pallas import tpu as pltpu


_DIMS = (1, 40, 100, 40, 1)
_H2_PAD = 104      # hidden dim 100 padded to a multiple of 8 (sublane axis)
_MAX_CHUNK = 512   # lane sub-chunk processed per inner-loop iteration


def _round_up(x, m):
    return ((x + m - 1) // m) * m


def _cdiv(a, b):
    return (a + b - 1) // b


def _mlp_kernel(x_ref, w1_ref, b1_ref, w2_ref, b2_ref, w3_ref, b3_ref,
                w4_ref, b4_ref, o_ref, *, chunk, n_chunks):
    """Fused tanh-form forward for one (1, block_m) batch tile.

    x_ref : (1, block_m)          batch on the lane axis
    w1: (40, 1)    b1: (40, 1)    (sigmoid affine pre-folded: tanh form)
    w2: (104, 40)  b2: (104, 1)   (rows 100..103 are zero padding)
    w3: (40, 104)  b3: (40, 1)    (cols 100..103 are zero padding)
    w4: (40, 1)    b4: (1, 1)
    o_ref : (1, block_m)
    """

    def body(c, carry):
        start = pl.multiple_of(c * chunk, chunk)
        x = x_ref[:, pl.ds(start, chunk)]                       # (1, chunk)

        # Layer 1 (in-dim 1): broadcast FMA on the VPU + tanh on the EUP.
        t1 = jnp.tanh(w1_ref[...] * x + b1_ref[...])            # (40, chunk)

        # Layers 2 & 3: MXU matmuls; batch is the moving (lane) dimension.
        z2 = jnp.dot(w2_ref[...], t1,
                     preferred_element_type=jnp.float32,
                     precision=lax.Precision.HIGHEST)
        t2 = jnp.tanh(z2 + b2_ref[...])                         # (104, chunk)
        # padded rows: tanh(0) = 0, killed by the zero columns of w3

        z3 = jnp.dot(w3_ref[...], t2,
                     preferred_element_type=jnp.float32,
                     precision=lax.Precision.HIGHEST)
        t3 = jnp.tanh(z3 + b3_ref[...])                         # (40, chunk)

        # Layer 4 (out-dim 1): VPU multiply + sublane (XLU) reduce, no MXU.
        out = jnp.sum(w4_ref[...] * t3, axis=0, keepdims=True) + b4_ref[...]
        o_ref[:, pl.ds(start, chunk)] = out.astype(o_ref.dtype)  # lane-dense
        return carry

    # fori_loop (not a Python for) bounds the live ranges per chunk.
    lax.fori_loop(0, n_chunks, body, 0, unroll=min(2, n_chunks))


@functools.partial(jax.jit, static_argnames=("block_m",))
def net_sigmoid4fat_forward(x, params, *, block_m=2048):
    """x: (N, 1) float32.  params: PyTorch-layout weights (out,in) / biases (out,)."""
    if block_m < 128 or block_m % 128 != 0:
        raise ValueError(f"block_m must be a positive multiple of 128, got {block_m}")

    n = x.shape[0]

    # ---- fold the sigmoid affine into the weights (tanh form) --------------
    # sigmoid(z) = 0.5*tanh(z/2) + 0.5  =>
    #   t_l = tanh(W_l' @ t_{l-1} + b_l'), W_1' = 0.5*W_1, b_1' = 0.5*b_1,
    #   W_l' = 0.25*W_l, b_l' = 0.5*b_l + 0.25*rowsum(W_l)  (l = 2, 3),
    #   out  = W_4' @ t_3 + b_4',  W_4' = 0.5*W_4, b_4' = b_4 + 0.5*sum(W_4).
    w1 = 0.5 * params["w1"].reshape(40, 1)
    b1 = 0.5 * params["b1"].reshape(40, 1)

    w2_raw = params["w2"]                                        # (100, 40)
    b2 = 0.5 * params["b2"] + 0.25 * jnp.sum(w2_raw, axis=1)     # (100,)
    w2 = jnp.pad(0.25 * w2_raw, ((0, _H2_PAD - 100), (0, 0)))
    b2 = jnp.pad(b2.reshape(100, 1), ((0, _H2_PAD - 100), (0, 0)))

    w3_raw = params["w3"]                                        # (40, 100)
    b3 = (0.5 * params["b3"] + 0.25 * jnp.sum(w3_raw, axis=1)).reshape(40, 1)
    w3 = jnp.pad(0.25 * w3_raw, ((0, 0), (0, _H2_PAD - 100)))

    w4_raw = params["w4"].reshape(40)                            # (1, 40) -> (40,)
    b4 = (params["b4"] + 0.5 * jnp.sum(w4_raw)).reshape(1, 1)
    w4 = (0.5 * w4_raw).reshape(40, 1)                           # column for the reduce

    # ---- tiling -------------------------------------------------------------
    chunk = _MAX_CHUNK
    while block_m % chunk:
        chunk //= 2                       # 512 -> 256 -> 128 (block_m % 128 == 0)

    # Batch on the lane axis; pad only to the (small) chunk granularity,
    # never to a multiple of block_m.
    n_pad = _round_up(max(n, 1), chunk)
    # Keep blocks large, but aim for >= 2 grid steps when there is enough work
    # (so both v7x TensorCores stay busy); trailing block may be partial.
    bm = min(block_m, max(chunk, _round_up(_cdiv(n_pad, 2), chunk)))
    n_chunks = bm // chunk
    grid = (_cdiv(n_pad, bm),)

    xt = jnp.pad(x.reshape(1, n), ((0, 0), (0, n_pad - n)))

    def full_spec(arr):
        # Whole (tiny, ~34 KB total) weight/bias array resident in VMEM for
        # every grid step (constant index map -> fetched once, never refetched).
        return pl.BlockSpec(arr.shape, lambda i: (0, 0))

    kernel = functools.partial(_mlp_kernel, chunk=chunk, n_chunks=n_chunks)

    out = pl.pallas_call(
        kernel,
        out_shape=jax.ShapeDtypeStruct((1, n_pad), jnp.float32),
        grid_spec=pltpu.PrefetchScalarGridSpec(
            num_scalar_prefetch=0,
            grid=grid,
            in_specs=[
                pl.BlockSpec((1, bm), lambda i: (0, i)),         # x tile
                full_spec(w1), full_spec(b1),
                full_spec(w2), full_spec(b2),
                full_spec(w3), full_spec(b3),
                full_spec(w4), full_spec(b4),
            ],
            out_specs=pl.BlockSpec((1, bm), lambda i: (0, i)),
        ),
        compiler_params=pltpu.CompilerParams(
            # batch axis is embarrassingly parallel -> sharded across the two
            # TensorCores on v7x; near-neutral on v5e/v6e.
            dimension_semantics=("parallel",),
            # tiny tile footprint (<1 MiB); 32 MiB leaves generous headroom for
            # compiler scratch / spill on every generation (v7x has 64 MiB).
            vmem_limit_bytes=32 * 1024 * 1024,
        ),
    )(xt, w1, b1, w2, b2, w3, b3, w4, b4)

    return out[0, :n].reshape(n, 1)


def init_params(key):
    """PyTorch nn.Linear-style init: W (out,in), b (out,), U[-1/sqrt(in), 1/sqrt(in)]."""
    params = {}
    keys = jax.random.split(key, 2 * (len(_DIMS) - 1))
    for li in range(len(_DIMS) - 1):
        fan_in, fan_out = _DIMS[li], _DIMS[li + 1]
        bound = 1.0 / jnp.sqrt(float(fan_in))
        w = jax.random.uniform(keys[2 * li], (fan_out, fan_in),
                               minval=-bound, maxval=bound, dtype=jnp.float32)
        b = jax.random.uniform(keys[2 * li + 1], (fan_out,),
                               minval=-bound, maxval=bound, dtype=jnp.float32)
        params[f"w{li + 1}"] = w
        params[f"b{li + 1}"] = b
    return params


def _reference_forward(x, params):
    """Pure-JAX reference with PyTorch semantics: y = x @ W.T + b, sigmoid hidden."""
    h = x
    for li in range(1, 5):
        h = h @ params[f"w{li}"].T + params[f"b{li}"]
        if li < 4:
            h = jax.nn.sigmoid(h)
    return h


if __name__ == "__main__":
    key = jax.random.PRNGKey(0)
    pkey, xkey = jax.random.split(key)
    params = init_params(pkey)

    # Small batch of scalar inputs, shape (N, 1) as Linear(1, 40) implies.
    x = jax.random.normal(xkey, (8, 1), dtype=jnp.float32)
    y = jax.block_until_ready(net_sigmoid4fat_forward(x, params))
    y_ref = _reference_forward(x, params)
    assert y.shape == (8, 1)
    assert jnp.allclose(y, y_ref, atol=5e-5, rtol=5e-5), \
        float(jnp.max(jnp.abs(y - y_ref)))

    # Larger batch: 2 grid blocks, multi-chunk inner loop, partial last block.
    x2 = jax.random.normal(jax.random.PRNGKey(1), (2500, 1), dtype=jnp.float32)
    y2 = jax.block_until_ready(net_sigmoid4fat_forward(x2, params))
    y2_ref = _reference_forward(x2, params)
    assert y2.shape == (2500, 1)
    assert jnp.allclose(y2, y2_ref, atol=5e-5, rtol=5e-5), \
        float(jnp.max(jnp.abs(y2 - y2_ref)))

    # Non-default (small) block_m exercising the chunk-size fallback path.
    x3 = jax.random.normal(jax.random.PRNGKey(2), (700, 1), dtype=jnp.float32)
    y3 = jax.block_until_ready(net_sigmoid4fat_forward(x3, params, block_m=256))
    y3_ref = _reference_forward(x3, params)
    assert y3.shape == (700, 1)
    assert jnp.allclose(y3, y3_ref, atol=5e-5, rtol=5e-5), \
        float(jnp.max(jnp.abs(y3 - y3_ref)))

    print("KERNEL_OK")
</pallas_src>

<mosaic_0001>
module attributes {stable_mosaic.version = 11 : i64} {
  func.func @_mlp_kernel(%arg0: i32, %arg1: memref<1x512xf32, #tpu.memory_space<vmem>>, %arg2: memref<40x1xf32, #tpu.memory_space<vmem>>, %arg3: memref<40x1xf32, #tpu.memory_space<vmem>>, %arg4: memref<104x40xf32, #tpu.memory_space<vmem>>, %arg5: memref<104x1xf32, #tpu.memory_space<vmem>>, %arg6: memref<40x104xf32, #tpu.memory_space<vmem>>, %arg7: memref<40x1xf32, #tpu.memory_space<vmem>>, %arg8: memref<40x1xf32, #tpu.memory_space<vmem>>, %arg9: memref<1x1xf32, #tpu.memory_space<vmem>>, %arg10: memref<1x512xf32, #tpu.memory_space<vmem>>) attributes {dimension_semantics = [#tpu.dimension_semantics<parallel>], iteration_bounds = array<i64: 1>, scalar_prefetch = 0 : i64, scratch_operands = 0 : i64, tpu.core_type = #tpu.core_type<tc>, window_params = [{transform_indices = @transform_0, window_bounds = array<i64: 1, 512>}, {pipeline_mode = #tpu.pipeline_mode<synchronous>, transform_indices = @transform_1, window_bounds = array<i64: 40, 1>}, {pipeline_mode = #tpu.pipeline_mode<synchronous>, transform_indices = @transform_2, window_bounds = array<i64: 40, 1>}, {pipeline_mode = #tpu.pipeline_mode<synchronous>, transform_indices = @transform_3, window_bounds = array<i64: 104, 40>}, {pipeline_mode = #tpu.pipeline_mode<synchronous>, transform_indices = @transform_4, window_bounds = array<i64: 104, 1>}, {pipeline_mode = #tpu.pipeline_mode<synchronous>, transform_indices = @transform_5, window_bounds = array<i64: 40, 104>}, {pipeline_mode = #tpu.pipeline_mode<synchronous>, transform_indices = @transform_6, window_bounds = array<i64: 40, 1>}, {pipeline_mode = #tpu.pipeline_mode<synchronous>, transform_indices = @transform_7, window_bounds = array<i64: 40, 1>}, {pipeline_mode = #tpu.pipeline_mode<synchronous>, transform_indices = @transform_8, window_bounds = array<i64: 1, 1>}, {transform_indices = @transform_9, window_bounds = array<i64: 1, 512>}]} {
    %c0_i32 = arith.constant 0 : i32
    %c512_i32 = arith.constant 512 : i32
    %0 = arith.muli %c0_i32, %c512_i32 : i32
    %1 = tpu.assume_multiple %0, 512 : i32
    %c0 = arith.constant 0 : index
    %2 = arith.index_cast %1 : i32 to index
    %3 = vector.load %arg1[%c0, %2] : memref<1x512xf32, #tpu.memory_space<vmem>>, vector<1x512xf32>
    %c0_0 = arith.constant 0 : index
    %c0_1 = arith.constant 0 : index
    %4 = vector.load %arg2[%c0_0, %c0_1] : memref<40x1xf32, #tpu.memory_space<vmem>>, vector<40x1xf32>
    %5 = vector.broadcast %4 : vector<40x1xf32> to vector<40x512xf32>
    %6 = vector.broadcast %3 : vector<1x512xf32> to vector<40x512xf32>
    %7 = arith.mulf %5, %6 : vector<40x512xf32>
    %c0_2 = arith.constant 0 : index
    %c0_3 = arith.constant 0 : index
    %8 = vector.load %arg3[%c0_2, %c0_3] : memref<40x1xf32, #tpu.memory_space<vmem>>, vector<40x1xf32>
    %9 = vector.broadcast %8 : vector<40x1xf32> to vector<40x512xf32>
    %10 = arith.addf %7, %9 : vector<40x512xf32>
    %11 = math.tanh %10 : vector<40x512xf32>
    %c0_4 = arith.constant 0 : index
    %c0_5 = arith.constant 0 : index
    %12 = vector.load %arg4[%c0_4, %c0_5] : memref<104x40xf32, #tpu.memory_space<vmem>>, vector<104x40xf32>
    %cst = arith.constant dense<0.000000e+00> : vector<104x512xf32>
    %13 = tpu.matmul %12, %11, %cst {dimension_numbers = #tpu.dot_dimension_numbers<[1], [0], [0], [1], [0, 0, 1, 1], [], []>, precision = #tpu.contract_precision<fp32>} : vector<104x40xf32>, vector<40x512xf32>, vector<104x512xf32> -> vector<104x512xf32>
    %c0_6 = arith.constant 0 : index
    %c0_7 = arith.constant 0 : index
    %14 = vector.load %arg5[%c0_6, %c0_7] : memref<104x1xf32, #tpu.memory_space<vmem>>, vector<104x1xf32>
    %15 = vector.broadcast %14 : vector<104x1xf32> to vector<104x512xf32>
    %16 = arith.addf %13, %15 : vector<104x512xf32>
    %17 = math.tanh %16 : vector<104x512xf32>
    %c0_8 = arith.constant 0 : index
    %c0_9 = arith.constant 0 : index
    %18 = vector.load %arg6[%c0_8, %c0_9] : memref<40x104xf32, #tpu.memory_space<vmem>>, vector<40x104xf32>
    %cst_10 = arith.constant dense<0.000000e+00> : vector<40x512xf32>
    %19 = tpu.matmul %18, %17, %cst_10 {dimension_numbers = #tpu.dot_dimension_numbers<[1], [0], [0], [1], [0, 0, 1, 1], [], []>, precision = #tpu.contract_precision<fp32>} : vector<40x104xf32>, vector<104x512xf32>, vector<40x512xf32> -> vector<40x512xf32>
    %c0_11 = arith.constant 0 : index
    %c0_12 = arith.constant 0 : index
    %20 = vector.load %arg7[%c0_11, %c0_12] : memref<40x1xf32, #tpu.memory_space<vmem>>, vector<40x1xf32>
    %21 = vector.broadcast %20 : vector<40x1xf32> to vector<40x512xf32>
    %22 = arith.addf %19, %21 : vector<40x512xf32>
    %23 = math.tanh %22 : vector<40x512xf32>
    %c0_13 = arith.constant 0 : index
    %c0_14 = arith.constant 0 : index
    %24 = vector.load %arg8[%c0_13, %c0_14] : memref<40x1xf32, #tpu.memory_space<vmem>>, vector<40x1xf32>
    %25 = vector.broadcast %24 : vector<40x1xf32> to vector<40x512xf32>
    %26 = arith.mulf %25, %23 : vector<40x512xf32>
    %cst_15 = arith.constant dense<0.000000e+00> : vector<512xf32>
    %27 = vector.multi_reduction <add>, %26, %cst_15 [0] : vector<40x512xf32> to vector<512xf32>
    %28 = vector.shape_cast %27 : vector<512xf32> to vector<1x512xf32>
    %c0_16 = arith.constant 0 : index
    %c0_17 = arith.constant 0 : index
    %29 = vector.load %arg9[%c0_16, %c0_17] : memref<1x1xf32, #tpu.memory_space<vmem>>, vector<1x1xf32>
    %30 = vector.broadcast %29 : vector<1x1xf32> to vector<1x512xf32>
    %31 = arith.addf %28, %30 : vector<1x512xf32>
    %c0_18 = arith.constant 0 : index
    %32 = arith.index_cast %1 : i32 to index
    %33 = vector.load %arg10[%c0_18, %32] : memref<1x512xf32, #tpu.memory_space<vmem>>, vector<1x512xf32>
    tpu.vector_store %arg10[%c0_18, %32], %31 {strides = array<i32>} : memref<1x512xf32, #tpu.memory_space<vmem>>, vector<1x512xf32>,
    %c1_i32 = arith.constant 1 : i32
    return
  }
  func.func @transform_0(%arg0: i32) -> (i32, i32) {
    %c0_i32 = arith.constant 0 : i32
    %c0_i32_0 = arith.constant 0 : i32
    return %c0_i32, %arg0 : i32, i32
  }
  func.func @transform_1(%arg0: i32) -> (i32, i32) {
    %c0_i32 = arith.constant 0 : i32
    %c0_i32_0 = arith.constant 0 : i32
    %c0_i32_1 = arith.constant 0 : i32
    return %c0_i32, %c0_i32_0 : i32, i32
  }
  func.func @transform_2(%arg0: i32) -> (i32, i32) {
    %c0_i32 = arith.constant 0 : i32
    %c0_i32_0 = arith.constant 0 : i32
    %c0_i32_1 = arith.constant 0 : i32
    return %c0_i32, %c0_i32_0 : i32, i32
  }
  func.func @transform_3(%arg0: i32) -> (i32, i32) {
    %c0_i32 = arith.constant 0 : i32
    %c0_i32_0 = arith.constant 0 : i32
    %c0_i32_1 = arith.constant 0 : i32
    return %c0_i32, %c0_i32_0 : i32, i32
  }
  func.func @transform_4(%arg0: i32) -> (i32, i32) {
    %c0_i32 = arith.constant 0 : i32
    %c0_i32_0 = arith.constant 0 : i32
    %c0_i32_1 = arith.constant 0 : i32
    return %c0_i32, %c0_i32_0 : i32, i32
  }
  func.func @transform_5(%arg0: i32) -> (i32, i32) {
    %c0_i32 = arith.constant 0 : i32
    %c0_i32_0 = arith.constant 0 : i32
    %c0_i32_1 = arith.constant 0 : i32
    return %c0_i32, %c0_i32_0 : i32, i32
  }
  func.func @transform_6(%arg0: i32) -> (i32, i32) {
    %c0_i32 = arith.constant 0 : i32
    %c0_i32_0 = arith.constant 0 : i32
    %c0_i32_1 = arith.constant 0 : i32
    return %c0_i32, %c0_i32_0 : i32, i32
  }
  func.func @transform_7(%arg0: i32) -> (i32, i32) {
    %c0_i32 = arith.constant 0 : i32
    %c0_i32_0 = arith.constant 0 : i32
    %c0_i32_1 = arith.constant 0 : i32
    return %c0_i32, %c0_i32_0 : i32, i32
  }
  func.func @transform_8(%arg0: i32) -> (i32, i32) {
    %c0_i32 = arith.constant 0 : i32
    %c0_i32_0 = arith.constant 0 : i32
    %c0_i32_1 = arith.constant 0 : i32
    return %c0_i32, %c0_i32_0 : i32, i32
  }
  func.func @transform_9(%arg0: i32) -> (i32, i32) {
    %c0_i32 = arith.constant 0 : i32
    %c0_i32_0 = arith.constant 0 : i32
    return %c0_i32, %arg0 : i32, i32
  }
}

</mosaic_0001>

<bundles_post_ra>
// kernel: net_sigmoid4fat_forward.1
= control target key start
LH: loop header
LB: loop body
LE: loop exit
PB: predicated region body
PF: predicated region fallthrough
CT: control target
= control target key end

     0   :  { %v5837_v0 = vmov 0   ;;  %v7792_v26 = vmov 0.0   ;;  %v7786_v37 = vlaneseq  ;;  %vm267_vm0 = vcmask 326656   ;;  %s7776_s2 = inlined_call_operand.vmem [shape: f32[40,1], index: 2, kind: input, shape index: {}]   ;;  %s7777_s1 = inlined_call_operand.vmem [shape: f32[40,1], index: 1, kind: input, shape index: {}]   ;;  %s7778_s8 = inlined_call_operand.<no memory space> [shape: f32[1,1], index: 8, kind: input, shape index: {}]   ;;  %s7779_s4 = inlined_call_operand.vmem [shape: f32[104,1], index: 4, kind: input, shape index: {}]   ;;  %s7780_s6 = inlined_call_operand.vmem [shape: f32[40,1], index: 6, kind: input, shape index: {}]   ;;  %s7781_s7 = inlined_call_operand.vmem [shape: f32[40,1], index: 7, kind: input, shape index: {}]   ;;  %s7782_s3 = inlined_call_operand.vmem [shape: f32[104,40], index: 3, kind: input, shape index: {}]   ;;  %s7783_s0 = inlined_call_operand.vmem [shape: f32[1,512], index: 0, kind: input, shape index: {}]   ;;  %s7784_s5 = inlined_call_operand.vmem [shape: f32[40,104], index: 5, kind: input, shape index: {}]   ;;  %s7785_s9 = inlined_call_operand.vmem [shape: f32[1,512], index: 9, kind: output, shape index: {}]  }
   0x1   :  { %5652 = vset.pattern.permute.xlu1 %v5837_v0  ;;  %5651 = vset.pattern.permute.xlu0 %v5837_v0  ;;  %v106_v1 = vld [vmem:[%s7776_s2] sm:$0xff]  ;;  %v14_v3 = vstv %s7778_s8  ;;  %v107_v4 = vld [vmem:[%s7776_s2 + $0x8] sm:$0xff]  ;;  %v38_v6 = vld [vmem:[%s7777_s1 + $0x18] sm:$0xff]  ;;  %vm2708_vm1 = vcmask 850944  }
   0x2   :  { %v35_v2 = vld [vmem:[%s7777_s1] sm:$0xff]  ;;  %113 = vperm.xlu1 %5652, %v106_v1   ;;  %15 = vst [vmem:[#allocation2] sm:$0x1] %v14_v3  ;;  %v36_v5 = vld [vmem:[%s7777_s1 + $0x8] sm:$0xff]  ;;  %v37_v7 = vld [vmem:[%s7777_s1 + $0x10] sm:$0xff]  ;;  %381 = vmatprep.mubr.f32.mxu0 %v7792_v26  ;;  %v6004_v41 = vshrl.u32 %v7786_v37, 7 }
   0x3   :  { %42 = vperm.xlu0 %5651, %v35_v2   ;;  %v109_v8 = vld [vmem:[%s7776_s2 + $0x18] sm:$0xff]  ;;  %v108_v9 = vld [vmem:[%s7776_s2 + $0x10] sm:$0xff]  ;;  %v110_v10 = vld [vmem:[%s7776_s2 + $0x20] sm:$0xff]  ;;  %1538 = vmatprep.mubr.f32.mxu1 %v7792_v26 }
   0x4   :  { %v39_v11 = vld [vmem:[%s7777_s1 + $0x20] sm:$0xff]  ;;  %v190_v12 = vld [vmem:[%s7779_s4 + $0x8] sm:$0xff]  ;;  %v192_v14 = vld [vmem:[%s7779_s4 + $0x18] sm:$0xff]  ;;  %8023 = vst [vmem:[#allocation3_spill] sm:$0xff] %v6004_v41  ;;  %v7787_v48 = vsub.s32 0, %v6004_v41  ;;  %v72_v49 = vsub.s32 1, %v6004_v41 }
   0x5   :  { %v189_v13 = vld [vmem:[%s7779_s4] sm:$0xff]  ;;  %v191_v15 = vld [vmem:[%s7779_s4 + $0x10] sm:$0xff]  ;;  %v194_v16 = vld [vmem:[%s7779_s4 + $0x28] sm:$0xff]  ;;  %v76_v50 = vsub.s32 2, %v6004_v41  ;;  %v80_v51 = vsub.s32 3, %v6004_v41 }
   0x6   :  { %118 = vperm.xlu1 %5652, %v107_v4   ;;  %v193_v17 = vld [vmem:[%s7779_s4 + $0x20] sm:$0xff]  ;;  %v196_v18 = vld [vmem:[%s7779_s4 + $0x38] sm:$0xff]  ;;  %v195_v19 = vld [vmem:[%s7779_s4 + $0x30] sm:$0xff] }
   0x7   :  { %47 = vperm.xlu0 %5651, %v36_v5   ;;  %v198_v20 = vld [vmem:[%s7779_s4 + $0x48] sm:$0xff]  ;;  %v197_v21 = vld [vmem:[%s7779_s4 + $0x40] sm:$0xff]  ;;  %v200_v22 = vld [vmem:[%s7779_s4 + $0x58] sm:$0xff] }
   0x8   :  { %v199_v23 = vld [vmem:[%s7779_s4 + $0x50] sm:$0xff]  ;;  %v2678_v24 = vld [vmem:[%s7780_s6] sm:$0xff]  ;;  %v2679_v28 = vld [vmem:[%s7780_s6 + $0x8] sm:$0xff] }
   0x9   :  { %v201_v25 = vld [vmem:[%s7779_s4 + $0x60] sm:$0xff]  ;;  %v2680_v27 = vld [vmem:[%s7780_s6 + $0x10] sm:$0xff]  ;;  %v2681_v30 = vld [vmem:[%s7780_s6 + $0x18] sm:$0xff] }
   0xa   :  { %57 = vperm.xlu1 %5652, %v38_v6   ;;  %v2682_v29 = vld [vmem:[%s7780_s6 + $0x20] sm:$0xff]  ;;  %v4691_v31 = vld [vmem:[%s7781_s7 + $0x8] sm:$0xff]  ;;  %v4693_v33 = vld [vmem:[%s7781_s7 + $0x18] sm:$0xff] }
   0xb   :  { %52 = vperm.xlu0 %5651, %v37_v7   ;;  %v4690_v32 = vld [vmem:[%s7781_s7] sm:$0xff]  ;;  %v4692_v34 = vld [vmem:[%s7781_s7 + $0x10] sm:$0xff]  ;;  %v177_v39 = vld [vmem:[%s7782_s3 + $0x8] sm:$0xff] }
   0xc   :  { %v4780_v35 = vld [vmem:[#allocation2] sm:$0x1]  ;;  %v178_v40 = vld [vmem:[%s7782_s3 + $0x10] sm:$0xff]  ;;  %v272_v43 = vsel %vm267_vm0, %v177_v39, 0  ;;  %v179_v47 = vld [vmem:[%s7782_s3 + $0x18] sm:$0xff] }
   0xd   :  { %v4694_v36 = vld [vmem:[%s7781_s7 + $0x20] sm:$0xff]  ;;  %v275_v44 = vsel %vm267_vm0, %v178_v40, 0  ;;  %v6011_v46 = vand.u32 4294901760, %v272_v43  ;;  %v278_v54 = vsel %vm267_vm0, %v179_v47, 0 }
   0xe   :  { %128 = vperm.xlu1 %5652, %v109_v8   ;;  %v176_v38 = vld [vmem:[%s7782_s3] sm:$0xff]  ;;  %v6023_v53 = vand.u32 4294901760, %v275_v44  ;;  %v6048_v63 = vand.u32 4294901760, %v278_v54 }
   0xf   :  { %123 = vperm.xlu0 %5651, %v108_v9   ;;  %v269_v42 = vsel %vm267_vm0, %v176_v38, 0  ;;  %v34_v52 = vld [vmem:[%s7783_s0] sm:$0xf]  ;;  %v6030_v56 = vsub.f32 %v272_v43, %v6011_v46 }
  0x10   :  { %v6009_v45 = vand.u32 4294901760, %v269_v42  ;;  %v6034_v57 = vrot.slane %v34_v52, %v7787_v48  ;;  %v6036_v58 = vrot.slane %v34_v52, %v72_v49  ;;  %v6038_v59 = vrot.slane %v34_v52, %v76_v50  ;;  %v180_v61 = vld [vmem:[%s7782_s3 + $0x20] sm:$0xff] }
  0x11   :  { %8024 = vst [vmem:[#allocation4_spill] sm:$0xff] %v6030_v56  ;;  %v6040_v60 = vrot.slane %v34_v52, %v80_v51  ;;  %v6046_v62 = vsub.f32 %v275_v44, %v6023_v53  ;;  %v6054_v3 = vand.u32 4294901760, %v6030_v56  ;;  %v281_v4 = vsel %vm267_vm0, %v180_v61, 0 }
  0x12   :  { %133 = vperm.xlu1 %5652, %v110_v10   ;;  %v6027_v55 = vsub.f32 %v269_v42, %v6009_v45  ;;  %v6065_v10 = vsub.f32 %v278_v54, %v6048_v63  ;;  %v182_v54 = vld [vmem:[%s7782_s3 + $0x30] sm:$0xff] }
  0x13   :  { %62 = vperm.xlu0 %5651, %v39_v11   ;;  %8025 = vst [vmem:[#allocation5_spill] sm:$0xff] %v6046_v62  ;;  %8027 = vst [vmem:[#allocation7_spill] sm:$0xff] %v6054_v3  ;;  %v6062_v9 = vand.u32 4294901760, %v6046_v62 }
  0x14   :  { %v6051_v2 = vand.u32 4294901760, %v6027_v55 }
  0x15   :  { %8028 = vst [vmem:[#allocation8_spill] sm:$0xff] %v6062_v9 }
  0x16   :  { %209 = vperm.xlu1 %5652, %v190_v12   ;;  %8026 = vst [vmem:[#allocation6_spill] sm:$0xff] %v6051_v2 }
  0x17   :  { %204 = vperm.xlu0 %5651, %v189_v13  }
  0x1a   :  { %219 = vperm.xlu1 %5652, %v192_v14  }
  0x1b   :  { %214 = vperm.xlu0 %5651, %v191_v15  }
  0x1e   :  { %229 = vperm.xlu1 %5652, %v194_v16  }
  0x1f   :  { %224 = vperm.xlu0 %5651, %v193_v17   ;;  %v385_v17 = vsub.f32 %v6027_v55, %v6051_v2 }
  0x22   :  { %239 = vperm.xlu1 %5652, %v196_v18   ;;  %v396_v18 = vsub.f32 %v6030_v56, %v6054_v3 }
  0x23   :  { %234 = vperm.xlu0 %5651, %v195_v19   ;;  %v6071_v19 = vand.u32 4294901760, %v281_v4 }
  0x26   :  { %249 = vperm.xlu1 %5652, %v198_v20  }
  0x27   :  { %244 = vperm.xlu0 %5651, %v197_v21  }
  0x2a   :  { %259 = vperm.xlu1 %5652, %v200_v22  }
  0x2b   :  { %254 = vperm.xlu0 %5651, %v199_v23  }
  0x2e   :  { %2685 = vperm.xlu1 %5652, %v2678_v24   ;;  %v407_v24 = vsub.f32 %v6046_v62, %v6062_v9 }
  0x2f   :  { %264 = vperm.xlu0 %5651, %v201_v25   ;;  %v6080_v25 = vand.u32 4294901760, %v6065_v10 }
  0x30   :  { %v6092_v38 = vand.u32 4294901760, %v407_v24 }
  0x31   :  { %8029 = vst [vmem:[#allocation9_spill] sm:$0xff] %v6080_v25 }
  0x32   :  { %2695 = vperm.xlu1 %5652, %v2680_v27  }
  0x33   :  { %2690 = vperm.xlu0 %5651, %v2679_v28  }
  0x36   :  { %2705 = vperm.xlu1 %5652, %v2682_v29  }
  0x37   :  { %2700 = vperm.xlu0 %5651, %v2681_v30   ;;  %v181_v30 = vld [vmem:[%s7782_s3 + $0x28] sm:$0xff] }
  0x38   :  { %v6097_v40 = vsel %vm267_vm0, %v181_v30, 0 }
  0x3a   :  { %4702 = vperm.xlu1 %5652, %v4691_v31  }
  0x3b   :  { %4697 = vperm.xlu0 %5651, %v4690_v32  }
  0x3e   :  { %4712 = vperm.xlu1 %5652, %v4693_v33  }
  0x3f   :  { %4707 = vperm.xlu0 %5651, %v4692_v34   ;;  %v6086_v34 = vsub.f32 %v281_v4, %v6071_v19 }
  0x41   :  { %v6105_v52 = vand.u32 4294901760, %v6086_v34 }
  0x42   :  { %4783 = vperm.xlu1 %5652, %v4780_v35   ;;  %v6088_v35 = vand.u32 4294901760, %v385_v17 }
  0x43   :  { %4717 = vperm.xlu0 %5651, %v4694_v36   ;;  %v6090_v36 = vand.u32 4294901760, %v396_v18  ;;  %8030 = vst [vmem:[#allocation10_spill] sm:$0xff] %v6105_v52 }
  0x81   :  { %v114_v0 = vpop.permute.xlu1 %113 }
  0x82   :  { %v43_v1 = vpop.permute.xlu0 %42 }
  0x83   :  { %v86_v5 = vmul.f32 %v6034_v57, %v43_v1  ;;  %v87_v6 = vmul.f32 %v6036_v58, %v43_v1  ;;  %v88_v7 = vmul.f32 %v6038_v59, %v43_v1  ;;  %v89_v8 = vmul.f32 %v6040_v60, %v43_v1 }
  0x85   :  { %v136_v11 = vadd.f32 %v114_v0, %v86_v5  ;;  %v137_v12 = vadd.f32 %v114_v0, %v87_v6  ;;  %v138_v13 = vadd.f32 %v114_v0, %v88_v7  ;;  %v139_v14 = vadd.f32 %v114_v0, %v89_v8  ;;  %v119_v15 = vpop.permute.xlu1 %118 }
  0x86   :  { %v48_v16 = vpop.permute.xlu0 %47  ;;  %v6114_v8 = vand.u32 4294901760, %v6097_v40 }
  0x87   :  { %5653 = vtanh.f32 %v136_v11  ;;  %v90_v20 = vmul.f32 %v6034_v57, %v48_v16  ;;  %v91_v21 = vmul.f32 %v6036_v58, %v48_v16  ;;  %v92_v22 = vmul.f32 %v6038_v59, %v48_v16 }
  0x88   :  { %5655 = vtanh.f32 %v137_v12  ;;  %v93_v23 = vmul.f32 %v6040_v60, %v48_v16 }
  0x89   :  { %5657 = vtanh.f32 %v138_v13  ;;  %v140_v27 = vadd.f32 %v119_v15, %v90_v20  ;;  %v141_v28 = vadd.f32 %v119_v15, %v91_v21  ;;  %v142_v29 = vadd.f32 %v119_v15, %v92_v22  ;;  %v58_v32 = vpop.permute.xlu1 %57 }
  0x8a   :  { %5659 = vtanh.f32 %v139_v14  ;;  %v143_v31 = vadd.f32 %v119_v15, %v93_v23  ;;  %v53_v33 = vpop.permute.xlu0 %52  ;;  %v98_v42 = vmul.f32 %v6034_v57, %v58_v32  ;;  %v99_v43 = vmul.f32 %v6036_v58, %v58_v32 }
  0x8b   :  { %5661 = vtanh.f32 %v140_v27  ;;  %v100_v44 = vmul.f32 %v6038_v59, %v58_v32  ;;  %v101_v47 = vmul.f32 %v6040_v60, %v58_v32  ;;  %v94_v49 = vmul.f32 %v6034_v57, %v53_v33 }
  0x8c   :  { %5663 = vtanh.f32 %v141_v28  ;;  %v95_v61 = vmul.f32 %v6036_v58, %v53_v33  ;;  %v96_v5 = vmul.f32 %v6038_v59, %v53_v33  ;;  %v97_v6 = vmul.f32 %v6040_v60, %v53_v33 }
  0x8d   :  { %5665 = vtanh.f32 %v142_v29  ;;  %v129_v50 = vpop.permute.xlu1 %128  ;;  %v6117_v14 = vsel %vm267_vm0, %v182_v54, 0 }
  0x8e   :  { %5667 = vtanh.f32 %v143_v31  ;;  %v124_v51 = vpop.permute.xlu0 %123  ;;  %v148_v0 = vadd.f32 %v129_v50, %v98_v42  ;;  %v149_v1 = vadd.f32 %v129_v50, %v99_v43  ;;  %v150_v4 = vadd.f32 %v129_v50, %v100_v44 }
  0x8f   :  { %v151_v7 = vadd.f32 %v129_v50, %v101_v47  ;;  %v144_v12 = vadd.f32 %v124_v51, %v94_v49  ;;  %v145_v13 = vadd.f32 %v124_v51, %v95_v61  ;;  %v146_v16 = vadd.f32 %v124_v51, %v96_v5 }
  0x90   :  { %5669 = vtanh.f32 %v148_v0  ;;  %v147_v17 = vadd.f32 %v124_v51, %v97_v6 }
  0x91   :  { %v5654_v11 = vpop.eup %5653  ;;  %5671 = vtanh.f32 %v149_v1  ;;  %v134_v28 = vpop.permute.xlu1 %133 }
  0x92   :  { %v5656_v15 = vpop.eup %5655  ;;  %v63_v18 = vpop.permute.xlu0 %62  ;;  %v309_v20 = vand.u32 4294901760, %v5654_v11  ;;  %5673 = vtanh.f32 %v150_v4 }
  0x93   :  { %v5658_v21 = vpop.eup %5657  ;;  %v102_v22 = vmul.f32 %v6034_v57, %v63_v18  ;;  %v103_v23 = vmul.f32 %v6036_v58, %v63_v18  ;;  %v104_v24 = vmul.f32 %v6038_v59, %v63_v18  ;;  %5675 = vtanh.f32 %v151_v7 }
  0x94   :  { %v5660_v27 = vpop.eup %5659  ;;  %v105_v29 = vmul.f32 %v6040_v60, %v63_v18  ;;  %v307_v30 = vand.u32 4294901760, %v5656_v15  ;;  %v6123_v31 = vsub.f32 %v5654_v11, %v309_v20  ;;  %5677 = vtanh.f32 %v144_v12 }
  0x95   :  { %v5662_v32 = vpop.eup %5661  ;;  %v152_v33 = vadd.f32 %v134_v28, %v102_v22  ;;  %v153_v42 = vadd.f32 %v134_v28, %v103_v23  ;;  %v154_v43 = vadd.f32 %v134_v28, %v104_v24  ;;  %5679 = vtanh.f32 %v145_v13 }
  0x96   :  { %v5664_v44 = vpop.eup %5663  ;;  %v155_v57 = vadd.f32 %v134_v28, %v105_v29  ;;  %v6125_v47 = vsub.f32 %v5656_v15, %v307_v30  ;;  %v1464_v58 = vand.u32 4294901760, %v5660_v27  ;;  %5681 = vtanh.f32 %v146_v16 }
  0x97   :  { %v5666_v59 = vpop.eup %5665  ;;  %v311_v49 = vand.u32 4294901760, %v5664_v44  ;;  %v313_v50 = vand.u32 4294901760, %v5662_v32  ;;  %v1466_v51 = vand.u32 4294901760, %v5658_v21  ;;  %5683 = vtanh.f32 %v147_v17 }
  0x98   :  { %v5668_v60 = vpop.eup %5667  ;;  %v6127_v54 = vsub.f32 %v5660_v27, %v1464_v58  ;;  %v1470_v61 = vand.u32 4294901760, %v5666_v59  ;;  %v7790_v0 = vand.u32 4294901760, %v6125_v47  ;;  %5685 = vtanh.f32 %v152_v33 }
  0x99   :  { %v6130_v1 = vpack.c.bf16 %v311_v49, %v307_v30  ;;  %v6132_v4 = vsub.f32 %v5664_v44, %v311_v49  ;;  %v1468_v5 = vand.u32 4294901760, %v5668_v60  ;;  %5687 = vtanh.f32 %v153_v42 }
  0x9a   :  { %v6134_v6 = vpack.c.bf16 %v313_v50, %v309_v20  ;;  %v6136_v7 = vsub.f32 %v5662_v32, %v313_v50  ;;  %v6138_v11 = vpack.c.bf16 %v1470_v61, %v1466_v51  ;;  %v5670_v12 = vpop.eup %5669  ;;  %5689 = vtanh.f32 %v154_v43 }
  0x9b   :  { %4833 = vmatprep.subr.bf16.mxu0 %v6130_v1  ;;  %v6141_v13 = vpack.c.bf16 %v1468_v5, %v1464_v58  ;;  %v6143_v15 = vsub.f32 %v5668_v60, %v1468_v5  ;;  %v6145_v16 = vsub.f32 %v5658_v21, %v1466_v51  ;;  %v5672_v17 = vpop.eup %5671  ;;  %5691 = vtanh.f32 %v155_v57 }
  0x9c   :  { %8031 = vst [vmem:[#allocation11_spill] sm:$0xff] %v6138_v11  ;;  %4835 = vmatpush1.bf16.msra.mxu0 %v6134_v6  ;;  %v6148_v18 = vsub.f32 %v5666_v59, %v1470_v61  ;;  %v321_v20 = vand.u32 4294901760, %v5670_v12  ;;  %v528_v22 = vsub.f32 %v6125_v47, %v7790_v0  ;;  %v5674_v23 = vpop.eup %5673  ;;  %v319_v24 = vand.u32 4294901760, %v5672_v17 }
  0x9d   :  { %4881 = vmatprep.subr.bf16.mxu1 %v6141_v13  ;;  %v7789_v27 = vand.u32 4294901760, %v6132_v4  ;;  %v7788_v21 = vand.u32 4294901760, %v6127_v54  ;;  %v7791_v28 = vand.u32 4294901760, %v6143_v15  ;;  %v5676_v29 = vpop.eup %5675  ;;  %v1478_v32 = vand.u32 4294901760, %v5674_v23 }
  0x9e   :  { %4883 = vmatpush1.bf16.msra.mxu1 %v6138_v11  ;;  %v6158_v30 = vsub.f32 %v5670_v12, %v321_v20  ;;  %v529_v33 = vand.u32 4294901760, %v528_v22  ;;  %v7794_v42 = vand.u32 4294901760, %v6123_v31  ;;  %v5678_v43 = vpop.eup %5677  ;;  %v6161_v44 = vsub.f32 %v5672_v17, %v319_v24 }
  0x9f   :  { %v1476_v57 = vand.u32 4294901760, %v5676_v29  ;;  %v540_v58 = vsub.f32 %v6132_v4, %v7789_v27  ;;  %v1685_v59 = vsub.f32 %v6127_v54, %v7788_v21  ;;  %v5680_v49 = vpop.eup %5679  ;;  %v317_v50 = vand.u32 4294901760, %v5678_v43 }
  0xa0   :  { %v6169_v51 = vsub.f32 %v5674_v23, %v1478_v32  ;;  %v1697_v60 = vsub.f32 %v6143_v15, %v7791_v28  ;;  %v534_v61 = vsub.f32 %v6123_v31, %v7794_v42  ;;  %v5682_v5 = vpop.eup %5681  ;;  %v315_v12 = vand.u32 4294901760, %v5680_v49 }
  0xa1   :  { %v6177_v17 = vsub.f32 %v5676_v29, %v1476_v57  ;;  %v541_v22 = vand.u32 4294901760, %v540_v58  ;;  %v1686_v37 = vand.u32 4294901760, %v1685_v59  ;;  %v5684_v48 = vpop.eup %5683  ;;  %v6179_v21 = vpack.c.bf16 %v321_v20, %v317_v50 }
  0xa2   :  { %v6181_v27 = vsub.f32 %v5678_v43, %v317_v50  ;;  %v1474_v23 = vand.u32 4294901760, %v5682_v5  ;;  %v1698_v0 = vand.u32 4294901760, %v1697_v60  ;;  %v6183_v39 = vpop.eup %5685  ;;  %v6185_v28 = vpack.c.bf16 %v319_v24, %v315_v12 }
  0xa3   :  { %8032 = vst [vmem:[#allocation12_spill] sm:$0xff] %v6179_v21  ;;  %v6187_v26 = vsub.f32 %v5680_v49, %v315_v12  ;;  %v1472_v42 = vand.u32 4294901760, %v5684_v48  ;;  %v4840_v41 = vpack.c.bf16 %v541_v22, %v529_v33  ;;  %v5688_v9 = vpop.eup %5687  ;;  %v6194_v20 = vand.u32 4294901760, %v6183_v39 }
  0xa4   :  { %8033 = vst [vmem:[#allocation13_spill] sm:$0xff] %v6185_v28  ;;  %v6189_v29 = vpack.c.bf16 %v1478_v32, %v1474_v23  ;;  %v6191_v58 = vsub.f32 %v5682_v5, %v1474_v23  ;;  %v4888_v43 = vpack.c.bf16 %v1698_v0, %v1686_v37  ;;  %v6196_v59 = vpop.eup %5689  ;;  %4837 = vmatprep.subr.bf16.mxu0 %v6185_v28  ;;  %v6203_v49 = vand.u32 4294901760, %v5688_v9 }
  0xa5   :  { %v6199_v50 = vpack.c.bf16 %v1476_v57, %v1472_v42  ;;  %v6201_v24 = vsub.f32 %v5684_v48, %v1472_v42  ;;  %v535_v33 = vand.u32 4294901760, %v534_v61  ;;  %v5692_v60 = vpop.eup %5691  ;;  %4839 = vmatpush1.bf16.msra.mxu0 %v6179_v21  ;;  %v6207_v32 = vand.u32 4294901760, %v6196_v59 }
  0xa6   :  { %8034 = vst [vmem:[#allocation14_spill] sm:$0xff] %v6189_v29  ;;  %v7801_v5 = vand.u32 4294901760, %v6136_v7  ;;  %v7804_v37 = vand.u32 4294901760, %v6145_v16  ;;  %v7807_v0 = vand.u32 4294901760, %v6148_v18  ;;  %324 = vmatprep.subr.mxu0 %v6203_v49  ;;  %v6214_v48 = vand.u32 4294901760, %v5692_v60 }
  0xa7   :  { %8035 = vst [vmem:[#allocation15_spill] sm:$0xff] %v6199_v50  ;;  %4885 = vmatprep.subr.bf16.mxu1 %v6199_v50  ;;  %v8036_v61 = vand.u32 4294901760, %v6187_v26  ;;  %v8037_v3 = vand.u32 4294901760, %v6161_v44  ;;  %v8038_v2 = vand.u32 4294901760, %v6201_v24  ;;  %v557_v62 = vand.u32 4294901760, %v6181_v27 }
  0xa8   :  { %4887 = vmatpush1.bf16.msra.mxu1 %v6189_v29  ;;  %v546_v12 = vsub.f32 %v6136_v7, %v7801_v5  ;;  %v1691_v22 = vsub.f32 %v6145_v16, %v7804_v37  ;;  %v1703_v23 = vsub.f32 %v6148_v18, %v7807_v0  ;;  %v8039_v21 = vand.u32 4294901760, %v6177_v17 }
  0xa9   :  { %1481 = vmatprep.subr.mxu1 %v6214_v48  ;;  %v552_v57 = vsub.f32 %v6187_v26, %v8036_v61  ;;  %v564_v5 = vsub.f32 %v6161_v44, %v8037_v3  ;;  %v1709_v37 = vsub.f32 %v6201_v24, %v8038_v2  ;;  %326 = vmatpush1.msra.mxu0 %v6194_v20  ;;  %v7826_v11 = vand.u32 4294901760, %v6158_v30 }
  0xaa   :  { %v547_v0 = vand.u32 4294901760, %v546_v12  ;;  %v1692_v42 = vand.u32 4294901760, %v1691_v22  ;;  %v1704_v29 = vand.u32 4294901760, %v1703_v23  ;;  %v1721_v56 = vsub.f32 %v6177_v17, %v8039_v21  ;;  %387 = vmatmul.mubr.f32.vlgmr.msra.gmra.mrb[0].mxu0 %v6088_v35  ;;  %4841 = vmatprep.subr.bf16.mxu0 %v4840_v41 }
  0xab   :  { %v553_v61 = vand.u32 4294901760, %v552_v57  ;;  %v565_v3 = vand.u32 4294901760, %v564_v5  ;;  %v1710_v50 = vand.u32 4294901760, %v1709_v37  ;;  %v558_v2 = vsub.f32 %v6181_v27, %v557_v62 }
  0xac   :  { %1483 = vmatpush1.msra.mxu1 %v6207_v32  ;;  %v4842_v28 = vpack.c.bf16 %v547_v0, %v535_v33  ;;  %v4890_v12 = vpack.c.bf16 %v1704_v29, %v1692_v42  ;;  %v1722_v22 = vand.u32 4294901760, %v1721_v56  ;;  %v8040_v23 = vmov 0.0  }
  0xad   :  { %392 = vmatprep.mubr.f32.mxu0 %v8040_v23  ;;  %1544 = vmatmul.mubr.f32.vlgmr.msra.gmra.mrb[0].mxu1 %v6088_v35  ;;  %v4844_v41 = vpack.c.bf16 %v565_v3, %v553_v61  ;;  %v7825_v21 = vand.u32 4294901760, %v6191_v58  ;;  %v7824_v5 = vand.u32 4294901760, %v6169_v51  ;;  %v6257_v37 = vsub.f32 %v6097_v40, %v6114_v8 }
  0xae   :  { %4889 = vmatprep.subr.bf16.mxu1 %v4888_v43  ;;  %4843 = vmatpush1.bf16.msra.mxu0 %v4842_v28  ;;  %v4892_v29 = vpack.c.bf16 %v1722_v22, %v1710_v50  ;;  %v559_v56 = vand.u32 4294901760, %v558_v2  ;;  %v570_v33 = vsub.f32 %v6158_v30, %v7826_v11  ;;  %v6263_v35 = vsub.f32 %v5688_v9, %v6203_v49  ;;  %v183_v43 = vld [vmem:[%s7782_s3 + $0x38] sm:$0xff] }
  0xaf   :  { %4891 = vmatpush1.bf16.msra.mxu1 %v4890_v12  ;;  %4845 = vmatprep.subr.bf16.mxu0 %v4844_v41  ;;  %v1715_v40 = vsub.f32 %v6191_v58, %v7825_v21  ;;  %v1727_v28 = vsub.f32 %v6169_v51, %v7824_v5  ;;  %v6276_v50 = vsub.f32 %v5692_v60, %v6214_v48  ;;  %v6279_v9 = vand.u32 4294901760, %v6117_v14 }
  0xb0   :  { %1549 = vmatprep.mubr.f32.mxu1 %v8040_v23  ;;  %4893 = vmatprep.subr.bf16.mxu1 %v4892_v29  ;;  %v571_v0 = vand.u32 4294901760, %v570_v33  ;;  %v7823_v42 = vand.u32 4294901760, %v6263_v35  ;;  %v6285_v57 = vsub.f32 %v6183_v39, %v6194_v20  ;;  %v6289_v61 = vsub.f32 %v6196_v59, %v6207_v32 }
  0xb1   :  { %398 = vmatmul.mubr.f32.gmra.mrb[2].mxu0 %v6090_v36  ;;  %1555 = vmatmul.mubr.f32.gmra.mrb[2].mxu1 %v6090_v36  ;;  %v1716_v60 = vand.u32 4294901760, %v1715_v40  ;;  %v1728_v3 = vand.u32 4294901760, %v1727_v28  ;;  %v7820_v2 = vand.u32 4294901760, %v6276_v50  ;;  %v290_v12 = vsel %vm267_vm0, %v183_v43, 0  ;;  %v184_v36 = vld [vmem:[%s7782_s3 + $0x40] sm:$0xff] }
  0xb2   :  { %403 = vmatprep.mubr.f32.mxu0 %v8040_v23  ;;  %v4846_v22 = vpack.c.bf16 %v571_v0, %v559_v56  ;;  %v576_v39 = vsub.f32 %v6263_v35, %v7823_v42  ;;  %1560 = vmatprep.mubr.f32.mxu1 %v8040_v23  ;;  %v7821_v59 = vand.u32 4294901760, %v6285_v57  ;;  %v7822_v41 = vand.u32 4294901760, %v6289_v61 }
  0xb3   :  { %v4894_v29 = vpack.c.bf16 %v1728_v3, %v1716_v60  ;;  %v1733_v33 = vsub.f32 %v6276_v50, %v7820_v2  ;;  %v8041_v56 = vsub.f32 %v6065_v10, %v6080_v25  ;;  %v429_v40 = vsub.f32 %v6086_v34, %v6105_v52 }
  0xb4   :  { %4847 = vmatpush1.bf16.msra.mxu0 %v4846_v22  ;;  %v577_v28 = vand.u32 4294901760, %v576_v39  ;;  %v582_v0 = vsub.f32 %v6285_v57, %v7821_v59  ;;  %v1739_v60 = vsub.f32 %v6289_v61, %v7822_v41  ;;  %v6319_v3 = vand.u32 4294901760, %v6257_v37 }
  0xb5   :  { %v419_v43 = vand.u32 4294901760, %v8041_v56  ;;  %4895 = vmatpush1.bf16.msra.mxu1 %v4894_v29  ;;  %v1734_v2 = vand.u32 4294901760, %v1733_v33  ;;  %409 = vmatmul.mubr.f32.gmra.mrb[4].mxu0 %v6092_v38  ;;  %v6324_v56 = vsub.f32 %v6117_v14, %v6279_v9  ;;  %v6326_v22 = vand.u32 4294901760, %v290_v12 }
  0xb6   :  { %8042 = vst [vmem:[#allocation16_spill] sm:$0xff] %v6319_v3  ;;  %v293_v39 = vsel %vm267_vm0, %v184_v36, 0  ;;  %578 = vmatprep.subr.mxu0 %v577_v28  ;;  %1566 = vmatmul.mubr.f32.gmra.mrb[4].mxu1 %v6092_v38  ;;  %v583_v59 = vand.u32 4294901760, %v582_v0  ;;  %v4848_v41 = vpack.c.bf16 %v6132_v4, %v6125_v47  ;;  %v4896_v29 = vpack.c.bf16 %v6143_v15, %v6127_v54 }
  0xb7   :  { %v8043_v33 = vand.u32 4294901760, %v6125_v47  ;;  %v8044_v42 = vand.u32 4294901760, %v6132_v4  ;;  %1735 = vmatprep.subr.mxu1 %v1734_v2  ;;  %v1740_v5 = vand.u32 4294901760, %v1739_v60  ;;  %414 = vmatprep.mubr.f32.mxu0 %v8040_v23  ;;  %v8045_v36 = vand.u32 4294901760, %v6127_v54  ;;  %v185_v54 = vld [vmem:[%s7782_s3 + $0x48] sm:$0xff] }
  0xb8   :  { %v8046_v38 = vand.u32 4294901760, %v6143_v15  ;;  %v8047_v0 = vand.u32 4294901760, %v6123_v31  ;;  %v8048_v21 = vand.u32 4294901760, %v6136_v7  ;;  %v8049_v47 = vand.u32 4294901760, %v6145_v16  ;;  %584 = vmatpush1.msra.mxu0 %v583_v59  ;;  %1571 = vmatprep.mubr.f32.mxu1 %v8040_v23 }
  0xb9   :  { %v6338_v14 = vpack.c.bf16 %v8044_v42, %v8043_v33  ;;  %v8050_v4 = vand.u32 4294901760, %v6148_v18  ;;  %v8051_v15 = vand.u32 4294901760, %v6187_v26  ;;  %v8052_v2 = vand.u32 4294901760, %v6161_v44  ;;  %1741 = vmatpush1.msra.mxu1 %v1740_v5  ;;  %4849 = vmatprep.subr.bf16.mxu0 %v4848_v41  ;;  %v186_v41 = vld [vmem:[%s7782_s3 + $0x50] sm:$0xff] }
  0xba   :  { %v6345_v28 = vpack.c.bf16 %v8046_v38, %v8045_v36  ;;  %v6351_v11 = vpack.c.bf16 %v8048_v21, %v8047_v0  ;;  %v8053_v21 = vand.u32 4294901760, %v6201_v24  ;;  %v8054_v33 = vand.u32 4294901760, %v6177_v17  ;;  %4897 = vmatprep.subr.bf16.mxu1 %v4896_v29  ;;  %420 = vmatmul.mubr.f32.gmra.mrb[6].mxu0 %v419_v43 }
  0xbb   :  { %v6357_v42 = vpack.c.bf16 %v8050_v4, %v8049_v47  ;;  %v6367_v60 = vpack.c.bf16 %v8052_v2, %v8051_v15  ;;  %v8055_v59 = vand.u32 4294901760, %v6158_v30  ;;  %v6381_v0 = vand.u32 4294901760, %v293_v39  ;;  %1577 = vmatmul.mubr.f32.gmra.mrb[6].mxu1 %v419_v43  ;;  %425 = vmatprep.mubr.f32.mxu0 %v8040_v23 }
  0xbc   :  { %v6373_v36 = vpack.c.bf16 %v8054_v33, %v8053_v21  ;;  %v8056_v47 = vand.u32 4294901760, %v6191_v58  ;;  %v8057_v4 = vand.u32 4294901760, %v6169_v51  ;;  %v430_v2 = vand.u32 4294901760, %v429_v40  ;;  %1582 = vmatprep.mubr.f32.mxu1 %v8040_v23 }
  0xbd   :  { %v6379_v38 = vpack.c.bf16 %v8055_v59, %v557_v62  ;;  %v440_v21 = vsub.f32 %v6257_v37, %v6319_v3  ;;  %v6392_v33 = vand.u32 4294901760, %v6324_v56  ;;  %v6395_v62 = vsub.f32 %v290_v12, %v6326_v22  ;;  %v188_v3 = vld [vmem:[%s7782_s3 + $0x60] sm:$0xff] }
  0xbe   :  { %v6387_v15 = vpack.c.bf16 %v8057_v4, %v8056_v47  ;;  %v296_v5 = vsel %vm267_vm0, %v185_v54, 0  ;;  %v6404_v40 = vsub.f32 %v293_v39, %v6381_v0  ;;  %431 = vmatmul.mubr.f32.gmra.mrb[8].mxu0 %v430_v2  ;;  %v299_v54 = vsel %vm267_vm0, %v186_v41, 0  ;;  %v187_v39 = vld [vmem:[%s7782_s3 + $0x58] sm:$0xff] }
  0xbf   :  { %8059 = vst [vmem:[#allocation18_spill] sm:$0xff] %v6392_v33  ;;  %v441_v29 = vand.u32 4294901760, %v440_v21  ;;  %v451_v12 = vsub.f32 %v6324_v56, %v6392_v33  ;;  %v6409_v43 = vand.u32 4294901760, %v6395_v62  ;;  %v6411_v59 = vand.u32 4294901760, %v296_v5  ;;  %1588 = vmatmul.mubr.f32.gmra.mrb[8].mxu1 %v430_v2  ;;  %436 = vmatprep.mubr.f32.mxu0 %v8040_v23 }
  0xc0   :  { %8058 = vst [vmem:[#allocation17_spill] sm:$0xff] %v6387_v15  ;;  %1593 = vmatprep.mubr.f32.mxu1 %v8040_v23  ;;  %v6420_v47 = vand.u32 4294901760, %v6404_v40  ;;  %v6427_v33 = vand.u32 4294901760, %v299_v54  ;;  %v302_v41 = vsel %vm267_vm0, %v187_v39, 0  ;;  %v305_v39 = vsel %vm267_vm0, %v188_v3, 0 }
  0xc1   :  { %8060 = vst [vmem:[#allocation19_spill] sm:$0xff] %v6409_v43  ;;  %v452_v4 = vand.u32 4294901760, %v451_v12  ;;  %v462_v21 = vsub.f32 %v6395_v62, %v6409_v43  ;;  %v6425_v2 = vsub.f32 %v296_v5, %v6411_v59  ;;  %v6443_v52 = vand.u32 4294901760, %v302_v41 }
  0xc2   :  { %8061 = vst [vmem:[#allocation20_spill] sm:$0xff] %v6420_v47  ;;  %442 = vmatmul.mubr.f32.gmra.mrb[10].mxu0 %v441_v29  ;;  %v473_v12 = vsub.f32 %v6404_v40, %v6420_v47  ;;  %v6456_v15 = vand.u32 4294901760, %v305_v39 }
  0xc3   :  { %1599 = vmatmul.mubr.f32.gmra.mrb[10].mxu1 %v441_v29  ;;  %447 = vmatprep.mubr.f32.mxu0 %v8040_v23  ;;  %v463_v43 = vand.u32 4294901760, %v462_v21  ;;  %v6438_v5 = vand.u32 4294901760, %v6425_v2  ;;  %v6441_v29 = vsub.f32 %v299_v54, %v6427_v33  ;;  %v6454_v54 = vsub.f32 %v302_v41, %v6443_v52 }
  0xc4   :  { %1604 = vmatprep.mubr.f32.mxu1 %v8040_v23  ;;  %v474_v25 = vand.u32 4294901760, %v473_v12 }
  0xc5   :  { %8062 = vst [vmem:[#allocation21_spill] sm:$0xff] %v6438_v5  ;;  %v484_v21 = vsub.f32 %v6425_v2, %v6438_v5  ;;  %v6451_v47 = vand.u32 4294901760, %v6441_v29  ;;  %v6463_v12 = vand.u32 4294901760, %v6454_v54  ;;  %v6466_v5 = vsub.f32 %v305_v39, %v6456_v15 }
  0xc6   :  { %453 = vmatmul.mubr.f32.gmra.mrb[12].mxu0 %v452_v4 }
  0xc7   :  { %1610 = vmatmul.mubr.f32.gmra.mrb[12].mxu1 %v452_v4  ;;  %458 = vmatprep.mubr.f32.mxu0 %v8040_v23  ;;  %v485_v3 = vand.u32 4294901760, %v484_v21  ;;  %v495_v4 = vsub.f32 %v6441_v29, %v6451_v47  ;;  %v506_v41 = vsub.f32 %v6454_v54, %v6463_v12  ;;  %v6473_v21 = vand.u32 4294901760, %v6466_v5 }
  0xc8   :  { %1615 = vmatprep.mubr.f32.mxu1 %v8040_v23 }
  0xc9   :  { %v507_v39 = vand.u32 4294901760, %v506_v41  ;;  %v4852_v41 = vpack.c.bf16 %v6161_v44, %v6187_v26  ;;  %v4902_v26 = vpack.c.bf16 %v6169_v51, %v6191_v58  ;;  %v8068_v44 = vld [vmem:[#allocation14_spill] sm:$0xff]  ;;  %v8072_v51 = vld [vmem:[#allocation17_spill] sm:$0xff]  ;;  %v8075_v58 = vld [vmem:[#allocation8_spill] sm:$0xff] }
  0xca   :  { %464 = vmatmul.mubr.f32.gmra.mrb[14].mxu0 %v463_v43 }
  0xcb   :  { %1621 = vmatmul.mubr.f32.gmra.mrb[14].mxu1 %v463_v43  ;;  %469 = vmatprep.mubr.f32.mxu0 %v8040_v23  ;;  %v496_v43 = vand.u32 4294901760, %v495_v4 }
  0xcc   :  { %1626 = vmatprep.mubr.f32.mxu1 %v8040_v23 }
  0xce   :  { %475 = vmatmul.mubr.f32.gmra.mrb[16].mxu0 %v474_v25 }
  0xcf   :  { %1632 = vmatmul.mubr.f32.gmra.mrb[16].mxu1 %v474_v25  ;;  %480 = vmatprep.mubr.f32.mxu0 %v8040_v23  ;;  %v517_v25 = vsub.f32 %v6466_v5, %v6473_v21 }
  0xd0   :  { %1637 = vmatprep.mubr.f32.mxu1 %v8040_v23 }
  0xd1   :  { %v518_v4 = vand.u32 4294901760, %v517_v25 }
  0xd2   :  { %486 = vmatmul.mubr.f32.gmra.mrb[18].mxu0 %v485_v3 }
  0xd3   :  { %1643 = vmatmul.mubr.f32.gmra.mrb[18].mxu1 %v485_v3  ;;  %491 = vmatprep.mubr.f32.mxu0 %v8040_v23  ;;  %v4850_v3 = vpack.c.bf16 %v6136_v7, %v6123_v31  ;;  %v4854_v31 = vpack.c.bf16 %v6158_v30, %v6181_v27  ;;  %v8063_v7 = vld [vmem:[#allocation11_spill] sm:$0xff]  ;;  %v8066_v27 = vld [vmem:[#allocation4_spill] sm:$0xff] }
  0xd4   :  { %1648 = vmatprep.mubr.f32.mxu1 %v8040_v23  ;;  %v8067_v30 = vld [vmem:[#allocation12_spill] sm:$0xff] }
  0xd6   :  { %497 = vmatmul.mubr.f32.gmra.mrb[20].mxu0 %v496_v43 }
  0xd7   :  { %1654 = vmatmul.mubr.f32.gmra.mrb[20].mxu1 %v496_v43  ;;  %502 = vmatprep.mubr.f32.mxu0 %v8040_v23  ;;  %v4898_v43 = vpack.c.bf16 %v6148_v18, %v6145_v16  ;;  %v8064_v16 = vld [vmem:[#allocation13_spill] sm:$0xff]  ;;  %v8065_v18 = vld [vmem:[#allocation15_spill] sm:$0xff] }
  0xd8   :  { %1659 = vmatprep.mubr.f32.mxu1 %v8040_v23 }
  0xda   :  { %508 = vmatmul.mubr.f32.gmra.mrb[22].mxu0 %v507_v39 }
  0xdb   :  { %1665 = vmatmul.mubr.f32.gmra.mrb[22].mxu1 %v507_v39  ;;  %513 = vmatprep.mubr.f32.mxu0 %v8040_v23  ;;  %v4900_v39 = vpack.c.bf16 %v6177_v17, %v6201_v24  ;;  %v8074_v17 = vand.u32 4294901760, %v6276_v50  ;;  %v8076_v24 = vand.u32 4294901760, %v6285_v57 }
  0xdc   :  { %1670 = vmatprep.mubr.f32.mxu1 %v8040_v23 }
  0xde   :  { %519 = vmatmul.mubr.f32.gmra.mrb[24].mxu0 %v518_v4 }
  0xdf   :  { %1676 = vmatmul.mubr.f32.gmra.mrb[24].mxu1 %v518_v4  ;;  %639 = vmatprep.mubr.f32.mxu0 %v8040_v23 }
  0xe0   :  { %1796 = vmatprep.mubr.f32.mxu1 %v8040_v23 }
  0xe2   :  { %641 = vmatmul.mubr.f32.vlgmr.msra.gmra.mrb[0].mxu0 %v6009_v45 }
  0xe3   :  { %4851 = vmatpush1.bf16.msra.mxu0 %v4850_v3  ;;  %1798 = vmatmul.mubr.f32.vlgmr.msra.gmra.mrb[0].mxu1 %v6009_v45 }
  0xe4   :  { %4899 = vmatpush1.bf16.msra.mxu1 %v4898_v43  ;;  %4853 = vmatprep.subr.bf16.mxu0 %v4852_v41 }
  0xe5   :  { %4901 = vmatprep.subr.bf16.mxu1 %v4900_v39  ;;  %646 = vmatprep.mubr.f32.mxu0 %v8040_v23 }
  0xe6   :  { %1803 = vmatprep.mubr.f32.mxu1 %v8040_v23  ;;  %648 = vmatmul.mubr.f32.gmra.mrb[2].mxu0 %v6011_v46 }
  0xe7   :  { %4855 = vmatpush1.bf16.msra.mxu0 %v4854_v31  ;;  %1805 = vmatmul.mubr.f32.gmra.mrb[2].mxu1 %v6011_v46 }
  0xe8   :  { %4903 = vmatpush1.bf16.msra.mxu1 %v4902_v26  ;;  %757 = vmatprep.subr.mxu0 %v6263_v35 }
  0xe9   :  { %1914 = vmatprep.subr.mxu1 %v6276_v50  ;;  %653 = vmatprep.mubr.f32.mxu0 %v8040_v23  ;;  %v8079_v50 = vld [vmem:[#allocation10_spill] sm:$0xff] }
  0xea   :  { %1810 = vmatprep.mubr.f32.mxu1 %v8040_v23  ;;  %655 = vmatmul.mubr.f32.gmra.mrb[4].mxu0 %v6023_v53 }
  0xeb   :  { %760 = vmatpush1.msra.mxu0 %v6285_v57  ;;  %1812 = vmatmul.mubr.f32.gmra.mrb[4].mxu1 %v6023_v53  ;;  %v8082_v57 = vld [vmem:[#allocation19_spill] sm:$0xff] }
  0xec   :  { %1917 = vmatpush1.msra.mxu1 %v6289_v61  ;;  %4857 = vmatprep.subr.bf16.mxu0 %v6130_v1 }
  0xed   :  { %4905 = vmatprep.subr.bf16.mxu1 %v6141_v13  ;;  %660 = vmatprep.mubr.f32.mxu0 %v8040_v23 }
  0xee   :  { %1817 = vmatprep.mubr.f32.mxu1 %v8040_v23  ;;  %662 = vmatmul.mubr.f32.gmra.mrb[6].mxu0 %v6048_v63 }
  0xef   :  { %1819 = vmatmul.mubr.f32.gmra.mrb[6].mxu1 %v6048_v63  ;;  %667 = vmatprep.mubr.f32.mxu0 %v8040_v23 }
  0xf0   :  { %1824 = vmatprep.mubr.f32.mxu1 %v8040_v23 }
  0xf2   :  { %669 = vmatmul.mubr.f32.gmra.mrb[8].mxu0 %v6071_v19 }
  0xf3   :  { %1826 = vmatmul.mubr.f32.gmra.mrb[8].mxu1 %v6071_v19  ;;  %674 = vmatprep.mubr.f32.mxu0 %v8040_v23 }
  0xf4   :  { %1831 = vmatprep.mubr.f32.mxu1 %v8040_v23 }
  0xf6   :  { %676 = vmatmul.mubr.f32.gmra.mrb[10].mxu0 %v6114_v8 }
  0xf7   :  { %1833 = vmatmul.mubr.f32.gmra.mrb[10].mxu1 %v6114_v8  ;;  %681 = vmatprep.mubr.f32.mxu0 %v8040_v23 }
  0xf8   :  { %1838 = vmatprep.mubr.f32.mxu1 %v8040_v23 }
  0xfa   :  { %683 = vmatmul.mubr.f32.gmra.mrb[12].mxu0 %v6279_v9 }
  0xfb   :  { %1840 = vmatmul.mubr.f32.gmra.mrb[12].mxu1 %v6279_v9  ;;  %688 = vmatprep.mubr.f32.mxu0 %v8040_v23 }
  0xfc   :  { %1845 = vmatprep.mubr.f32.mxu1 %v8040_v23 }
  0xfe   :  { %690 = vmatmul.mubr.f32.gmra.mrb[14].mxu0 %v6326_v22 }
  0xff   :  { %1847 = vmatmul.mubr.f32.gmra.mrb[14].mxu1 %v6326_v22  ;;  %695 = vmatprep.mubr.f32.mxu0 %v8040_v23 }
 0x100   :  { %1852 = vmatprep.mubr.f32.mxu1 %v8040_v23 }
 0x102   :  { %697 = vmatmul.mubr.f32.gmra.mrb[16].mxu0 %v6381_v0 }
 0x103   :  { %1854 = vmatmul.mubr.f32.gmra.mrb[16].mxu1 %v6381_v0  ;;  %702 = vmatprep.mubr.f32.mxu0 %v8040_v23 }
 0x104   :  { %1859 = vmatprep.mubr.f32.mxu1 %v8040_v23 }
 0x106   :  { %704 = vmatmul.mubr.f32.gmra.mrb[18].mxu0 %v6411_v59 }
 0x107   :  { %1861 = vmatmul.mubr.f32.gmra.mrb[18].mxu1 %v6411_v59  ;;  %709 = vmatprep.mubr.f32.mxu0 %v8040_v23 }
 0x108   :  { %1866 = vmatprep.mubr.f32.mxu1 %v8040_v23 }
 0x10a   :  { %711 = vmatmul.mubr.f32.gmra.mrb[20].mxu0 %v6427_v33 }
 0x10b   :  { %1868 = vmatmul.mubr.f32.gmra.mrb[20].mxu1 %v6427_v33  ;;  %716 = vmatprep.mubr.f32.mxu0 %v8040_v23 }
 0x10c   :  { %1873 = vmatprep.mubr.f32.mxu1 %v8040_v23 }
 0x10e   :  { %718 = vmatmul.mubr.f32.gmra.mrb[22].mxu0 %v6443_v52 }
 0x10f   :  { %1875 = vmatmul.mubr.f32.gmra.mrb[22].mxu1 %v6443_v52  ;;  %723 = vmatprep.mubr.f32.mxu0 %v8040_v23 }
 0x110   :  { %1880 = vmatprep.mubr.f32.mxu1 %v8040_v23 }
 0x112   :  { %725 = vmatmul.mubr.f32.gmra.mrb[24].mxu0 %v6456_v15 }
 0x113   :  { %1882 = vmatmul.mubr.f32.gmra.mrb[24].mxu1 %v6456_v15  ;;  %815 = vmatprep.mubr.f32.mxu0 %v8040_v23 }
 0x114   :  { %1972 = vmatprep.mubr.f32.mxu1 %v8040_v23 }
 0x116   :  { %818 = vmatmul.mubr.f32.vlgmr.msra.gmra.mrb[0].mxu0 %v6027_v55 }
 0x117   :  { %4859 = vmatpush1.bf16.msra.mxu0 %v6134_v6  ;;  %1975 = vmatmul.mubr.f32.vlgmr.msra.gmra.mrb[0].mxu1 %v6027_v55  ;;  %v8069_v55 = vld [vmem:[#allocation5_spill] sm:$0xff] }
 0x118   :  { %4907 = vmatpush1.bf16.msra.mxu1 %v8063_v7  ;;  %4861 = vmatprep.subr.bf16.mxu0 %v8064_v16 }
 0x119   :  { %4909 = vmatprep.subr.bf16.mxu1 %v8065_v18  ;;  %823 = vmatprep.mubr.f32.mxu0 %v8040_v23 }
 0x11a   :  { %1980 = vmatprep.mubr.f32.mxu1 %v8040_v23  ;;  %826 = vmatmul.mubr.f32.gmra.mrb[2].mxu0 %v8066_v27 }
 0x11b   :  { %4863 = vmatpush1.bf16.msra.mxu0 %v8067_v30  ;;  %1983 = vmatmul.mubr.f32.gmra.mrb[2].mxu1 %v8066_v27 }
 0x11c   :  { %4911 = vmatpush1.bf16.msra.mxu1 %v8068_v44  ;;  %937 = vmatprep.subr.mxu0 %v6203_v49 }
 0x11d   :  { %2094 = vmatprep.subr.mxu1 %v6214_v48  ;;  %831 = vmatprep.mubr.f32.mxu0 %v8040_v23 }
 0x11e   :  { %1988 = vmatprep.mubr.f32.mxu1 %v8040_v23  ;;  %834 = vmatmul.mubr.f32.gmra.mrb[4].mxu0 %v8069_v55 }
 0x11f   :  { %939 = vmatpush1.msra.mxu0 %v6194_v20  ;;  %1991 = vmatmul.mubr.f32.gmra.mrb[4].mxu1 %v8069_v55 }
 0x120   :  { %2096 = vmatpush1.msra.mxu1 %v6207_v32  ;;  %4865 = vmatprep.subr.bf16.mxu0 %v6338_v14  ;;  %v205_v14 = vpop.permute.xlu0 %204 }
 0x121   :  { %4913 = vmatprep.subr.bf16.mxu1 %v6345_v28  ;;  %839 = vmatprep.mubr.f32.mxu0 %v8040_v23 }
 0x122   :  { %1996 = vmatprep.mubr.f32.mxu1 %v8040_v23  ;;  %842 = vmatmul.mubr.f32.gmra.mrb[6].mxu0 %v6065_v10 }
 0x123   :  { %1999 = vmatmul.mubr.f32.gmra.mrb[6].mxu1 %v6065_v10  ;;  %847 = vmatprep.mubr.f32.mxu0 %v8040_v23  ;;  %v8070_v10 = vld [vmem:[#allocation6_spill] sm:$0xff] }
 0x124   :  { %2004 = vmatprep.mubr.f32.mxu1 %v8040_v23 }
 0x126   :  { %850 = vmatmul.mubr.f32.gmra.mrb[8].mxu0 %v6086_v34 }
 0x127   :  { %2007 = vmatmul.mubr.f32.gmra.mrb[8].mxu1 %v6086_v34  ;;  %855 = vmatprep.mubr.f32.mxu0 %v8040_v23  ;;  %v8071_v34 = vld [vmem:[#allocation7_spill] sm:$0xff] }
 0x128   :  { %2012 = vmatprep.mubr.f32.mxu1 %v8040_v23 }
 0x12a   :  { %858 = vmatmul.mubr.f32.gmra.mrb[10].mxu0 %v6257_v37 }
 0x12b   :  { %2015 = vmatmul.mubr.f32.gmra.mrb[10].mxu1 %v6257_v37  ;;  %863 = vmatprep.mubr.f32.mxu0 %v8040_v23  ;;  %v8077_v37 = vand.u32 4294901760, %v6289_v61  ;;  %v8083_v61 = vld [vmem:[#allocation20_spill] sm:$0xff] }
 0x12c   :  { %2020 = vmatprep.mubr.f32.mxu1 %v8040_v23 }
 0x12e   :  { %866 = vmatmul.mubr.f32.gmra.mrb[12].mxu0 %v6324_v56 }
 0x12f   :  { %2023 = vmatmul.mubr.f32.gmra.mrb[12].mxu1 %v6324_v56  ;;  %871 = vmatprep.mubr.f32.mxu0 %v8040_v23  ;;  %v8084_v56 = vld [vmem:[#allocation21_spill] sm:$0xff] }
 0x130   :  { %2028 = vmatprep.mubr.f32.mxu1 %v8040_v23 }
 0x132   :  { %874 = vmatmul.mubr.f32.gmra.mrb[14].mxu0 %v6395_v62 }
 0x133   :  { %2031 = vmatmul.mubr.f32.gmra.mrb[14].mxu1 %v6395_v62  ;;  %879 = vmatprep.mubr.f32.mxu0 %v8040_v23 }
 0x134   :  { %2036 = vmatprep.mubr.f32.mxu1 %v8040_v23 }
 0x136   :  { %882 = vmatmul.mubr.f32.gmra.mrb[16].mxu0 %v6404_v40 }
 0x137   :  { %2039 = vmatmul.mubr.f32.gmra.mrb[16].mxu1 %v6404_v40  ;;  %887 = vmatprep.mubr.f32.mxu0 %v8040_v23 }
 0x138   :  { %2044 = vmatprep.mubr.f32.mxu1 %v8040_v23 }
 0x13a   :  { %890 = vmatmul.mubr.f32.gmra.mrb[18].mxu0 %v6425_v2 }
 0x13b   :  { %2047 = vmatmul.mubr.f32.gmra.mrb[18].mxu1 %v6425_v2  ;;  %895 = vmatprep.mubr.f32.mxu0 %v8040_v23 }
 0x13c   :  { %2052 = vmatprep.mubr.f32.mxu1 %v8040_v23 }
 0x13e   :  { %898 = vmatmul.mubr.f32.gmra.mrb[20].mxu0 %v6441_v29 }
 0x13f   :  { %2055 = vmatmul.mubr.f32.gmra.mrb[20].mxu1 %v6441_v29  ;;  %903 = vmatprep.mubr.f32.mxu0 %v8040_v23 }
 0x140   :  { %2060 = vmatprep.mubr.f32.mxu1 %v8040_v23 }
 0x142   :  { %906 = vmatmul.mubr.f32.gmra.mrb[22].mxu0 %v6454_v54 }
 0x143   :  { %2063 = vmatmul.mubr.f32.gmra.mrb[22].mxu1 %v6454_v54  ;;  %911 = vmatprep.mubr.f32.mxu0 %v8040_v23 }
 0x144   :  { %2068 = vmatprep.mubr.f32.mxu1 %v8040_v23 }
 0x146   :  { %914 = vmatmul.mubr.f32.gmra.mrb[24].mxu0 %v6466_v5 }
 0x147   :  { %2071 = vmatmul.mubr.f32.gmra.mrb[24].mxu1 %v6466_v5  ;;  %994 = vmatprep.mubr.f32.mxu0 %v8040_v23  ;;  %v210_v5 = vpop.permute.xlu1 %209 }
 0x148   :  { %2151 = vmatprep.mubr.f32.mxu1 %v8040_v23 }
 0x14a   :  { %998 = vmatmul.mubr.f32.vlgmr.msra.gmra.mrb[0].mxu0 %v8070_v10 }
 0x14b   :  { %4867 = vmatpush1.bf16.msra.mxu0 %v6351_v11  ;;  %2155 = vmatmul.mubr.f32.vlgmr.msra.gmra.mrb[0].mxu1 %v8070_v10  ;;  %v8073_v11 = vand.u32 4294901760, %v6263_v35  ;;  %v8078_v35 = vld [vmem:[#allocation9_spill] sm:$0xff] }
 0x14c   :  { %4915 = vmatpush1.bf16.msra.mxu1 %v6357_v42  ;;  %4869 = vmatprep.subr.bf16.mxu0 %v6367_v60 }
 0x14d   :  { %4917 = vmatprep.subr.bf16.mxu1 %v6373_v36  ;;  %1003 = vmatprep.mubr.f32.mxu0 %v8040_v23 }
 0x14e   :  { %2160 = vmatprep.mubr.f32.mxu1 %v8040_v23  ;;  %1007 = vmatmul.mubr.f32.gmra.mrb[2].mxu0 %v8071_v34 }
 0x14f   :  { %4871 = vmatpush1.bf16.msra.mxu0 %v6379_v38  ;;  %2164 = vmatmul.mubr.f32.gmra.mrb[2].mxu1 %v8071_v34 }
 0x150   :  { %4919 = vmatpush1.bf16.msra.mxu1 %v8072_v51  ;;  %1147 = vmatprep.subr.mxu0 %v8073_v11 }
 0x151   :  { %2304 = vmatprep.subr.mxu1 %v8074_v17  ;;  %1012 = vmatprep.mubr.f32.mxu0 %v8040_v23 }
 0x152   :  { %2169 = vmatprep.mubr.f32.mxu1 %v8040_v23  ;;  %1016 = vmatmul.mubr.f32.gmra.mrb[4].mxu0 %v8075_v58 }
 0x153   :  { %1151 = vmatpush1.msra.mxu0 %v8076_v24  ;;  %2173 = vmatmul.mubr.f32.gmra.mrb[4].mxu1 %v8075_v58 }
 0x154   :  { %2308 = vmatpush1.msra.mxu1 %v8077_v37  ;;  %4873 = vmatprep.subr.bf16.mxu0 %v6130_v1  ;;  %v8080_v1 = vld [vmem:[#allocation16_spill] sm:$0xff] }
 0x155   :  { %4921 = vmatprep.subr.bf16.mxu1 %v6141_v13  ;;  %1021 = vmatprep.mubr.f32.mxu0 %v8040_v23  ;;  %v8081_v13 = vld [vmem:[#allocation18_spill] sm:$0xff] }
 0x156   :  { %2178 = vmatprep.mubr.f32.mxu1 %v8040_v23  ;;  %1025 = vmatmul.mubr.f32.gmra.mrb[6].mxu0 %v8078_v35 }
 0x157   :  { %2182 = vmatmul.mubr.f32.gmra.mrb[6].mxu1 %v8078_v35  ;;  %1030 = vmatprep.mubr.f32.mxu0 %v8040_v23  ;;  %v220_v35 = vpop.permute.xlu1 %219 }
 0x158   :  { %2187 = vmatprep.mubr.f32.mxu1 %v8040_v23 }
 0x15a   :  { %1034 = vmatmul.mubr.f32.gmra.mrb[8].mxu0 %v8079_v50 }
 0x15b   :  { %2191 = vmatmul.mubr.f32.gmra.mrb[8].mxu1 %v8079_v50  ;;  %1039 = vmatprep.mubr.f32.mxu0 %v8040_v23 }
 0x15c   :  { %2196 = vmatprep.mubr.f32.mxu1 %v8040_v23 }
 0x15e   :  { %1043 = vmatmul.mubr.f32.gmra.mrb[10].mxu0 %v8080_v1 }
 0x15f   :  { %2200 = vmatmul.mubr.f32.gmra.mrb[10].mxu1 %v8080_v1  ;;  %1048 = vmatprep.mubr.f32.mxu0 %v8040_v23 }
 0x160   :  { %2205 = vmatprep.mubr.f32.mxu1 %v8040_v23 }
 0x162   :  { %1052 = vmatmul.mubr.f32.gmra.mrb[12].mxu0 %v8081_v13 }
 0x163   :  { %2209 = vmatmul.mubr.f32.gmra.mrb[12].mxu1 %v8081_v13  ;;  %1057 = vmatprep.mubr.f32.mxu0 %v8040_v23 }
 0x164   :  { %2214 = vmatprep.mubr.f32.mxu1 %v8040_v23 }
 0x166   :  { %1061 = vmatmul.mubr.f32.gmra.mrb[14].mxu0 %v8082_v57 }
 0x167   :  { %2218 = vmatmul.mubr.f32.gmra.mrb[14].mxu1 %v8082_v57  ;;  %1066 = vmatprep.mubr.f32.mxu0 %v8040_v23 }
 0x168   :  { %2223 = vmatprep.mubr.f32.mxu1 %v8040_v23 }
 0x16a   :  { %1070 = vmatmul.mubr.f32.gmra.mrb[16].mxu0 %v8083_v61 }
 0x16b   :  { %2227 = vmatmul.mubr.f32.gmra.mrb[16].mxu1 %v8083_v61  ;;  %1075 = vmatprep.mubr.f32.mxu0 %v8040_v23 }
 0x16c   :  { %2232 = vmatprep.mubr.f32.mxu1 %v8040_v23 }
 0x16e   :  { %1079 = vmatmul.mubr.f32.gmra.mrb[18].mxu0 %v8084_v56 }
 0x16f   :  { %2236 = vmatmul.mubr.f32.gmra.mrb[18].mxu1 %v8084_v56  ;;  %1084 = vmatprep.mubr.f32.mxu0 %v8040_v23 }
 0x170   :  { %2241 = vmatprep.mubr.f32.mxu1 %v8040_v23 }
 0x172   :  { %1088 = vmatmul.mubr.f32.gmra.mrb[20].mxu0 %v6451_v47 }
 0x173   :  { %2245 = vmatmul.mubr.f32.gmra.mrb[20].mxu1 %v6451_v47  ;;  %1093 = vmatprep.mubr.f32.mxu0 %v8040_v23 }
 0x174   :  { %2250 = vmatprep.mubr.f32.mxu1 %v8040_v23 }
 0x176   :  { %1097 = vmatmul.mubr.f32.gmra.mrb[22].mxu0 %v6463_v12 }
 0x177   :  { %2254 = vmatmul.mubr.f32.gmra.mrb[22].mxu1 %v6463_v12  ;;  %1102 = vmatprep.mubr.f32.mxu0 %v8040_v23 }
 0x178   :  { %2259 = vmatprep.mubr.f32.mxu1 %v8040_v23 }
 0x17a   :  { %1106 = vmatmul.mubr.f32.gmra.mrb[24].mxu0 %v6473_v21 }
 0x17b   :  { %2263 = vmatmul.mubr.f32.gmra.mrb[24].mxu1 %v6473_v21  ;;  %1206 = vmatprep.mubr.f32.mxu0 %v8040_v23 }
 0x17c   :  { %2363 = vmatprep.mubr.f32.mxu1 %v8040_v23 }
 0x17e   :  { %1208 = vmatmul.mubr.f32.vlgmr.msra.gmra.mrb[0].mxu0 %v6009_v45 }
 0x17f   :  { %4875 = vmatpush1.bf16.msra.mxu0 %v6134_v6  ;;  %2365 = vmatmul.mubr.f32.vlgmr.msra.gmra.mrb[0].mxu1 %v6009_v45  ;;  %v2677_v6 = vld [vmem:[%s7784_s5 + $0x20] sm:$0xff] }
 0x180   :  { %4923 = vmatpush1.bf16.msra.mxu1 %v8063_v7  ;;  %4877 = vmatprep.subr.bf16.mxu0 %v8064_v16  ;;  %v215_v16 = vpop.permute.xlu0 %214 }
 0x181   :  { %4925 = vmatprep.subr.bf16.mxu1 %v8065_v18  ;;  %1213 = vmatprep.mubr.f32.mxu0 %v8040_v23 }
 0x182   :  { %2370 = vmatprep.mubr.f32.mxu1 %v8040_v23  ;;  %1215 = vmatmul.mubr.f32.gmra.mrb[2].mxu0 %v6011_v46 }
 0x183   :  { %4879 = vmatpush1.bf16.msra.mxu0 %v8067_v30  ;;  %2372 = vmatmul.mubr.f32.gmra.mrb[2].mxu1 %v6011_v46 }
 0x184   :  { %4927 = vmatpush1.bf16.msra.mxu1 %v8068_v44  ;;  %1315 = vmatprep.subr.mxu0 %v6203_v49 }
 0x185   :  { %2472 = vmatprep.subr.mxu1 %v6214_v48  ;;  %1220 = vmatprep.mubr.f32.mxu0 %v8040_v23 }
 0x186   :  { %2377 = vmatprep.mubr.f32.mxu1 %v8040_v23  ;;  %1222 = vmatmul.mubr.f32.gmra.mrb[4].mxu0 %v6023_v53 }
 0x187   :  { %1317 = vmatpush1.msra.mxu0 %v6194_v20  ;;  %2379 = vmatmul.mubr.f32.gmra.mrb[4].mxu1 %v6023_v53 }
 0x188   :  { %2474 = vmatpush1.msra.mxu1 %v6207_v32  ;;  %1227 = vmatprep.mubr.f32.mxu0 %v8040_v23 }
 0x189   :  { %2384 = vmatprep.mubr.f32.mxu1 %v8040_v23 }
 0x18a   :  { %1229 = vmatmul.mubr.f32.gmra.mrb[6].mxu0 %v6048_v63 }
 0x18b   :  { %2386 = vmatmul.mubr.f32.gmra.mrb[6].mxu1 %v6048_v63  ;;  %1234 = vmatprep.mubr.f32.mxu0 %v8040_v23 }
 0x18c   :  { %2391 = vmatprep.mubr.f32.mxu1 %v8040_v23 }
 0x18e   :  { %1236 = vmatmul.mubr.f32.gmra.mrb[8].mxu0 %v6071_v19 }
 0x18f   :  { %2393 = vmatmul.mubr.f32.gmra.mrb[8].mxu1 %v6071_v19  ;;  %1241 = vmatprep.mubr.f32.mxu0 %v8040_v23 }
 0x190   :  { %2398 = vmatprep.mubr.f32.mxu1 %v8040_v23 }
 0x192   :  { %1243 = vmatmul.mubr.f32.gmra.mrb[10].mxu0 %v6114_v8 }
 0x193   :  { %2400 = vmatmul.mubr.f32.gmra.mrb[10].mxu1 %v6114_v8  ;;  %1248 = vmatprep.mubr.f32.mxu0 %v8040_v23 }
 0x194   :  { %2405 = vmatprep.mubr.f32.mxu1 %v8040_v23 }
 0x196   :  { %1250 = vmatmul.mubr.f32.gmra.mrb[12].mxu0 %v6279_v9 }
 0x197   :  { %2407 = vmatmul.mubr.f32.gmra.mrb[12].mxu1 %v6279_v9  ;;  %1255 = vmatprep.mubr.f32.mxu0 %v8040_v23 }
 0x198   :  { %2412 = vmatprep.mubr.f32.mxu1 %v8040_v23 }
 0x19a   :  { %1257 = vmatmul.mubr.f32.gmra.mrb[14].mxu0 %v6326_v22 }
 0x19b   :  { %2414 = vmatmul.mubr.f32.gmra.mrb[14].mxu1 %v6326_v22  ;;  %1262 = vmatprep.mubr.f32.mxu0 %v8040_v23 }
 0x19c   :  { %2419 = vmatprep.mubr.f32.mxu1 %v8040_v23 }
 0x19e   :  { %1264 = vmatmul.mubr.f32.gmra.mrb[16].mxu0 %v6381_v0 }
 0x19f   :  { %2421 = vmatmul.mubr.f32.gmra.mrb[16].mxu1 %v6381_v0  ;;  %1269 = vmatprep.mubr.f32.mxu0 %v8040_v23 }
 0x1a0   :  { %2426 = vmatprep.mubr.f32.mxu1 %v8040_v23 }
 0x1a2   :  { %1271 = vmatmul.mubr.f32.gmra.mrb[18].mxu0 %v6411_v59 }
 0x1a3   :  { %2428 = vmatmul.mubr.f32.gmra.mrb[18].mxu1 %v6411_v59  ;;  %1276 = vmatprep.mubr.f32.mxu0 %v8040_v23 }
 0x1a4   :  { %2433 = vmatprep.mubr.f32.mxu1 %v8040_v23 }
 0x1a6   :  { %1278 = vmatmul.mubr.f32.gmra.mrb[20].mxu0 %v6427_v33 }
 0x1a7   :  { %2435 = vmatmul.mubr.f32.gmra.mrb[20].mxu1 %v6427_v33  ;;  %1283 = vmatprep.mubr.f32.mxu0 %v8040_v23 }
 0x1a8   :  { %2440 = vmatprep.mubr.f32.mxu1 %v8040_v23 }
 0x1aa   :  { %1285 = vmatmul.mubr.f32.gmra.mrb[22].mxu0 %v6443_v52 }
 0x1ab   :  { %2442 = vmatmul.mubr.f32.gmra.mrb[22].mxu1 %v6443_v52  ;;  %1290 = vmatprep.mubr.f32.mxu0 %v8040_v23 }
 0x1ac   :  { %2447 = vmatprep.mubr.f32.mxu1 %v8040_v23 }
 0x1ae   :  { %1292 = vmatmul.mubr.f32.gmra.mrb[24].mxu0 %v6456_v15 }
 0x1af   :  { %2449 = vmatmul.mubr.f32.gmra.mrb[24].mxu1 %v6456_v15  ;;  %1372 = vmatprep.mubr.f32.mxu0 %v8040_v23 }
 0x1b0   :  { %2529 = vmatprep.mubr.f32.mxu1 %v8040_v23 }
 0x1b2   :  { %1374 = vmatmul.mubr.f32.vlgmr.msra.gmra.mrb[0].mxu0 %v6009_v45 }
 0x1b3   :  { %2531 = vmatmul.mubr.f32.vlgmr.msra.gmra.mrb[0].mxu1 %v6009_v45  ;;  %1379 = vmatprep.mubr.f32.mxu0 %v8040_v23  ;;  %v2673_v45 = vld [vmem:[%s7784_s5] sm:$0xff] }
 0x1b4   :  { %2536 = vmatprep.mubr.f32.mxu1 %v8040_v23 }
 0x1b6   :  { %1381 = vmatmul.mubr.f32.gmra.mrb[2].mxu0 %v6011_v46 }
 0x1b7   :  { %2538 = vmatmul.mubr.f32.gmra.mrb[2].mxu1 %v6011_v46  ;;  %1386 = vmatprep.mubr.f32.mxu0 %v8040_v23  ;;  %v2674_v46 = vld [vmem:[%s7784_s5 + $0x8] sm:$0xff] }
 0x1b8   :  { %2543 = vmatprep.mubr.f32.mxu1 %v8040_v23 }
 0x1ba   :  { %1388 = vmatmul.mubr.f32.gmra.mrb[4].mxu0 %v6023_v53 }
 0x1bb   :  { %2545 = vmatmul.mubr.f32.gmra.mrb[4].mxu1 %v6023_v53  ;;  %1393 = vmatprep.mubr.f32.mxu0 %v8040_v23  ;;  %v2675_v53 = vld [vmem:[%s7784_s5 + $0x10] sm:$0xff] }
 0x1bc   :  { %2550 = vmatprep.mubr.f32.mxu1 %v8040_v23 }
 0x1be   :  { %1395 = vmatmul.mubr.f32.gmra.mrb[6].mxu0 %v6048_v63 }
 0x1bf   :  { %2552 = vmatmul.mubr.f32.gmra.mrb[6].mxu1 %v6048_v63  ;;  %1400 = vmatprep.mubr.f32.mxu0 %v8040_v23  ;;  %v2710_v63 = vsel %vm2708_vm1, %v2673_v45, 0 }
 0x1c0   :  { %2557 = vmatprep.mubr.f32.mxu1 %v8040_v23  ;;  %v6816_v20 = vand.u32 4294901760, %v2710_v63 }
 0x1c2   :  { %1402 = vmatmul.mubr.f32.gmra.mrb[8].mxu0 %v6071_v19  ;;  %8085 = vst [vmem:[#allocation11_spill] sm:$0xff] %v6816_v20  ;;  %v6825_v42 = vsub.f32 %v2710_v63, %v6816_v20 }
 0x1c3   :  { %2559 = vmatmul.mubr.f32.gmra.mrb[8].mxu1 %v6071_v19  ;;  %1407 = vmatprep.mubr.f32.mxu0 %v8040_v23  ;;  %v2676_v19 = vld [vmem:[%s7784_s5 + $0x18] sm:$0xff] }
 0x1c4   :  { %2564 = vmatprep.mubr.f32.mxu1 %v8040_v23  ;;  %v2719_v49 = vsel %vm2708_vm1, %v2676_v19, 0  ;;  %8089 = vst [vmem:[#allocation12_spill] sm:$0xff] %v6825_v42  ;;  %v6839_v54 = vand.u32 4294901760, %v6825_v42 }
 0x1c6   :  { %1409 = vmatmul.mubr.f32.gmra.mrb[10].mxu0 %v6114_v8  ;;  %8094 = vst [vmem:[#allocation17_spill] sm:$0xff] %v6839_v54  ;;  %v2818_v27 = vsub.f32 %v6825_v42, %v6839_v54 }
 0x1c7   :  { %2566 = vmatmul.mubr.f32.gmra.mrb[10].mxu1 %v6114_v8  ;;  %1414 = vmatprep.mubr.f32.mxu0 %v8040_v23  ;;  %v2716_v8 = vsel %vm2708_vm1, %v2675_v53, 0 }
 0x1c8   :  { %2571 = vmatprep.mubr.f32.mxu1 %v8040_v23  ;;  %v6820_v48 = vand.u32 4294901760, %v2716_v8  ;;  %v6864_v1 = vand.u32 4294901760, %v2818_v27 }
 0x1ca   :  { %1416 = vmatmul.mubr.f32.gmra.mrb[12].mxu0 %v6279_v9  ;;  %8087 = vst [vmem:[#allocation15_spill] sm:$0xff] %v6820_v48 }
 0x1cb   :  { %2573 = vmatmul.mubr.f32.gmra.mrb[12].mxu1 %v6279_v9  ;;  %1421 = vmatprep.mubr.f32.mxu0 %v8040_v23  ;;  %v2722_v9 = vsel %vm2708_vm1, %v2677_v6, 0 }
 0x1cc   :  { %2578 = vmatprep.mubr.f32.mxu1 %v8040_v23  ;;  %v6827_v60 = vand.u32 4294901760, %v2722_v9 }
 0x1ce   :  { %1423 = vmatmul.mubr.f32.gmra.mrb[14].mxu0 %v6326_v22  ;;  %8090 = vst [vmem:[#allocation14_spill] sm:$0xff] %v6827_v60  ;;  %v6842_v12 = vsub.f32 %v2722_v9, %v6827_v60 }
 0x1cf   :  { %2580 = vmatmul.mubr.f32.gmra.mrb[14].mxu1 %v6326_v22  ;;  %1428 = vmatprep.mubr.f32.mxu0 %v8040_v23  ;;  %v6822_v22 = vand.u32 4294901760, %v2719_v49 }
 0x1d0   :  { %2585 = vmatprep.mubr.f32.mxu1 %v8040_v23  ;;  %8095 = vst [vmem:[#allocation8_spill] sm:$0xff] %v6842_v12  ;;  %v6856_v30 = vand.u32 4294901760, %v6842_v12 }
 0x1d1   :  { %8088 = vst [vmem:[#allocation4_spill] sm:$0xff] %v6822_v22  ;;  %v6836_v2 = vsub.f32 %v2719_v49, %v6822_v22 }
 0x1d2   :  { %1430 = vmatmul.mubr.f32.gmra.mrb[16].mxu0 %v6381_v0  ;;  %8099 = vst [vmem:[#allocation18_spill] sm:$0xff] %v6856_v30  ;;  %v2862_v13 = vsub.f32 %v6842_v12, %v6856_v30 }
 0x1d3   :  { %2587 = vmatmul.mubr.f32.gmra.mrb[16].mxu1 %v6381_v0  ;;  %1435 = vmatprep.mubr.f32.mxu0 %v8040_v23  ;;  %8093 = vst [vmem:[#allocation7_spill] sm:$0xff] %v6836_v2  ;;  %v6851_v7 = vand.u32 4294901760, %v6836_v2 }
 0x1d4   :  { %2592 = vmatprep.mubr.f32.mxu1 %v8040_v23 }
 0x1d5   :  { %8098 = vst [vmem:[#allocation16_spill] sm:$0xff] %v6851_v7  ;;  %v2851_v37 = vsub.f32 %v6836_v2, %v6851_v7 }
 0x1d6   :  { %1437 = vmatmul.mubr.f32.gmra.mrb[18].mxu0 %v6411_v59 }
 0x1d7   :  { %2594 = vmatmul.mubr.f32.gmra.mrb[18].mxu1 %v6411_v59  ;;  %1442 = vmatprep.mubr.f32.mxu0 %v8040_v23 }
 0x1d8   :  { %2599 = vmatprep.mubr.f32.mxu1 %v8040_v23 }
 0x1da   :  { %1444 = vmatmul.mubr.f32.gmra.mrb[20].mxu0 %v6427_v33 }
 0x1db   :  { %2601 = vmatmul.mubr.f32.gmra.mrb[20].mxu1 %v6427_v33  ;;  %1449 = vmatprep.mubr.f32.mxu0 %v8040_v23  ;;  %v6833_v33 = vsub.f32 %v2716_v8, %v6820_v48 }
 0x1dc   :  { %2606 = vmatprep.mubr.f32.mxu1 %v8040_v23 }
 0x1dd   :  { %8092 = vst [vmem:[#allocation6_spill] sm:$0xff] %v6833_v33  ;;  %v6848_v43 = vand.u32 4294901760, %v6833_v33 }
 0x1de   :  { %1451 = vmatmul.mubr.f32.gmra.mrb[22].mxu0 %v6443_v52 }
 0x1df   :  { %2608 = vmatmul.mubr.f32.gmra.mrb[22].mxu1 %v6443_v52  ;;  %1456 = vmatprep.mubr.f32.mxu0 %v8040_v23  ;;  %v2713_v52 = vsel %vm2708_vm1, %v2674_v46, 0  ;;  %8097 = vst [vmem:[#allocation10_spill] sm:$0xff] %v6848_v43  ;;  %v2840_v51 = vsub.f32 %v6833_v33, %v6848_v43 }
 0x1e0   :  { %2613 = vmatprep.mubr.f32.mxu1 %v8040_v23  ;;  %v6818_v32 = vand.u32 4294901760, %v2713_v52 }
 0x1e1   :  { %v6870_v53 = vand.u32 4294901760, %v2840_v51 }
 0x1e2   :  { %1458 = vmatmul.mubr.f32.gmra.mrb[24].mxu0 %v6456_v15  ;;  %8086 = vst [vmem:[#allocation13_spill] sm:$0xff] %v6818_v32 }
 0x1e3   :  { %2615 = vmatmul.mubr.f32.gmra.mrb[24].mxu1 %v6456_v15  ;;  %2814 = vmatprep.mubr.f32.mxu0 %v8040_v23  ;;  %v6830_v15 = vsub.f32 %v2713_v52, %v6818_v32 }
 0x1e4   :  { %3787 = vmatprep.mubr.f32.mxu1 %v8040_v23 }
 0x1e5   :  { %8091 = vst [vmem:[#allocation5_spill] sm:$0xff] %v6830_v15  ;;  %v6845_v3 = vand.u32 4294901760, %v6830_v15 }
 0x1e7   :  { %8096 = vst [vmem:[#allocation9_spill] sm:$0xff] %v6845_v3  ;;  %v2829_v34 = vsub.f32 %v6830_v15, %v6845_v3 }
 0x1e9   :  { %v6868_v46 = vand.u32 4294901760, %v2829_v34  ;;  %v230_v34 = vpop.permute.xlu1 %229 }
 0x285   :  { %v1375_v28 = vpop.f32.mrb[0].mxu0 }
 0x286   :  { %v5216_v36 = vadd.f32 %v1375_v28, %v205_v14  ;;  %v2532_v38 = vpop.f32.mrb[0].mxu1  ;;  %v1377_v0 = vpop.f32.mrb[1].mxu0  ;;  %v6875_v28 = vand.u32 4294901760, %v2851_v37 }
 0x287   :  { %v5242_v62 = vadd.f32 %v2532_v38, %v205_v14  ;;  %v5217_v40 = vadd.f32 %v1377_v0, %v205_v14  ;;  %v2534_v59 = vpop.f32.mrb[1].mxu1  ;;  %v225_v38 = vpop.permute.xlu0 %224 }
 0x288   :  { %5693 = vtanh.f32 %v5216_v36  ;;  %v5243_v47 = vadd.f32 %v2534_v59, %v205_v14  ;;  %v6879_v59 = vand.u32 4294901760, %v2862_v13 }
 0x289   :  { %5695 = vtanh.f32 %v5242_v62  ;;  %v1382_v29 = vpop.f32.mrb[2].mxu0 }
 0x28a   :  { %5697 = vtanh.f32 %v5217_v40  ;;  %v5218_v21 = vadd.f32 %v1382_v29, %v210_v5  ;;  %v2539_v25 = vpop.f32.mrb[2].mxu1  ;;  %v1384_v4 = vpop.f32.mrb[3].mxu0  ;;  %8100 = vst [vmem:[#allocation19_spill] sm:$0xff] %v6879_v59 }
 0x28b   :  { %5699 = vtanh.f32 %v5243_v47  ;;  %v5244_v41 = vadd.f32 %v2539_v25, %v210_v5  ;;  %v5219_v39 = vadd.f32 %v1384_v4, %v210_v5  ;;  %v2541_v31 = vpop.f32.mrb[3].mxu1 }
 0x28c   :  { %5701 = vtanh.f32 %v5218_v21  ;;  %v5245_v26 = vadd.f32 %v2541_v31, %v210_v5 }
 0x28d   :  { %5703 = vtanh.f32 %v5244_v41  ;;  %v1389_v18 = vpop.f32.mrb[4].mxu0 }
 0x28e   :  { %5705 = vtanh.f32 %v5219_v39  ;;  %v5220_v44 = vadd.f32 %v1389_v18, %v215_v16  ;;  %v2546_v55 = vpop.f32.mrb[4].mxu1  ;;  %v1391_v10 = vpop.f32.mrb[5].mxu0 }
 0x28f   :  { %5707 = vtanh.f32 %v5245_v26  ;;  %v5246_v11 = vadd.f32 %v2546_v55, %v215_v16  ;;  %v5221_v17 = vadd.f32 %v1391_v10, %v215_v16  ;;  %v2548_v58 = vpop.f32.mrb[5].mxu1 }
 0x290   :  { %5709 = vtanh.f32 %v5220_v44  ;;  %v5247_v24 = vadd.f32 %v2548_v58, %v215_v16 }
 0x291   :  { %5711 = vtanh.f32 %v5246_v11  ;;  %v1396_v50 = vpop.f32.mrb[6].mxu0 }
 0x292   :  { %v5694_v57 = vpop.eup %5693  ;;  %5713 = vtanh.f32 %v5221_v17  ;;  %v5222_v61 = vadd.f32 %v1396_v50, %v220_v35  ;;  %v2553_v56 = vpop.f32.mrb[6].mxu1 }
 0x293   :  { %v1398_v45 = vpop.f32.mrb[7].mxu0  ;;  %v6872_v63 = vpop.eup %5695  ;;  %5715 = vtanh.f32 %v5247_v24  ;;  %v5248_v19 = vadd.f32 %v2553_v56, %v220_v35  ;;  %v2726_v6 = vand.u32 4294901760, %v5694_v57 }
 0x294   :  { %v5223_v52 = vadd.f32 %v1398_v45, %v220_v35  ;;  %v2555_v8 = vpop.f32.mrb[7].mxu1  ;;  %v5698_v49 = vpop.eup %5697  ;;  %5717 = vtanh.f32 %v5222_v61  ;;  %v3699_v14 = vand.u32 4294901760, %v6872_v63 }
 0x295   :  { %v5249_v9 = vadd.f32 %v2555_v8, %v220_v35  ;;  %v5700_v36 = vpop.eup %5699  ;;  %5719 = vtanh.f32 %v5248_v19  ;;  %v1403_v0 = vpop.f32.mrb[8].mxu0  ;;  %v2724_v62 = vand.u32 4294901760, %v5698_v49  ;;  %v6877_v40 = vsub.f32 %v5694_v57, %v2726_v6 }
 0x296   :  { %v5702_v47 = vpop.eup %5701  ;;  %5721 = vtanh.f32 %v5223_v52  ;;  %v5224_v5 = vadd.f32 %v1403_v0, %v225_v38  ;;  %v2560_v29 = vpop.f32.mrb[8].mxu1  ;;  %v3697_v25 = vand.u32 4294901760, %v5700_v36  ;;  %v6882_v4 = vsub.f32 %v6872_v63, %v3699_v14 }
 0x297   :  { %v1405_v21 = vpop.f32.mrb[9].mxu0  ;;  %v5704_v41 = vpop.eup %5703  ;;  %5723 = vtanh.f32 %v5249_v9  ;;  %v5250_v39 = vadd.f32 %v2560_v29, %v225_v38  ;;  %v6884_v16 = vsub.f32 %v5698_v49, %v2724_v62  ;;  %v2730_v55 = vand.u32 4294901760, %v5702_v47 }
 0x298   :  { %8101 = vst [vmem:[#allocation20_spill] sm:$0xff] %v6882_v4  ;;  %v5225_v31 = vadd.f32 %v1405_v21, %v225_v38  ;;  %v2562_v26 = vpop.f32.mrb[9].mxu1  ;;  %v5706_v18 = vpop.eup %5705  ;;  %5725 = vtanh.f32 %v5224_v5  ;;  %v6886_v44 = vsub.f32 %v5700_v36, %v3697_v25  ;;  %v3703_v17 = vand.u32 4294901760, %v5704_v41 }
 0x299   :  { %8102 = vst [vmem:[#allocation21_spill] sm:$0xff] %v6884_v16  ;;  %v5251_v27 = vadd.f32 %v2562_v26, %v225_v38  ;;  %v5708_v10 = vpop.eup %5707  ;;  %5727 = vtanh.f32 %v5250_v39  ;;  %v1410_v51 = vpop.f32.mrb[10].mxu0  ;;  %v2728_v11 = vand.u32 4294901760, %v5706_v18  ;;  %v6891_v57 = vpack.c.bf16 %v2730_v55, %v2726_v6 }
 0x29a   :  { %8103 = vst [vmem:[#allocation22_spill] sm:$0xff] %v6886_v44  ;;  %v6889_v24 = vpop.eup %5709  ;;  %5729 = vtanh.f32 %v5225_v31  ;;  %v5226_v37 = vadd.f32 %v1410_v51, %v230_v34  ;;  %v2567_v35 = vpop.f32.mrb[10].mxu1  ;;  %v3701_v13 = vand.u32 4294901760, %v5708_v10  ;;  %v6904_v5 = vsub.f32 %v5702_v47, %v2730_v55 }
 0x29b   :  { %v1412_v50 = vpop.f32.mrb[11].mxu0  ;;  %8104 = vst [vmem:[#allocation23_spill] sm:$0xff] %v6891_v57  ;;  %v6893_v61 = vpop.eup %5711  ;;  %5731 = vtanh.f32 %v5251_v27  ;;  %v5252_v56 = vadd.f32 %v2567_v35, %v230_v34  ;;  %v6895_v19 = vpack.c.bf16 %v2728_v11, %v2724_v62  ;;  %v6897_v49 = vsub.f32 %v5706_v18, %v2728_v11 }
 0x29c   :  { %v5227_v45 = vadd.f32 %v1412_v50, %v230_v34  ;;  %v2569_v63 = vpop.f32.mrb[11].mxu1  ;;  %v5714_v52 = vpop.eup %5713  ;;  %5733 = vtanh.f32 %v5226_v37  ;;  %v6899_v9 = vpack.c.bf16 %v3701_v13, %v3697_v25  ;;  %v6902_v6 = vsub.f32 %v5708_v10, %v3701_v13  ;;  %8109 = vst [vmem:[#allocation28_spill] sm:$0xff] %v6904_v5 }
 0x29d   :  { %8105 = vst [vmem:[#allocation24_spill] sm:$0xff] %v6895_v19  ;;  %v5253_v8 = vadd.f32 %v2569_v63, %v230_v34  ;;  %8106 = vst [vmem:[#allocation25_spill] sm:$0xff] %v6897_v49  ;;  %v5716_v36 = vpop.eup %5715  ;;  %v235_v38 = vpop.permute.xlu0 %234  ;;  %5735 = vtanh.f32 %v5252_v56  ;;  %4929 = vmatprep.subr.bf16.mxu0 %v6895_v19  ;;  %v6906_v29 = vpack.c.bf16 %v3703_v17, %v3699_v14  ;;  %v2732_v26 = vand.u32 4294901760, %v5714_v52 }
 0x29e   :  { %8107 = vst [vmem:[#allocation26_spill] sm:$0xff] %v6899_v9  ;;  %8108 = vst [vmem:[#allocation27_spill] sm:$0xff] %v6902_v6  ;;  %v1417_v0 = vpop.f32.mrb[12].mxu0  ;;  %v5718_v62 = vpop.eup %5717  ;;  %5737 = vtanh.f32 %v5227_v45  ;;  %5073 = vmatprep.subr.bf16.mxu1 %v6899_v9  ;;  %4931 = vmatpush1.bf16.msra.mxu0 %v6891_v57  ;;  %v6910_v25 = vsub.f32 %v5704_v41, %v3703_v17  ;;  %v3705_v55 = vand.u32 4294901760, %v5716_v36  ;;  %v2734_v11 = vand.u32 4294901760, %v6889_v24 }
 0x29f   :  { %8110 = vst [vmem:[#allocation29_spill] sm:$0xff] %v6906_v29  ;;  %v5228_v21 = vadd.f32 %v1417_v0, %v235_v38  ;;  %v2574_v39 = vpop.f32.mrb[12].mxu1  ;;  %v1419_v31 = vpop.f32.mrb[13].mxu0  ;;  %5739 = vtanh.f32 %v5253_v8  ;;  %5075 = vmatpush1.bf16.msra.mxu1 %v6906_v29  ;;  %v6915_v51 = vsub.f32 %v5714_v52, %v2732_v26  ;;  %v2738_v13 = vand.u32 4294901760, %v5718_v62 }
 0x2a0   :  { %v6912_v18 = vpop.eup %5719  ;;  %v5254_v27 = vadd.f32 %v2574_v39, %v235_v38  ;;  %v5229_v14 = vadd.f32 %v1419_v31, %v235_v38  ;;  %v2576_v47 = vpop.f32.mrb[13].mxu1  ;;  %v6918_v50 = vsub.f32 %v5716_v36, %v3705_v55  ;;  %v6923_v52 = vsub.f32 %v6889_v24, %v2734_v11 }
 0x2a1   :  { %v5722_v10 = vpop.eup %5721  ;;  %5741 = vtanh.f32 %v5228_v21  ;;  %v5255_v34 = vadd.f32 %v2576_v47, %v235_v38  ;;  %v240_v17 = vpop.permute.xlu1 %239 }
 0x2a2   :  { %v5724_v41 = vpop.eup %5723  ;;  %5743 = vtanh.f32 %v5254_v27  ;;  %v1424_v37 = vpop.f32.mrb[14].mxu0  ;;  %v2736_v35 = vand.u32 4294901760, %v5722_v10 }
 0x2a3   :  { %v6920_v56 = vpop.eup %5725  ;;  %5745 = vtanh.f32 %v5229_v14  ;;  %v5230_v45 = vadd.f32 %v1424_v37, %v240_v17  ;;  %v2581_v63 = vpop.f32.mrb[14].mxu1  ;;  %v3709_v0 = vand.u32 4294901760, %v5724_v41 }
 0x2a4   :  { %v1426_v8 = vpop.f32.mrb[15].mxu0  ;;  %v6925_v38 = vpop.eup %5727  ;;  %5747 = vtanh.f32 %v5255_v34  ;;  %v5256_v21 = vadd.f32 %v2581_v63, %v240_v17  ;;  %v6927_v27 = vpack.c.bf16 %v2736_v35, %v2732_v26  ;;  %v6929_v58 = vsub.f32 %v5722_v10, %v2736_v35 }
 0x2a5   :  { %v5231_v39 = vadd.f32 %v1426_v8, %v240_v17  ;;  %v2583_v31 = vpop.f32.mrb[15].mxu1  ;;  %v5730_v36 = vpop.eup %5729  ;;  %5749 = vtanh.f32 %v5230_v45  ;;  %v6931_v14 = vpack.c.bf16 %v3709_v0, %v3705_v55  ;;  %v6934_v24 = vsub.f32 %v5724_v41, %v3709_v0 }
 0x2a6   :  { %8111 = vst [vmem:[#allocation30_spill] sm:$0xff] %v6927_v27  ;;  %v5257_v47 = vadd.f32 %v2583_v31, %v240_v17  ;;  %v5732_v37 = vpop.eup %5731  ;;  %v245_v30 = vpop.permute.xlu0 %244  ;;  %5751 = vtanh.f32 %v5256_v21  ;;  %4933 = vmatprep.subr.bf16.mxu0 %v6927_v27  ;;  %v6936_v63 = vpack.c.bf16 %v2738_v13, %v2734_v11  ;;  %v6938_v8 = vsub.f32 %v5718_v62, %v2738_v13 }
 0x2a7   :  { %8112 = vst [vmem:[#allocation31_spill] sm:$0xff] %v6931_v14  ;;  %v1431_v34 = vpop.f32.mrb[16].mxu0  ;;  %v6940_v26 = vpop.eup %5733  ;;  %5753 = vtanh.f32 %v5231_v39  ;;  %5077 = vmatprep.subr.bf16.mxu1 %v6931_v14  ;;  %v3707_v17 = vand.u32 4294901760, %v6893_v61  ;;  %v3711_v35 = vand.u32 4294901760, %v6912_v18  ;;  %v2740_v13 = vand.u32 4294901760, %v5730_v36 }
 0x2a8   :  { %8113 = vst [vmem:[#allocation32_spill] sm:$0xff] %v6936_v63  ;;  %v5232_v10 = vadd.f32 %v1431_v34, %v245_v30  ;;  %v2588_v55 = vpop.f32.mrb[16].mxu1  ;;  %v1433_v45 = vpop.f32.mrb[17].mxu0  ;;  %5755 = vtanh.f32 %v5257_v47  ;;  %4935 = vmatpush1.bf16.msra.mxu0 %v6936_v63 }
 0x2a9   :  { %v6945_v21 = vpop.eup %5735  ;;  %v5258_v41 = vadd.f32 %v2588_v55, %v245_v30  ;;  %v5233_v62 = vadd.f32 %v1433_v45, %v245_v30  ;;  %v2590_v11 = vpop.f32.mrb[17].mxu1  ;;  %v6948_v39 = vpack.c.bf16 %v3711_v35, %v3707_v17  ;;  %v6951_v31 = vsub.f32 %v6893_v61, %v3707_v17 }
 0x2aa   :  { %v5738_v0 = vpop.eup %5737  ;;  %5757 = vtanh.f32 %v5232_v10  ;;  %v6954_v34 = vsub.f32 %v6912_v18, %v3711_v35  ;;  %v250_v43 = vpop.permute.xlu1 %249  ;;  %v5259_v47 = vadd.f32 %v2590_v11, %v245_v30  ;;  %v6956_v54 = vsub.f32 %v5730_v36, %v2740_v13 }
 0x2ab   :  { %8114 = vst [vmem:[#allocation33_spill] sm:$0xff] %v6948_v39  ;;  %v5740_v7 = vpop.eup %5739  ;;  %5759 = vtanh.f32 %v5258_v41  ;;  %v1438_v55 = vpop.f32.mrb[18].mxu0  ;;  %v2744_v3 = vand.u32 4294901760, %v5738_v0  ;;  %5079 = vmatpush1.bf16.msra.mxu1 %v6948_v39  ;;  %v3713_v17 = vand.u32 4294901760, %v5732_v37 }
 0x2ac   :  { %v6958_v45 = vpop.eup %5741  ;;  %5761 = vtanh.f32 %v5233_v62  ;;  %v5234_v10 = vadd.f32 %v1438_v55, %v250_v43  ;;  %v2595_v12 = vpop.f32.mrb[18].mxu1  ;;  %v3717_v2 = vand.u32 4294901760, %v5740_v7 }
 0x2ad   :  { %v1440_v61 = vpop.f32.mrb[19].mxu0  ;;  %v6961_v18 = vpop.eup %5743  ;;  %5763 = vtanh.f32 %v5259_v47  ;;  %v5260_v35 = vadd.f32 %v2595_v12, %v250_v43  ;;  %v6963_v11 = vpack.c.bf16 %v2744_v3, %v2740_v13  ;;  %v6965_v63 = vsub.f32 %v5738_v0, %v2744_v3 }
 0x2ae   :  { %v5235_v41 = vadd.f32 %v1440_v61, %v250_v43  ;;  %v2597_v30 = vpop.f32.mrb[19].mxu1  ;;  %v5746_v36 = vpop.eup %5745  ;;  %5765 = vtanh.f32 %v5234_v10  ;;  %v6967_v39 = vpack.c.bf16 %v3717_v2, %v3713_v17  ;;  %v6972_v15 = vsub.f32 %v5732_v37, %v3713_v17 }
 0x2af   :  { %8115 = vst [vmem:[#allocation34_spill] sm:$0xff] %v6963_v11  ;;  %v5261_v33 = vadd.f32 %v2597_v30, %v250_v43  ;;  %8116 = vst [vmem:[#allocation35_spill] sm:$0xff] %v6965_v63  ;;  %v6969_v62 = vpop.eup %5747  ;;  %v255_v55 = vpop.permute.xlu0 %254  ;;  %5767 = vtanh.f32 %v5260_v35  ;;  %4937 = vmatprep.subr.bf16.mxu0 %v6963_v11  ;;  %v6974_v12 = vsub.f32 %v5740_v7, %v3717_v2  ;;  %v2742_v13 = vand.u32 4294901760, %v6920_v56 }
 0x2b0   :  { %8117 = vst [vmem:[#allocation36_spill] sm:$0xff] %v6967_v39  ;;  %v1445_v47 = vpop.f32.mrb[20].mxu0  ;;  %v6977_v61 = vpop.eup %5749  ;;  %5769 = vtanh.f32 %v5235_v41  ;;  %5081 = vmatprep.subr.bf16.mxu1 %v6967_v39  ;;  %v2746_v0 = vand.u32 4294901760, %v6940_v26  ;;  %v3715_v10 = vand.u32 4294901760, %v6925_v38  ;;  %v3719_v37 = vand.u32 4294901760, %v6945_v21 }
 0x2b1   :  { %8118 = vst [vmem:[#allocation37_spill] sm:$0xff] %v6974_v12  ;;  %v5236_v3 = vadd.f32 %v1445_v47, %v255_v55  ;;  %v2602_v43 = vpop.f32.mrb[20].mxu1  ;;  %v1447_v35 = vpop.f32.mrb[21].mxu0  ;;  %5771 = vtanh.f32 %v5261_v33  ;;  %v6985_v7 = vsub.f32 %v6920_v56, %v2742_v13 }
 0x2b2   :  { %v6982_v30 = vpop.eup %5751  ;;  %v5262_v2 = vadd.f32 %v2602_v43, %v255_v55  ;;  %v2604_v17 = vpop.f32.mrb[21].mxu1  ;;  %v6988_v39 = vpack.c.bf16 %v2746_v0, %v2742_v13  ;;  %v6991_v47 = vsub.f32 %v6940_v26, %v2746_v0  ;;  %v6994_v11 = vsub.f32 %v6925_v38, %v3715_v10 }
 0x2b3   :  { %v5754_v41 = vpop.eup %5753  ;;  %5773 = vtanh.f32 %v5236_v3  ;;  %v260_v27 = vpop.permute.xlu1 %259  ;;  %v6996_v33 = vpack.c.bf16 %v3719_v37, %v3715_v10  ;;  %v6999_v56 = vsub.f32 %v6945_v21, %v3719_v37  ;;  %v5237_v43 = vadd.f32 %v1447_v35, %v255_v55 }
 0x2b4   :  { %8119 = vst [vmem:[#allocation38_spill] sm:$0xff] %v6988_v39  ;;  %v5756_v14 = vpop.eup %5755  ;;  %5775 = vtanh.f32 %v5262_v2  ;;  %v1452_v29 = vpop.f32.mrb[22].mxu0  ;;  %4939 = vmatpush1.bf16.msra.mxu0 %v6988_v39  ;;  %v5263_v13 = vadd.f32 %v2604_v17, %v255_v55  ;;  %v2748_v38 = vand.u32 4294901760, %v5746_v36  ;;  %v2752_v42 = vand.u32 4294901760, %v5754_v41 }
 0x2b5   :  { %8120 = vst [vmem:[#allocation39_spill] sm:$0xff] %v6996_v33  ;;  %8121 = vst [vmem:[#allocation40_spill] sm:$0xff] %v6999_v56  ;;  %v7001_v57 = vpop.eup %5757  ;;  %v5238_v26 = vadd.f32 %v1452_v29, %v260_v27  ;;  %v2609_v3 = vpop.f32.mrb[22].mxu1  ;;  %5083 = vmatpush1.bf16.msra.mxu1 %v6996_v33  ;;  %5777 = vtanh.f32 %v5237_v43  ;;  %v3721_v35 = vand.u32 4294901760, %v6969_v62  ;;  %v3725_v22 = vand.u32 4294901760, %v5756_v14 }
 0x2b6   :  { %v1454_v0 = vpop.f32.mrb[23].mxu0  ;;  %v7004_v9 = vpop.eup %5759  ;;  %v5264_v10 = vadd.f32 %v2609_v3, %v260_v27  ;;  %5779 = vtanh.f32 %v5263_v13  ;;  %v7008_v39 = vpack.c.bf16 %v2752_v42, %v2748_v38  ;;  %v7010_v29 = vsub.f32 %v5746_v36, %v2748_v38 }
 0x2b7   :  { %v5239_v21 = vadd.f32 %v1454_v0, %v260_v27  ;;  %v2611_v2 = vpop.f32.mrb[23].mxu1  ;;  %v5762_v37 = vpop.eup %5761  ;;  %5781 = vtanh.f32 %v5238_v26  ;;  %v7012_v60 = vsub.f32 %v5754_v41, %v2752_v42  ;;  %v7015_v43 = vsub.f32 %v6969_v62, %v3721_v35 }
 0x2b8   :  { %v5265_v19 = vadd.f32 %v2611_v2, %v260_v27  ;;  %8122 = vst [vmem:[#allocation41_spill] sm:$0xff] %v7008_v39  ;;  %8123 = vst [vmem:[#allocation42_spill] sm:$0xff] %v7010_v29  ;;  %v5764_v55 = vpop.eup %5763  ;;  %v265_v17 = vpop.permute.xlu0 %264  ;;  %5783 = vtanh.f32 %v5264_v10  ;;  %4941 = vmatprep.subr.bf16.mxu0 %v7008_v39  ;;  %v2750_v2 = vand.u32 4294901760, %v6958_v45  ;;  %v2754_v36 = vand.u32 4294901760, %v6977_v61 }
 0x2b9   :  { %8124 = vst [vmem:[#allocation43_spill] sm:$0xff] %v7012_v60  ;;  %v1459_v3 = vpop.f32.mrb[24].mxu0  ;;  %v5766_v0 = vpop.eup %5765  ;;  %5785 = vtanh.f32 %v5239_v21  ;;  %v7020_v42 = vpack.c.bf16 %v3725_v22, %v3721_v35  ;;  %v7022_v41 = vsub.f32 %v5756_v14, %v3725_v22  ;;  %v3723_v21 = vand.u32 4294901760, %v6961_v18 }
 0x2ba   :  { %v5240_v13 = vadd.f32 %v1459_v3, %v265_v17  ;;  %v2616_v27 = vpop.f32.mrb[24].mxu1  ;;  %v1461_v38 = vpop.f32.mrb[25].mxu0  ;;  %5787 = vtanh.f32 %v5265_v19  ;;  %v7024_v10 = vpack.c.bf16 %v2754_v36, %v2750_v2  ;;  %v7027_v3 = vsub.f32 %v6958_v45, %v2750_v2 }
 0x2bb   :  { %v5768_v33 = vpop.eup %5767  ;;  %8125 = vst [vmem:[#allocation44_spill] sm:$0xff] %v7020_v42  ;;  %v5266_v62 = vadd.f32 %v2616_v27, %v265_v17  ;;  %v2618_v26 = vpop.f32.mrb[25].mxu1  ;;  %v7030_v39 = vsub.f32 %v6977_v61, %v2754_v36  ;;  %5085 = vmatprep.subr.bf16.mxu1 %v7020_v42  ;;  %v3727_v22 = vand.u32 4294901760, %v6982_v30  ;;  %v5241_v14 = vadd.f32 %v1461_v38, %v265_v17 }
 0x2bc   :  { %v5770_v48 = vpop.eup %5769  ;;  %8126 = vst [vmem:[#allocation45_spill] sm:$0xff] %v7024_v10  ;;  %8127 = vst [vmem:[#allocation46_spill] sm:$0xff] %v7027_v3  ;;  %5789 = vtanh.f32 %v5240_v13  ;;  %4943 = vmatpush1.bf16.msra.mxu0 %v7024_v10  ;;  %v5267_v19 = vadd.f32 %v2618_v26, %v265_v17  ;;  %v2756_v27 = vand.u32 4294901760, %v5762_v37  ;;  %v7039_v61 = vsub.f32 %v6961_v18, %v3723_v21 }
 0x2bd   :  { %8128 = vst [vmem:[#allocation47_spill] sm:$0xff] %v7030_v39  ;;  %v5772_v32 = vpop.eup %5771  ;;  %5791 = vtanh.f32 %v5266_v62  ;;  %v2760_v45 = vand.u32 4294901760, %v5770_v48  ;;  %v7036_v20 = vpack.c.bf16 %v3727_v22, %v3723_v21  ;;  %v7042_v13 = vsub.f32 %v6982_v30, %v3727_v22 }
 0x2be   :  { %v5774_v35 = vpop.eup %5773  ;;  %8130 = vst [vmem:[#allocation49_spill] sm:$0xff] %v7039_v61  ;;  %5793 = vtanh.f32 %v5241_v14  ;;  %v7046_v38 = vsub.f32 %v5762_v37, %v2756_v27  ;;  %v3729_v26 = vand.u32 4294901760, %v5764_v55  ;;  %v3733_v10 = vand.u32 4294901760, %v5772_v32 }
 0x2bf   :  { %v5776_v2 = vpop.eup %5775  ;;  %8129 = vst [vmem:[#allocation48_spill] sm:$0xff] %v7036_v20  ;;  %8131 = vst [vmem:[#allocation50_spill] sm:$0xff] %v7042_v13  ;;  %5795 = vtanh.f32 %v5267_v19  ;;  %v7044_v36 = vpack.c.bf16 %v2760_v45, %v2756_v27  ;;  %v7048_v62 = vsub.f32 %v5770_v48, %v2760_v45  ;;  %5087 = vmatpush1.bf16.msra.mxu1 %v7036_v20  ;;  %v2758_v42 = vand.u32 4294901760, %v7001_v57 }
 0x2c0   :  { %8133 = vst [vmem:[#allocation52_spill] sm:$0xff] %v7046_v38  ;;  %v5778_v17 = vpop.eup %5777  ;;  %v2762_v18 = vand.u32 4294901760, %v5766_v0  ;;  %v3731_v30 = vand.u32 4294901760, %v7004_v9  ;;  %v3735_v22 = vand.u32 4294901760, %v5768_v33  ;;  %v2766_v19 = vand.u32 4294901760, %v5774_v35 }
 0x2c1   :  { %8132 = vst [vmem:[#allocation51_spill] sm:$0xff] %v7044_v36  ;;  %8134 = vst [vmem:[#allocation53_spill] sm:$0xff] %v7048_v62  ;;  %v5780_v21 = vpop.eup %5779  ;;  %4945 = vmatprep.subr.bf16.mxu0 %v7044_v36  ;;  %v2764_v14 = vand.u32 4294901760, %v5778_v17  ;;  %v7054_v27 = vpack.c.bf16 %v3733_v10, %v3729_v26  ;;  %v7056_v48 = vsub.f32 %v5764_v55, %v3729_v26 }
 0x2c2   :  { %v5782_v37 = vpop.eup %5781  ;;  %v7058_v45 = vsub.f32 %v5772_v32, %v3733_v10  ;;  %v7060_v20 = vpack.c.bf16 %v2762_v18, %v2758_v42  ;;  %v7063_v38 = vsub.f32 %v7001_v57, %v2758_v42  ;;  %v7065_v13 = vsub.f32 %v5766_v0, %v2762_v18 }
 0x2c3   :  { %8135 = vst [vmem:[#allocation54_spill] sm:$0xff] %v7054_v27  ;;  %v5784_v62 = vpop.eup %5783  ;;  %v7067_v36 = vpack.c.bf16 %v3735_v22, %v3731_v30  ;;  %v7070_v61 = vsub.f32 %v7004_v9, %v3731_v30  ;;  %5089 = vmatprep.subr.bf16.mxu1 %v7054_v27  ;;  %v7074_v32 = vsub.f32 %v5768_v33, %v3735_v22  ;;  %v3737_v10 = vand.u32 4294901760, %v5780_v21 }
 0x2c4   :  { %8136 = vst [vmem:[#allocation55_spill] sm:$0xff] %v7058_v45  ;;  %8137 = vst [vmem:[#allocation56_spill] sm:$0xff] %v7060_v20  ;;  %v5786_v59 = vpop.eup %5785  ;;  %4947 = vmatpush1.bf16.msra.mxu0 %v7060_v20  ;;  %v7076_v55 = vsub.f32 %v5778_v17, %v2764_v14  ;;  %v2770_v26 = vand.u32 4294901760, %v5782_v37  ;;  %v7079_v42 = vsub.f32 %v5774_v35, %v2766_v19  ;;  %v3739_v18 = vand.u32 4294901760, %v5776_v2 }
 0x2c5   :  { %8138 = vst [vmem:[#allocation57_spill] sm:$0xff] %v7063_v38  ;;  %8139 = vst [vmem:[#allocation58_spill] sm:$0xff] %v7065_v13  ;;  %v5788_v57 = vpop.eup %5787  ;;  %5091 = vmatpush1.bf16.msra.mxu1 %v7067_v36  ;;  %v2768_v0 = vand.u32 4294901760, %v5786_v59  ;;  %v3743_v9 = vand.u32 4294901760, %v5784_v62  ;;  %v7083_v27 = vsub.f32 %v5780_v21, %v3737_v10 }
 0x2c6   :  { %8140 = vst [vmem:[#allocation59_spill] sm:$0xff] %v7067_v36  ;;  %8141 = vst [vmem:[#allocation60_spill] sm:$0xff] %v7070_v61  ;;  %v7081_v30 = vpop.eup %5789  ;;  %v3741_v61 = vand.u32 4294901760, %v5788_v57  ;;  %v7085_v20 = vpack.c.bf16 %v2770_v26, %v2766_v19  ;;  %v7087_v33 = vsub.f32 %v5782_v37, %v2770_v26  ;;  %v7097_v35 = vsub.f32 %v5776_v2, %v3739_v18 }
 0x2c7   :  { %8142 = vst [vmem:[#allocation61_spill] sm:$0xff] %v7074_v32  ;;  %8143 = vst [vmem:[#allocation62_spill] sm:$0xff] %v7076_v55  ;;  %v7089_v17 = vpop.eup %5791  ;;  %v7091_v22 = vpack.c.bf16 %v2768_v0, %v2764_v14  ;;  %v7093_v55 = vsub.f32 %v5786_v59, %v2768_v0  ;;  %v7095_v36 = vpack.c.bf16 %v3743_v9, %v3739_v18  ;;  %v7108_v37 = vand.u32 4294901760, %v7081_v30 }
 0x2c8   :  { %8144 = vst [vmem:[#allocation63_spill] sm:$0xff] %v7079_v42  ;;  %8145 = vst [vmem:[#allocation64_spill] sm:$0xff] %v7085_v20  ;;  %v7099_v42 = vpop.eup %5793  ;;  %v7101_v32 = vpack.c.bf16 %v3741_v61, %v3737_v10  ;;  %v7103_v21 = vsub.f32 %v5788_v57, %v3741_v61  ;;  %v7105_v19 = vsub.f32 %v5784_v62, %v3743_v9  ;;  %v7117_v2 = vand.u32 4294901760, %v7089_v17 }
 0x2c9   :  { %8146 = vst [vmem:[#allocation65_spill] sm:$0xff] %v7087_v33  ;;  %8147 = vst [vmem:[#allocation66_spill] sm:$0xff] %v7089_v17  ;;  %v7110_v26 = vpop.eup %5795  ;;  %4949 = vmatprep.subr.bf16.mxu0 %v7091_v22  ;;  %v7114_v59 = vand.u32 4294901760, %v7099_v42  ;;  %v8155_v14 = vand.u32 4294901760, %v6884_v16  ;;  %v7928_v62 = vand.u32 4294901760, %v6897_v49  ;;  %v7934_v57 = vand.u32 4294901760, %v6886_v44 }
 0x2ca   :  { %8148 = vst [vmem:[#allocation67_spill] sm:$0xff] %v7091_v22  ;;  %8149 = vst [vmem:[#allocation68_spill] sm:$0xff] %v7095_v36  ;;  %5093 = vmatprep.subr.bf16.mxu1 %v7101_v32  ;;  %4951 = vmatpush1.bf16.msra.mxu0 %v7085_v20  ;;  %v7126_v10 = vand.u32 4294901760, %v7110_v26  ;;  %v7939_v20 = vand.u32 4294901760, %v6904_v5  ;;  %v8157_v18 = vand.u32 4294901760, %v6902_v6 }
 0x2cb   :  { %8150 = vst [vmem:[#allocation69_spill] sm:$0xff] %v7101_v32  ;;  %8151 = vst [vmem:[#allocation70_spill] sm:$0xff] %v7103_v21  ;;  %v2873_v61 = vsub.f32 %v6884_v16, %v8155_v14  ;;  %5095 = vmatpush1.bf16.msra.mxu1 %v7095_v36  ;;  %2773 = vmatprep.subr.mxu0 %v7114_v59  ;;  %v2885_v14 = vsub.f32 %v6897_v49, %v7928_v62  ;;  %v7967_v62 = vand.u32 4294901760, %v6910_v25 }
 0x2cc   :  { %8152 = vst [vmem:[#allocation71_spill] sm:$0xff] %v7108_v37  ;;  %8153 = vst [vmem:[#allocation72_spill] sm:$0xff] %v7114_v59  ;;  %3746 = vmatprep.subr.mxu1 %v7126_v10  ;;  %v3846_v0 = vsub.f32 %v6886_v44, %v7934_v57  ;;  %v3858_v36 = vsub.f32 %v6902_v6, %v8157_v18  ;;  %v2891_v32 = vsub.f32 %v6904_v5, %v7939_v20 }
 0x2cd   :  { %8154 = vst [vmem:[#allocation73_spill] sm:$0xff] %v7117_v2  ;;  %8156 = vst [vmem:[#allocation74_spill] sm:$0xff] %v7126_v10  ;;  %v2874_v9 = vand.u32 4294901760, %v2873_v61  ;;  %v8158_v61 = vand.u32 4294901760, %v6877_v40  ;;  %v2886_v49 = vand.u32 4294901760, %v2885_v14  ;;  %v8159_v16 = vand.u32 4294901760, %v6882_v4 }
 0x2ce   :  { %v7950_v57 = vand.u32 4294901760, %v6915_v51  ;;  %2775 = vmatpush1.msra.mxu0 %v7108_v37  ;;  %v3847_v18 = vand.u32 4294901760, %v3846_v0  ;;  %v3859_v6 = vand.u32 4294901760, %v3858_v36  ;;  %v2892_v20 = vand.u32 4294901760, %v2891_v32 }
 0x2cf   :  { %v2879_v22 = vsub.f32 %v6877_v40, %v8158_v61  ;;  %v3852_v17 = vsub.f32 %v6882_v4, %v8159_v16  ;;  %v3864_v61 = vsub.f32 %v6910_v25, %v7967_v62  ;;  %3748 = vmatpush1.msra.mxu1 %v7117_v2  ;;  %v4952_v14 = vpack.c.bf16 %v2886_v49, %v2874_v9 }
 0x2d0   :  { %2820 = vmatmul.mubr.f32.vlgmr.msra.gmra.mrb[26].mxu0 %v6864_v1  ;;  %v2897_v16 = vsub.f32 %v6915_v51, %v7950_v57  ;;  %v5096_v4 = vpack.c.bf16 %v3859_v6, %v3847_v18  ;;  %3793 = vmatmul.mubr.f32.vlgmr.msra.gmra.mrb[26].mxu1 %v6864_v1  ;;  %v7945_v0 = vand.u32 4294901760, %v6918_v50  ;;  %v7944_v32 = vand.u32 4294901760, %v6934_v24 }
 0x2d1   :  { %v2880_v44 = vand.u32 4294901760, %v2879_v22  ;;  %v3853_v5 = vand.u32 4294901760, %v3852_v17  ;;  %v3865_v36 = vand.u32 4294901760, %v3864_v61  ;;  %v7949_v22 = vand.u32 4294901760, %v6929_v58  ;;  %2825 = vmatprep.mubr.f32.mxu0 %v8040_v23  ;;  %4953 = vmatprep.subr.bf16.mxu0 %v4952_v14 }
 0x2d2   :  { %v2898_v9 = vand.u32 4294901760, %v2897_v16  ;;  %v7946_v17 = vand.u32 4294901760, %v6923_v52  ;;  %3798 = vmatprep.mubr.f32.mxu1 %v8040_v23  ;;  %5097 = vmatprep.subr.bf16.mxu1 %v5096_v4  ;;  %v3870_v18 = vsub.f32 %v6918_v50, %v7945_v0  ;;  %v7947_v61 = vand.u32 4294901760, %v6938_v8 }
 0x2d3   :  { %v4954_v49 = vpack.c.bf16 %v2892_v20, %v2880_v44  ;;  %v5098_v6 = vpack.c.bf16 %v3865_v36, %v3853_v5  ;;  %v2909_v1 = vsub.f32 %v6929_v58, %v7949_v22  ;;  %v3882_v20 = vsub.f32 %v6934_v24, %v7944_v32 }
 0x2d4   :  { %v2903_v4 = vsub.f32 %v6923_v52, %v7946_v17  ;;  %v7948_v44 = vand.u32 4294901760, %v6951_v31  ;;  %v7951_v5 = vand.u32 4294901760, %v6954_v34  ;;  %v3871_v16 = vand.u32 4294901760, %v3870_v18  ;;  %2831 = vmatmul.mubr.f32.gmra.mrb[28].mxu0 %v6868_v46  ;;  %3804 = vmatmul.mubr.f32.gmra.mrb[28].mxu1 %v6868_v46 }
 0x2d5   :  { %4955 = vmatpush1.bf16.msra.mxu0 %v4954_v49  ;;  %5099 = vmatpush1.bf16.msra.mxu1 %v5098_v6  ;;  %v2910_v14 = vand.u32 4294901760, %v2909_v1  ;;  %v2915_v36 = vsub.f32 %v6938_v8, %v7947_v61  ;;  %v7965_v49 = vand.u32 4294901760, %v6956_v54  ;;  %v3883_v32 = vand.u32 4294901760, %v3882_v20 }
 0x2d6   :  { %v2904_v0 = vand.u32 4294901760, %v2903_v4  ;;  %v3876_v17 = vsub.f32 %v6951_v31, %v7948_v44  ;;  %v3888_v6 = vsub.f32 %v6954_v34, %v7951_v5  ;;  %2836 = vmatprep.mubr.f32.mxu0 %v8040_v23  ;;  %v7964_v20 = vand.u32 4294901760, %v6965_v63  ;;  %3809 = vmatprep.mubr.f32.mxu1 %v8040_v23 }
 0x2d7   :  { %v4956_v1 = vpack.c.bf16 %v2910_v14, %v2898_v9  ;;  %v2916_v18 = vand.u32 4294901760, %v2915_v36  ;;  %v2921_v61 = vsub.f32 %v6956_v54, %v7965_v49  ;;  %v5100_v4 = vpack.c.bf16 %v3883_v32, %v3871_v16 }
 0x2d8   :  { %v3877_v44 = vand.u32 4294901760, %v3876_v17  ;;  %v3889_v22 = vand.u32 4294901760, %v3888_v6  ;;  %v7961_v57 = vand.u32 4294901760, %v6972_v15  ;;  %v2933_v9 = vsub.f32 %v6965_v63, %v7964_v20  ;;  %2842 = vmatmul.mubr.f32.gmra.mrb[30].mxu0 %v6870_v53  ;;  %3815 = vmatmul.mubr.f32.gmra.mrb[30].mxu1 %v6870_v53  ;;  %v8164_v20 = vld [vmem:[#allocation53_spill] sm:$0xff] }
 0x2d9   :  { %4957 = vmatprep.subr.bf16.mxu0 %v4956_v1  ;;  %v4958_v5 = vpack.c.bf16 %v2916_v18, %v2904_v0  ;;  %v2922_v46 = vand.u32 4294901760, %v2921_v61  ;;  %v7954_v14 = vand.u32 4294901760, %v6974_v12  ;;  %5101 = vmatprep.subr.bf16.mxu1 %v5100_v4  ;;  %v7952_v17 = vand.u32 4294901760, %v6985_v7 }
 0x2da   :  { %v5102_v36 = vpack.c.bf16 %v3889_v22, %v3877_v44  ;;  %v3894_v32 = vsub.f32 %v6972_v15, %v7961_v57  ;;  %v7953_v16 = vand.u32 4294901760, %v6991_v47  ;;  %v2934_v0 = vand.u32 4294901760, %v2933_v9  ;;  %2847 = vmatprep.mubr.f32.mxu0 %v8040_v23  ;;  %3820 = vmatprep.mubr.f32.mxu1 %v8040_v23 }
 0x2db   :  { %4959 = vmatpush1.bf16.msra.mxu0 %v4958_v5  ;;  %v3906_v61 = vsub.f32 %v6974_v12, %v7954_v14  ;;  %v7957_v6 = vand.u32 4294901760, %v6994_v11  ;;  %v7955_v22 = vand.u32 4294901760, %v6999_v56  ;;  %v2927_v1 = vsub.f32 %v6985_v7, %v7952_v17 }
 0x2dc   :  { %5103 = vmatpush1.bf16.msra.mxu1 %v5102_v36  ;;  %v3895_v44 = vand.u32 4294901760, %v3894_v32  ;;  %v2939_v53 = vsub.f32 %v6991_v47, %v7953_v16  ;;  %v7956_v5 = vand.u32 4294901760, %v7010_v29  ;;  %v4960_v18 = vpack.c.bf16 %v2934_v0, %v2922_v46  ;;  %2853 = vmatmul.mubr.f32.gmra.mrb[32].mxu0 %v6875_v28 }
 0x2dd   :  { %v3907_v4 = vand.u32 4294901760, %v3906_v61  ;;  %v3900_v9 = vsub.f32 %v6994_v11, %v7957_v6  ;;  %v3912_v36 = vsub.f32 %v6999_v56, %v7955_v22  ;;  %v2928_v32 = vand.u32 4294901760, %v2927_v1  ;;  %3826 = vmatmul.mubr.f32.gmra.mrb[32].mxu1 %v6875_v28  ;;  %2858 = vmatprep.mubr.f32.mxu0 %v8040_v23 }
 0x2de   :  { %v2940_v17 = vand.u32 4294901760, %v2939_v53  ;;  %v2945_v16 = vsub.f32 %v7010_v29, %v7956_v5  ;;  %v7959_v14 = vand.u32 4294901760, %v7012_v60  ;;  %4961 = vmatprep.subr.bf16.mxu0 %v4960_v18  ;;  %v7958_v22 = vand.u32 4294901760, %v7015_v43  ;;  %3831 = vmatprep.mubr.f32.mxu1 %v8040_v23 }
 0x2df   :  { %v5104_v46 = vpack.c.bf16 %v3907_v4, %v3895_v44  ;;  %v3901_v0 = vand.u32 4294901760, %v3900_v9  ;;  %v3913_v61 = vand.u32 4294901760, %v3912_v36  ;;  %v7960_v6 = vand.u32 4294901760, %v7022_v41  ;;  %v8160_v9 = vld [vmem:[#allocation19_spill] sm:$0xff]  ;;  %v8161_v36 = vld [vmem:[#allocation49_spill] sm:$0xff] }
 0x2e0   :  { %v4962_v1 = vpack.c.bf16 %v2940_v17, %v2928_v32  ;;  %v2946_v53 = vand.u32 4294901760, %v2945_v16  ;;  %v2957_v5 = vsub.f32 %v7012_v60, %v7959_v14  ;;  %v3918_v44 = vsub.f32 %v7015_v43, %v7958_v22  ;;  %2864 = vmatmul.mubr.f32.gmra.mrb[34].mxu0 %v8160_v9 }
 0x2e1   :  { %5105 = vmatprep.subr.bf16.mxu1 %v5104_v46  ;;  %v5106_v28 = vpack.c.bf16 %v3913_v61, %v3901_v0  ;;  %v7962_v18 = vand.u32 4294901760, %v7027_v3  ;;  %v7963_v4 = vand.u32 4294901760, %v7030_v39  ;;  %v3930_v16 = vsub.f32 %v7022_v41, %v7960_v6  ;;  %v8162_v46 = vld [vmem:[#allocation50_spill] sm:$0xff]  ;;  %3837 = vmatmul.mubr.f32.gmra.mrb[34].mxu1 %v8160_v9 }
 0x2e2   :  { %4963 = vmatpush1.bf16.msra.mxu0 %v4962_v1  ;;  %v2958_v17 = vand.u32 4294901760, %v2957_v5  ;;  %v7966_v32 = vand.u32 4294901760, %v8161_v36  ;;  %v7969_v0 = vand.u32 4294901760, %v8162_v46  ;;  %v3919_v61 = vand.u32 4294901760, %v3918_v44  ;;  %v8163_v1 = vld [vmem:[#allocation52_spill] sm:$0xff]  ;;  %3064 = vmatprep.mubr.f32.mxu0 %v8040_v23 }
 0x2e3   :  { %5107 = vmatpush1.bf16.msra.mxu1 %v5106_v28  ;;  %v2951_v22 = vsub.f32 %v7027_v3, %v7962_v18  ;;  %v2963_v5 = vsub.f32 %v7030_v39, %v7963_v4  ;;  %v7970_v14 = vand.u32 4294901760, %v8163_v1  ;;  %v3931_v57 = vand.u32 4294901760, %v3930_v16  ;;  %4037 = vmatprep.mubr.f32.mxu1 %v8040_v23 }
 0x2e4   :  { %v4964_v6 = vpack.c.bf16 %v2958_v17, %v2946_v53  ;;  %v3924_v9 = vsub.f32 %v8161_v36, %v7966_v32  ;;  %v3936_v28 = vsub.f32 %v8162_v46, %v7969_v0  ;;  %v7972_v49 = vand.u32 4294901760, %v8164_v20 }
 0x2e5   :  { %v2952_v44 = vand.u32 4294901760, %v2951_v22  ;;  %v2964_v18 = vand.u32 4294901760, %v2963_v5  ;;  %v2969_v4 = vsub.f32 %v8163_v1, %v7970_v14  ;;  %v5108_v53 = vpack.c.bf16 %v3931_v57, %v3919_v61 }
 0x2e6   :  { %4965 = vmatprep.subr.bf16.mxu0 %v4964_v6  ;;  %v3925_v17 = vand.u32 4294901760, %v3924_v9  ;;  %v3937_v16 = vand.u32 4294901760, %v3936_v28  ;;  %v7971_v32 = vand.u32 4294901760, %v7056_v48  ;;  %v2981_v0 = vsub.f32 %v8164_v20, %v7972_v49  ;;  %v8166_v28 = vld [vmem:[#allocation61_spill] sm:$0xff] }
 0x2e7   :  { %v4966_v62 = vpack.c.bf16 %v2964_v18, %v2952_v44  ;;  %v2970_v36 = vand.u32 4294901760, %v2969_v4  ;;  %v7973_v22 = vand.u32 4294901760, %v7058_v45  ;;  %5109 = vmatprep.subr.bf16.mxu1 %v5108_v53  ;;  %v7975_v57 = vand.u32 4294901760, %v7063_v38  ;;  %v8165_v4 = vld [vmem:[#allocation60_spill] sm:$0xff] }
 0x2e8   :  { %v5110_v5 = vpack.c.bf16 %v3937_v16, %v3925_v17  ;;  %v3942_v14 = vsub.f32 %v7056_v48, %v7971_v32  ;;  %v7976_v6 = vand.u32 4294901760, %v7065_v13  ;;  %v2982_v61 = vand.u32 4294901760, %v2981_v0 }
 0x2e9   :  { %4967 = vmatpush1.bf16.msra.mxu0 %v4966_v62  ;;  %v3954_v18 = vsub.f32 %v7058_v45, %v7973_v22  ;;  %v7981_v9 = vand.u32 4294901760, %v8165_v4  ;;  %v7982_v44 = vand.u32 4294901760, %v8166_v28  ;;  %v2975_v17 = vsub.f32 %v7063_v38, %v7975_v57  ;;  %v8167_v62 = vld [vmem:[#allocation62_spill] sm:$0xff] }
 0x2ea   :  { %5111 = vmatpush1.bf16.msra.mxu1 %v5110_v5  ;;  %v3943_v53 = vand.u32 4294901760, %v3942_v14  ;;  %v2987_v16 = vsub.f32 %v7065_v13, %v7976_v6  ;;  %v7983_v0 = vand.u32 4294901760, %v8167_v62  ;;  %v4968_v32 = vpack.c.bf16 %v2982_v61, %v2970_v36 }
 0x2eb   :  { %v3955_v49 = vand.u32 4294901760, %v3954_v18  ;;  %v3948_v22 = vsub.f32 %v8165_v4, %v7981_v9  ;;  %v3960_v14 = vsub.f32 %v8166_v28, %v7982_v44  ;;  %v2976_v5 = vand.u32 4294901760, %v2975_v17 }
 0x2ec   :  { %v2988_v23 = vand.u32 4294901760, %v2987_v16  ;;  %v2993_v57 = vsub.f32 %v8167_v62, %v7983_v0  ;;  %v7990_v6 = vand.u32 4294901760, %v7093_v55  ;;  %4969 = vmatprep.subr.bf16.mxu0 %v4968_v32  ;;  %v7986_v18 = vand.u32 4294901760, %v7083_v27  ;;  %v8168_v32 = vld [vmem:[#allocation63_spill] sm:$0xff] }
 0x2ed   :  { %v5112_v13 = vpack.c.bf16 %v3955_v49, %v3943_v53  ;;  %v3949_v36 = vand.u32 4294901760, %v3948_v22  ;;  %v3961_v61 = vand.u32 4294901760, %v3960_v14  ;;  %v7984_v17 = vand.u32 4294901760, %v7103_v21 }
 0x2ee   :  { %v4970_v38 = vpack.c.bf16 %v2988_v23, %v2976_v5  ;;  %v2994_v9 = vand.u32 4294901760, %v2993_v57  ;;  %v3005_v44 = vsub.f32 %v7093_v55, %v7990_v6  ;;  %v3966_v0 = vsub.f32 %v7083_v27, %v7986_v18 }
 0x2ef   :  { %5113 = vmatprep.subr.bf16.mxu1 %v5112_v13  ;;  %v5114_v16 = vpack.c.bf16 %v3961_v61, %v3949_v36  ;;  %v7985_v49 = vand.u32 4294901760, %v8168_v32  ;;  %v7987_v22 = vand.u32 4294901760, %v7087_v33  ;;  %v3978_v23 = vsub.f32 %v7103_v21, %v7984_v17 }
 0x2f0   :  { %4971 = vmatpush1.bf16.msra.mxu0 %v4970_v38  ;;  %v3006_v53 = vand.u32 4294901760, %v3005_v44  ;;  %v7988_v57 = vand.u32 4294901760, %v7097_v35  ;;  %v7989_v14 = vand.u32 4294901760, %v7105_v19  ;;  %v3967_v13 = vand.u32 4294901760, %v3966_v0 }
 0x2f1   :  { %5115 = vmatpush1.bf16.msra.mxu1 %v5114_v16  ;;  %v2999_v5 = vsub.f32 %v8168_v32, %v7985_v49  ;;  %v3011_v36 = vsub.f32 %v7087_v33, %v7987_v22  ;;  %v7336_v38 = vsub.f32 %v7099_v42, %v7114_v59  ;;  %v3979_v61 = vand.u32 4294901760, %v3978_v23 }
 0x2f2   :  { %v4972_v44 = vpack.c.bf16 %v3006_v53, %v2994_v9  ;;  %v3972_v17 = vsub.f32 %v7097_v35, %v7988_v57  ;;  %v3984_v0 = vsub.f32 %v7105_v19, %v7989_v14  ;;  %v7347_v22 = vsub.f32 %v7110_v26, %v7126_v10  ;;  %v8172_v14 = vld [vmem:[#allocation66_spill] sm:$0xff] }
 0x2f3   :  { %8169 = vst [vmem:[#allocation19_spill] sm:$0xff] %v7336_v38  ;;  %v3000_v16 = vand.u32 4294901760, %v2999_v5  ;;  %v3012_v49 = vand.u32 4294901760, %v3011_v36  ;;  %v7991_v18 = vand.u32 4294901760, %v7336_v38  ;;  %v5116_v42 = vpack.c.bf16 %v3979_v61, %v3967_v13  ;;  %v8174_v13 = vld [vmem:[#allocation21_spill] sm:$0xff] }
 0x2f4   :  { %8170 = vst [vmem:[#allocation50_spill] sm:$0xff] %v7347_v22  ;;  %4973 = vmatprep.subr.bf16.mxu0 %v4972_v44  ;;  %v3973_v9 = vand.u32 4294901760, %v3972_v17  ;;  %v3985_v53 = vand.u32 4294901760, %v3984_v0  ;;  %v7351_v23 = vsub.f32 %v7081_v30, %v7108_v37  ;;  %v7996_v36 = vand.u32 4294901760, %v7347_v22  ;;  %v8175_v44 = vld [vmem:[#allocation25_spill] sm:$0xff]  ;;  %v8176_v30 = vld [vmem:[#allocation22_spill] sm:$0xff] }
 0x2f5   :  { %v4974_v57 = vpack.c.bf16 %v3012_v49, %v3000_v16  ;;  %v3017_v5 = vsub.f32 %v7336_v38, %v7991_v18  ;;  %v7359_v6 = vsub.f32 %v8172_v14, %v7117_v2  ;;  %5117 = vmatprep.subr.bf16.mxu1 %v5116_v42  ;;  %v4976_v61 = vpack.c.bf16 %v8175_v44, %v8174_v13  ;;  %v8177_v0 = vld [vmem:[#allocation27_spill] sm:$0xff]  ;;  %v8178_v14 = vld [vmem:[#allocation28_spill] sm:$0xff] }
 0x2f6   :  { %8171 = vst [vmem:[#allocation52_spill] sm:$0xff] %v7351_v23  ;;  %v5118_v26 = vpack.c.bf16 %v3985_v53, %v3973_v9  ;;  %v7999_v17 = vand.u32 4294901760, %v7351_v23  ;;  %v5120_v49 = vpack.c.bf16 %v8177_v0, %v8176_v30  ;;  %v3990_v18 = vsub.f32 %v7347_v22, %v7996_v36  ;;  %v8179_v53 = vld [vmem:[#allocation20_spill] sm:$0xff] }
 0x2f7   :  { %8173 = vst [vmem:[#allocation60_spill] sm:$0xff] %v7359_v6  ;;  %4975 = vmatpush1.bf16.msra.mxu0 %v4974_v57  ;;  %v3018_v16 = vand.u32 4294901760, %v3017_v5  ;;  %v8006_v37 = vand.u32 4294901760, %v7359_v6  ;;  %v4978_v42 = vpack.c.bf16 %v8178_v14, %v6877_v40  ;;  %v5122_v2 = vpack.c.bf16 %v6910_v25, %v8179_v53 }
 0x2f8   :  { %5119 = vmatpush1.bf16.msra.mxu1 %v5118_v26  ;;  %v3023_v9 = vsub.f32 %v7351_v23, %v7999_v17  ;;  %v4980_v57 = vpack.c.bf16 %v6929_v58, %v6915_v51  ;;  %v5124_v5 = vpack.c.bf16 %v6934_v24, %v6918_v50  ;;  %v3991_v36 = vand.u32 4294901760, %v3990_v18 }
 0x2f9   :  { %3019 = vmatprep.subr.mxu0 %v3018_v16  ;;  %v3996_v10 = vsub.f32 %v7359_v6, %v8006_v37  ;;  %v4982_v26 = vpack.c.bf16 %v6938_v8, %v6923_v52  ;;  %v5126_v17 = vpack.c.bf16 %v6954_v34, %v6951_v31  ;;  %v4984_v23 = vpack.c.bf16 %v6965_v63, %v6956_v54  ;;  %v8180_v63 = vld [vmem:[#allocation49_spill] sm:$0xff] }
 0x2fa   :  { %v3024_v59 = vand.u32 4294901760, %v3023_v9  ;;  %v5128_v22 = vpack.c.bf16 %v6974_v12, %v6972_v15  ;;  %v4986_v18 = vpack.c.bf16 %v6991_v47, %v6985_v7  ;;  %3992 = vmatprep.subr.mxu1 %v3991_v36  ;;  %v5130_v37 = vpack.c.bf16 %v6999_v56, %v6994_v11  ;;  %v8181_v56 = vld [vmem:[#allocation57_spill] sm:$0xff] }
 0x2fb   :  { %v3997_v16 = vand.u32 4294901760, %v3996_v10  ;;  %v4988_v6 = vpack.c.bf16 %v7012_v60, %v7010_v29  ;;  %v5132_v9 = vpack.c.bf16 %v7022_v41, %v7015_v43  ;;  %v4990_v38 = vpack.c.bf16 %v7030_v39, %v7027_v3  ;;  %v8182_v60 = vld [vmem:[#allocation58_spill] sm:$0xff]  ;;  %v8183_v3 = vld [vmem:[#allocation11_spill] sm:$0xff] }
 0x2fc   :  { %3025 = vmatpush1.msra.mxu0 %v3024_v59  ;;  %v5134_v12 = vpack.c.bf16 %v8162_v46, %v8180_v63  ;;  %v4992_v36 = vpack.c.bf16 %v8164_v20, %v8163_v1  ;;  %v5136_v10 = vpack.c.bf16 %v7058_v45, %v7056_v48  ;;  %v5140_v20 = vpack.c.bf16 %v7103_v21, %v7083_v27 }
 0x2fd   :  { %3998 = vmatpush1.msra.mxu1 %v3997_v16  ;;  %4977 = vmatprep.subr.bf16.mxu0 %v4976_v61  ;;  %v8184_v16 = vand.u32 4294901760, %v8174_v13  ;;  %v8185_v59 = vand.u32 4294901760, %v8175_v44  ;;  %v8187_v29 = vand.u32 4294901760, %v8177_v0  ;;  %v8188_v45 = vand.u32 4294901760, %v6877_v40 }
 0x2fe   :  { %5121 = vmatprep.subr.bf16.mxu1 %v5120_v49  ;;  %3066 = vmatmul.mubr.f32.vlgmr.msra.gmra.mrb[26].mxu0 %v8183_v3  ;;  %v8186_v49 = vand.u32 4294901760, %v8176_v30  ;;  %v8189_v33 = vand.u32 4294901760, %v8178_v14  ;;  %v8190_v13 = vand.u32 4294901760, %v8179_v53  ;;  %v8191_v44 = vand.u32 4294901760, %v6910_v25 }
 0x2ff   :  { %4979 = vmatpush1.bf16.msra.mxu0 %v4978_v42  ;;  %4039 = vmatmul.mubr.f32.vlgmr.msra.gmra.mrb[26].mxu1 %v8183_v3  ;;  %v7426_v39 = vpack.c.bf16 %v8185_v59, %v8184_v16  ;;  %v8192_v30 = vand.u32 4294901760, %v6915_v51  ;;  %v8193_v0 = vand.u32 4294901760, %v6929_v58  ;;  %v8194_v40 = vand.u32 4294901760, %v6918_v50 }
 0x300   :  { %v7432_v21 = vpack.c.bf16 %v8187_v29, %v8186_v49  ;;  %v7438_v61 = vpack.c.bf16 %v8189_v33, %v8188_v45  ;;  %5123 = vmatpush1.bf16.msra.mxu1 %v5122_v2  ;;  %4981 = vmatprep.subr.bf16.mxu0 %v4980_v57  ;;  %v7444_v42 = vpack.c.bf16 %v8191_v44, %v8190_v13  ;;  %v8195_v14 = vand.u32 4294901760, %v6934_v24  ;;  %v8202_v24 = vld [vmem:[#allocation35_spill] sm:$0xff] }
 0x301   :  { %v7450_v29 = vpack.c.bf16 %v8193_v0, %v8192_v30  ;;  %5125 = vmatprep.subr.bf16.mxu1 %v5124_v5  ;;  %v8196_v33 = vmov 0.0   ;;  %v8197_v2 = vand.u32 4294901760, %v6923_v52  ;;  %v8198_v25 = vand.u32 4294901760, %v6938_v8  ;;  %v8204_v5 = vld [vmem:[#allocation13_spill] sm:$0xff]  ;;  %v8211_v30 = vld [vmem:[#allocation40_spill] sm:$0xff] }
 0x302   :  { %v7456_v45 = vpack.c.bf16 %v8195_v14, %v8194_v40  ;;  %3071 = vmatprep.mubr.f32.mxu0 %v8196_v33  ;;  %v8199_v51 = vand.u32 4294901760, %v6951_v31  ;;  %v8200_v58 = vand.u32 4294901760, %v6954_v34  ;;  %v8201_v50 = vand.u32 4294901760, %v6956_v54  ;;  %4044 = vmatprep.mubr.f32.mxu1 %v8196_v33  ;;  %v8206_v8 = vld [vmem:[#allocation37_spill] sm:$0xff] }
 0x303   :  { %v7463_v53 = vpack.c.bf16 %v8198_v25, %v8197_v2  ;;  %v8203_v59 = vand.u32 4294901760, %v8202_v24  ;;  %3073 = vmatmul.mubr.f32.gmra.mrb[28].mxu0 %v8204_v5  ;;  %v8205_v52 = vand.u32 4294901760, %v6972_v15  ;;  %v8207_v49 = vand.u32 4294901760, %v8206_v8  ;;  %4046 = vmatmul.mubr.f32.gmra.mrb[28].mxu1 %v8204_v5  ;;  %v8213_v15 = vld [vmem:[#allocation42_spill] sm:$0xff]  ;;  %v8215_v2 = vld [vmem:[#allocation43_spill] sm:$0xff] }
 0x304   :  { %v7469_v57 = vpack.c.bf16 %v8200_v58, %v8199_v51  ;;  %v8208_v31 = vand.u32 4294901760, %v6985_v7  ;;  %v8209_v34 = vand.u32 4294901760, %v6991_v47  ;;  %v8210_v54 = vand.u32 4294901760, %v6994_v11  ;;  %4983 = vmatpush1.bf16.msra.mxu0 %v4982_v26  ;;  %v8219_v11 = vld [vmem:[#allocation46_spill] sm:$0xff]  ;;  %v8221_v24 = vld [vmem:[#allocation47_spill] sm:$0xff]  ;;  %5127 = vmatpush1.bf16.msra.mxu1 %v5126_v17 }
 0x305   :  { %v7475_v16 = vpack.c.bf16 %v8203_v59, %v8201_v50  ;;  %v7483_v13 = vpack.c.bf16 %v8207_v49, %v8205_v52  ;;  %v8212_v0 = vand.u32 4294901760, %v8211_v30  ;;  %v8214_v14 = vand.u32 4294901760, %v8213_v15  ;;  %4985 = vmatprep.subr.bf16.mxu0 %v4984_v23  ;;  %v8229_v30 = vld [vmem:[#allocation55_spill] sm:$0xff]  ;;  %5129 = vmatprep.subr.bf16.mxu1 %v5128_v22 }
 0x306   :  { %v7489_v44 = vpack.c.bf16 %v8209_v34, %v8208_v31  ;;  %v8216_v25 = vand.u32 4294901760, %v8215_v2  ;;  %v8217_v7 = vand.u32 4294901760, %v7015_v43  ;;  %v8218_v47 = vand.u32 4294901760, %v7022_v41  ;;  %v8226_v31 = vld [vmem:[#allocation53_spill] sm:$0xff]  ;;  %3078 = vmatprep.mubr.f32.mxu0 %v8196_v33  ;;  %4051 = vmatprep.mubr.f32.mxu1 %v8196_v33  ;;  %v8237_v22 = vld [vmem:[#allocation15_spill] sm:$0xff] }
 0x307   :  { %v7495_v40 = vpack.c.bf16 %v8212_v0, %v8210_v54  ;;  %v8220_v50 = vand.u32 4294901760, %v8219_v11  ;;  %v8222_v59 = vand.u32 4294901760, %v8221_v24  ;;  %v8223_v26 = vand.u32 4294901760, %v8180_v63  ;;  %3080 = vmatmul.mubr.f32.gmra.mrb[30].mxu0 %v8237_v22  ;;  %4053 = vmatmul.mubr.f32.gmra.mrb[30].mxu1 %v8237_v22 }
 0x308   :  { %v7502_v51 = vpack.c.bf16 %v8216_v25, %v8214_v14  ;;  %v7508_v58 = vpack.c.bf16 %v8218_v47, %v8217_v7  ;;  %v8224_v8 = vand.u32 4294901760, %v8162_v46  ;;  %v8225_v43 = vand.u32 4294901760, %v8163_v1  ;;  %v8239_v47 = vld [vmem:[#allocation70_spill] sm:$0xff]  ;;  %4987 = vmatpush1.bf16.msra.mxu0 %v4986_v18  ;;  %5131 = vmatpush1.bf16.msra.mxu1 %v5130_v37 }
 0x309   :  { %v7514_v52 = vpack.c.bf16 %v8222_v59, %v8220_v50  ;;  %v8227_v41 = vand.u32 4294901760, %v8226_v31  ;;  %v8228_v54 = vand.u32 4294901760, %v7056_v48  ;;  %v8230_v0 = vand.u32 4294901760, %v8229_v30  ;;  %v8242_v59 = vld [vmem:[#allocation65_spill] sm:$0xff]  ;;  %4989 = vmatprep.subr.bf16.mxu0 %v4988_v6  ;;  %5133 = vmatprep.subr.bf16.mxu1 %v5132_v9  ;;  %v8247_v18 = vld [vmem:[#allocation14_spill] sm:$0xff]  ;;  %v8259_v9 = vld [vmem:[#allocation12_spill] sm:$0xff] }
 0x30a   :  { %v7520_v49 = vpack.c.bf16 %v8224_v8, %v8223_v26  ;;  %v8231_v63 = vand.u32 4294901760, %v8181_v56  ;;  %v8232_v46 = vand.u32 4294901760, %v8182_v60  ;;  %v8233_v1 = vand.u32 4294901760, %v8165_v4  ;;  %3085 = vmatprep.mubr.f32.mxu0 %v8196_v33  ;;  %4058 = vmatprep.mubr.f32.mxu1 %v8196_v33  ;;  %v8266_v30 = vld [vmem:[#allocation33_spill] sm:$0xff] }
 0x30b   :  { %v7526_v34 = vpack.c.bf16 %v8227_v41, %v8225_v43  ;;  %v7532_v15 = vpack.c.bf16 %v8230_v0, %v8228_v54  ;;  %v8234_v17 = vand.u32 4294901760, %v8166_v28  ;;  %v8235_v48 = vand.u32 4294901760, %v8167_v62  ;;  %v8265_v54 = vld [vmem:[#allocation32_spill] sm:$0xff]  ;;  %v8267_v0 = vld [vmem:[#allocation34_spill] sm:$0xff] }
 0x30c   :  { %v7539_v23 = vpack.c.bf16 %v8232_v46, %v8231_v63  ;;  %v8236_v2 = vand.u32 4294901760, %v7093_v55  ;;  %v8238_v7 = vand.u32 4294901760, %v7083_v27  ;;  %v8240_v11 = vand.u32 4294901760, %v8239_v47  ;;  %v8246_v27 = vld [vmem:[#allocation4_spill] sm:$0xff]  ;;  %4991 = vmatpush1.bf16.msra.mxu0 %v4990_v38  ;;  %5135 = vmatpush1.bf16.msra.mxu1 %v5134_v12  ;;  %v8269_v46 = vld [vmem:[#allocation6_spill] sm:$0xff]  ;;  %v8275_v47 = vld [vmem:[#allocation45_spill] sm:$0xff] }
 0x30d   :  { %v7545_v14 = vpack.c.bf16 %v8234_v17, %v8233_v1  ;;  %v8241_v24 = vand.u32 4294901760, %v8168_v32  ;;  %v8243_v26 = vand.u32 4294901760, %v8242_v59  ;;  %v8244_v43 = vand.u32 4294901760, %v7097_v35  ;;  %3087 = vmatmul.mubr.f32.gmra.mrb[32].mxu0 %v8246_v27  ;;  %4060 = vmatmul.mubr.f32.gmra.mrb[32].mxu1 %v8246_v27  ;;  %v8268_v63 = vld [vmem:[#allocation36_spill] sm:$0xff]  ;;  %v8270_v1 = vld [vmem:[#allocation38_spill] sm:$0xff]  ;;  %v8271_v17 = vld [vmem:[#allocation39_spill] sm:$0xff] }
 0x30e   :  { %v7551_v25 = vpack.c.bf16 %v8236_v2, %v8235_v48  ;;  %v7559_v50 = vpack.c.bf16 %v8240_v11, %v8238_v7  ;;  %v8245_v31 = vand.u32 4294901760, %v7105_v19  ;;  %4993 = vmatprep.subr.bf16.mxu0 %v4992_v36  ;;  %5137 = vmatprep.subr.bf16.mxu1 %v5136_v10  ;;  %v8248_v37 = vpack.c.bf16 %v8182_v60, %v8181_v56  ;;  %v8253_v56 = vld [vmem:[#allocation19_spill] sm:$0xff]  ;;  %v8264_v10 = vld [vmem:[#allocation5_spill] sm:$0xff]  ;;  %v8273_v2 = vld [vmem:[#allocation44_spill] sm:$0xff] }
 0x30f   :  { %v7565_v8 = vpack.c.bf16 %v8243_v26, %v8241_v24  ;;  %3092 = vmatprep.mubr.f32.mxu0 %v8196_v33  ;;  %4065 = vmatprep.mubr.f32.mxu1 %v8196_v33  ;;  %v8249_v6 = vpack.c.bf16 %v8166_v28, %v8165_v4  ;;  %v8250_v12 = vpack.c.bf16 %v7093_v55, %v8167_v62  ;;  %v8254_v4 = vld [vmem:[#allocation50_spill] sm:$0xff]  ;;  %v8255_v28 = vld [vmem:[#allocation52_spill] sm:$0xff]  ;;  %v8263_v36 = vld [vmem:[#allocation31_spill] sm:$0xff] }
 0x310   :  { %v7571_v41 = vpack.c.bf16 %v8245_v31, %v8244_v43  ;;  %4995 = vmatpush1.bf16.msra.mxu0 %v8248_v37  ;;  %v8251_v38 = vpack.c.bf16 %v8242_v59, %v8168_v32  ;;  %v8252_v60 = vpack.c.bf16 %v7105_v19, %v7097_v35  ;;  %v8256_v55 = vld [vmem:[#allocation60_spill] sm:$0xff]  ;;  %v8258_v62 = vld [vmem:[#allocation26_spill] sm:$0xff]  ;;  %v8260_v32 = vld [vmem:[#allocation23_spill] sm:$0xff] }
 0x311   :  { %3094 = vmatmul.mubr.f32.gmra.mrb[34].mxu0 %v8247_v18  ;;  %4067 = vmatmul.mubr.f32.gmra.mrb[34].mxu1 %v8247_v18  ;;  %v8261_v35 = vld [vmem:[#allocation29_spill] sm:$0xff]  ;;  %v8262_v19 = vld [vmem:[#allocation30_spill] sm:$0xff]  ;;  %v8274_v7 = vld [vmem:[#allocation7_spill] sm:$0xff] }
 0x312   :  { %5139 = vmatpush1.bf16.msra.mxu1 %v8249_v6  ;;  %4997 = vmatprep.subr.bf16.mxu0 %v8250_v12  ;;  %v8272_v48 = vld [vmem:[#allocation41_spill] sm:$0xff]  ;;  %v8276_v11 = vld [vmem:[#allocation48_spill] sm:$0xff]  ;;  %v8277_v24 = vld [vmem:[#allocation51_spill] sm:$0xff] }
 0x313   :  { %5141 = vmatprep.subr.bf16.mxu1 %v5140_v20  ;;  %3216 = vmatprep.mubr.f32.mxu0 %v8196_v33  ;;  %v8257_v20 = vld [vmem:[#allocation24_spill] sm:$0xff]  ;;  %v8278_v59 = vld [vmem:[#allocation54_spill] sm:$0xff]  ;;  %v8281_v31 = vld [vmem:[#allocation59_spill] sm:$0xff] }
 0x314   :  { %4189 = vmatprep.mubr.f32.mxu1 %v8196_v33  ;;  %4999 = vmatpush1.bf16.msra.mxu0 %v8251_v38  ;;  %v8279_v26 = vld [vmem:[#allocation8_spill] sm:$0xff]  ;;  %v8282_v37 = vld [vmem:[#allocation67_spill] sm:$0xff]  ;;  %v8283_v6 = vld [vmem:[#allocation69_spill] sm:$0xff] }
 0x315   :  { %3174 = vmatprep.subr.mxu0 %v8253_v56  ;;  %v8280_v43 = vld [vmem:[#allocation56_spill] sm:$0xff] }
 0x316   :  { %5143 = vmatpush1.bf16.msra.mxu1 %v8252_v60  ;;  %v8284_v12 = vld [vmem:[#allocation64_spill] sm:$0xff] }
 0x317   :  { %4147 = vmatprep.subr.mxu1 %v8254_v4  ;;  %v8285_v38 = vld [vmem:[#allocation68_spill] sm:$0xff] }
 0x318   :  { %3177 = vmatpush1.msra.mxu0 %v8255_v28  ;;  %v8286_v60 = vld [vmem:[#allocation72_spill] sm:$0xff] }
 0x319   :  { %5001 = vmatprep.subr.bf16.mxu0 %v8257_v20  ;;  %3219 = vmatmul.mubr.f32.vlgmr.msra.gmra.mrb[26].mxu0 %v8259_v9 }
 0x31a   :  { %4150 = vmatpush1.msra.mxu1 %v8256_v55  ;;  %5003 = vmatpush1.bf16.msra.mxu0 %v8260_v32 }
 0x31b   :  { %5145 = vmatprep.subr.bf16.mxu1 %v8258_v62  ;;  %4192 = vmatmul.mubr.f32.vlgmr.msra.gmra.mrb[26].mxu1 %v8259_v9  ;;  %v8287_v9 = vld [vmem:[#allocation74_spill] sm:$0xff] }
 0x31c   :  { %5147 = vmatpush1.bf16.msra.mxu1 %v8261_v35  ;;  %5005 = vmatprep.subr.bf16.mxu0 %v8262_v19 }
 0x31d   :  { %5149 = vmatprep.subr.bf16.mxu1 %v8263_v36  ;;  %3224 = vmatprep.mubr.f32.mxu0 %v8196_v33 }
 0x31e   :  { %4197 = vmatprep.mubr.f32.mxu1 %v8196_v33  ;;  %3227 = vmatmul.mubr.f32.gmra.mrb[28].mxu0 %v8264_v10 }
 0x31f   :  { %5007 = vmatpush1.bf16.msra.mxu0 %v8265_v54  ;;  %4200 = vmatmul.mubr.f32.gmra.mrb[28].mxu1 %v8264_v10  ;;  %v8288_v10 = vld [vmem:[#allocation71_spill] sm:$0xff] }
 0x320   :  { %5151 = vmatpush1.bf16.msra.mxu1 %v8266_v30  ;;  %5009 = vmatprep.subr.bf16.mxu0 %v8267_v0 }
 0x321   :  { %5153 = vmatprep.subr.bf16.mxu1 %v8268_v63  ;;  %3232 = vmatprep.mubr.f32.mxu0 %v8196_v33 }
 0x322   :  { %4205 = vmatprep.mubr.f32.mxu1 %v8196_v33  ;;  %3235 = vmatmul.mubr.f32.gmra.mrb[30].mxu0 %v8269_v46 }
 0x323   :  { %5011 = vmatpush1.bf16.msra.mxu0 %v8270_v1  ;;  %4208 = vmatmul.mubr.f32.gmra.mrb[30].mxu1 %v8269_v46  ;;  %v8289_v46 = vld [vmem:[#allocation73_spill] sm:$0xff] }
 0x324   :  { %5155 = vmatpush1.bf16.msra.mxu1 %v8271_v17  ;;  %5013 = vmatprep.subr.bf16.mxu0 %v8272_v48 }
 0x325   :  { %5157 = vmatprep.subr.bf16.mxu1 %v8273_v2  ;;  %3240 = vmatprep.mubr.f32.mxu0 %v8196_v33 }
 0x326   :  { %4213 = vmatprep.mubr.f32.mxu1 %v8196_v33  ;;  %3243 = vmatmul.mubr.f32.gmra.mrb[32].mxu0 %v8274_v7 }
 0x327   :  { %5015 = vmatpush1.bf16.msra.mxu0 %v8275_v47  ;;  %4216 = vmatmul.mubr.f32.gmra.mrb[32].mxu1 %v8274_v7  ;;  %v8290_v7 = vld [vmem:[#allocation17_spill] sm:$0xff] }
 0x328   :  { %5159 = vmatpush1.bf16.msra.mxu1 %v8276_v11  ;;  %5017 = vmatprep.subr.bf16.mxu0 %v8277_v24 }
 0x329   :  { %5161 = vmatprep.subr.bf16.mxu1 %v8278_v59  ;;  %3248 = vmatprep.mubr.f32.mxu0 %v8196_v33 }
 0x32a   :  { %4221 = vmatprep.mubr.f32.mxu1 %v8196_v33  ;;  %3251 = vmatmul.mubr.f32.gmra.mrb[34].mxu0 %v8279_v26 }
 0x32b   :  { %5019 = vmatpush1.bf16.msra.mxu0 %v8280_v43  ;;  %4224 = vmatmul.mubr.f32.gmra.mrb[34].mxu1 %v8279_v26  ;;  %v8291_v26 = vld [vmem:[#allocation9_spill] sm:$0xff] }
 0x32c   :  { %5163 = vmatpush1.bf16.msra.mxu1 %v8281_v31  ;;  %5021 = vmatprep.subr.bf16.mxu0 %v8282_v37 }
 0x32d   :  { %5165 = vmatprep.subr.bf16.mxu1 %v8283_v6  ;;  %3347 = vmatprep.mubr.f32.mxu0 %v8196_v33 }
 0x32e   :  { %4320 = vmatprep.mubr.f32.mxu1 %v8196_v33 }
 0x32f   :  { %5023 = vmatpush1.bf16.msra.mxu0 %v8284_v12 }
 0x330   :  { %5167 = vmatpush1.bf16.msra.mxu1 %v8285_v38  ;;  %3306 = vmatprep.subr.mxu0 %v8286_v60 }
 0x331   :  { %4279 = vmatprep.subr.mxu1 %v8287_v9 }
 0x333   :  { %3308 = vmatpush1.msra.mxu0 %v8288_v10 }
 0x334   :  { %4281 = vmatpush1.msra.mxu1 %v8289_v46  ;;  %5025 = vmatprep.subr.bf16.mxu0 %v7426_v39  ;;  %v8292_v39 = vld [vmem:[#allocation10_spill] sm:$0xff] }
 0x335   :  { %5169 = vmatprep.subr.bf16.mxu1 %v7432_v21  ;;  %3351 = vmatmul.mubr.f32.vlgmr.msra.gmra.mrb[26].mxu0 %v8290_v7  ;;  %v8293_v21 = vld [vmem:[#allocation16_spill] sm:$0xff] }
 0x336   :  { %5027 = vmatpush1.bf16.msra.mxu0 %v7438_v61  ;;  %4324 = vmatmul.mubr.f32.vlgmr.msra.gmra.mrb[26].mxu1 %v8290_v7  ;;  %v8294_v61 = vld [vmem:[#allocation18_spill] sm:$0xff] }
 0x337   :  { %5171 = vmatpush1.bf16.msra.mxu1 %v7444_v42  ;;  %5029 = vmatprep.subr.bf16.mxu0 %v7450_v29  ;;  %v8295_v42 = vand.u32 4294901760, %v8253_v56  ;;  %v8296_v29 = vand.u32 4294901760, %v8254_v4 }
 0x338   :  { %5173 = vmatprep.subr.bf16.mxu1 %v7456_v45  ;;  %3356 = vmatprep.mubr.f32.mxu0 %v8196_v33  ;;  %v8297_v45 = vand.u32 4294901760, %v8255_v28 }
 0x339   :  { %4329 = vmatprep.mubr.f32.mxu1 %v8196_v33  ;;  %3360 = vmatmul.mubr.f32.gmra.mrb[28].mxu0 %v8291_v26 }
 0x33a   :  { %5031 = vmatpush1.bf16.msra.mxu0 %v7463_v53  ;;  %4333 = vmatmul.mubr.f32.gmra.mrb[28].mxu1 %v8291_v26  ;;  %v8298_v53 = vand.u32 4294901760, %v8256_v55 }
 0x33b   :  { %5175 = vmatpush1.bf16.msra.mxu1 %v7469_v57  ;;  %5033 = vmatprep.subr.bf16.mxu0 %v7475_v16 }
 0x33c   :  { %5177 = vmatprep.subr.bf16.mxu1 %v7483_v13  ;;  %3365 = vmatprep.mubr.f32.mxu0 %v8196_v33 }
 0x33d   :  { %4338 = vmatprep.mubr.f32.mxu1 %v8196_v33  ;;  %3369 = vmatmul.mubr.f32.gmra.mrb[30].mxu0 %v8292_v39 }
 0x33e   :  { %5035 = vmatpush1.bf16.msra.mxu0 %v7489_v44  ;;  %4342 = vmatmul.mubr.f32.gmra.mrb[30].mxu1 %v8292_v39  ;;  %v2691_v44 = vpop.permute.xlu0 %2690 }
 0x33f   :  { %5179 = vmatpush1.bf16.msra.mxu1 %v7495_v40  ;;  %5037 = vmatprep.subr.bf16.mxu0 %v7502_v51 }
 0x340   :  { %5181 = vmatprep.subr.bf16.mxu1 %v7508_v58  ;;  %3374 = vmatprep.mubr.f32.mxu0 %v8196_v33 }
 0x341   :  { %4347 = vmatprep.mubr.f32.mxu1 %v8196_v33  ;;  %3378 = vmatmul.mubr.f32.gmra.mrb[32].mxu0 %v8293_v21 }
 0x342   :  { %5039 = vmatpush1.bf16.msra.mxu0 %v7514_v52  ;;  %4351 = vmatmul.mubr.f32.gmra.mrb[32].mxu1 %v8293_v21 }
 0x343   :  { %5183 = vmatpush1.bf16.msra.mxu1 %v7520_v49  ;;  %5041 = vmatprep.subr.bf16.mxu0 %v7526_v34 }
 0x344   :  { %5185 = vmatprep.subr.bf16.mxu1 %v7532_v15  ;;  %3383 = vmatprep.mubr.f32.mxu0 %v8196_v33 }
 0x345   :  { %4356 = vmatprep.mubr.f32.mxu1 %v8196_v33  ;;  %3387 = vmatmul.mubr.f32.gmra.mrb[34].mxu0 %v8294_v61 }
 0x346   :  { %5043 = vmatpush1.bf16.msra.mxu0 %v7539_v23  ;;  %4360 = vmatmul.mubr.f32.gmra.mrb[34].mxu1 %v8294_v61 }
 0x347   :  { %5187 = vmatpush1.bf16.msra.mxu1 %v7545_v14  ;;  %5045 = vmatprep.subr.bf16.mxu0 %v7551_v25 }
 0x348   :  { %5189 = vmatprep.subr.bf16.mxu1 %v7559_v50  ;;  %3535 = vmatprep.mubr.f32.mxu0 %v8196_v33 }
 0x349   :  { %4508 = vmatprep.mubr.f32.mxu1 %v8196_v33 }
 0x34a   :  { %5047 = vmatpush1.bf16.msra.mxu0 %v7565_v8  ;;  %v2701_v8 = vpop.permute.xlu0 %2700 }
 0x34b   :  { %5191 = vmatpush1.bf16.msra.mxu1 %v7571_v41  ;;  %3492 = vmatprep.subr.mxu0 %v8295_v42 }
 0x34c   :  { %4465 = vmatprep.subr.mxu1 %v8296_v29 }
 0x34e   :  { %3496 = vmatpush1.msra.mxu0 %v8297_v45 }
 0x34f   :  { %4469 = vmatpush1.msra.mxu1 %v8298_v53  ;;  %5049 = vmatprep.subr.bf16.mxu0 %v8257_v20 }
 0x350   :  { %5193 = vmatprep.subr.bf16.mxu1 %v8258_v62  ;;  %3537 = vmatmul.mubr.f32.vlgmr.msra.gmra.mrb[26].mxu0 %v8183_v3 }
 0x351   :  { %5051 = vmatpush1.bf16.msra.mxu0 %v8260_v32  ;;  %4510 = vmatmul.mubr.f32.vlgmr.msra.gmra.mrb[26].mxu1 %v8183_v3 }
 0x352   :  { %5195 = vmatpush1.bf16.msra.mxu1 %v8261_v35  ;;  %5053 = vmatprep.subr.bf16.mxu0 %v8262_v19 }
 0x353   :  { %5197 = vmatprep.subr.bf16.mxu1 %v8263_v36  ;;  %3542 = vmatprep.mubr.f32.mxu0 %v8196_v33 }
 0x354   :  { %4515 = vmatprep.mubr.f32.mxu1 %v8196_v33  ;;  %3544 = vmatmul.mubr.f32.gmra.mrb[28].mxu0 %v8204_v5 }
 0x355   :  { %5055 = vmatpush1.bf16.msra.mxu0 %v8265_v54  ;;  %4517 = vmatmul.mubr.f32.gmra.mrb[28].mxu1 %v8204_v5 }
 0x356   :  { %5199 = vmatpush1.bf16.msra.mxu1 %v8266_v30  ;;  %5057 = vmatprep.subr.bf16.mxu0 %v8267_v0 }
 0x357   :  { %5201 = vmatprep.subr.bf16.mxu1 %v8268_v63  ;;  %3549 = vmatprep.mubr.f32.mxu0 %v8196_v33 }
 0x358   :  { %4522 = vmatprep.mubr.f32.mxu1 %v8196_v33  ;;  %3551 = vmatmul.mubr.f32.gmra.mrb[30].mxu0 %v8237_v22 }
 0x359   :  { %5059 = vmatpush1.bf16.msra.mxu0 %v8270_v1  ;;  %4524 = vmatmul.mubr.f32.gmra.mrb[30].mxu1 %v8237_v22 }
 0x35a   :  { %5203 = vmatpush1.bf16.msra.mxu1 %v8271_v17  ;;  %5061 = vmatprep.subr.bf16.mxu0 %v8272_v48  ;;  %v4698_v48 = vpop.permute.xlu0 %4697 }
 0x35b   :  { %5205 = vmatprep.subr.bf16.mxu1 %v8273_v2  ;;  %3556 = vmatprep.mubr.f32.mxu0 %v8196_v33 }
 0x35c   :  { %4529 = vmatprep.mubr.f32.mxu1 %v8196_v33  ;;  %3558 = vmatmul.mubr.f32.gmra.mrb[32].mxu0 %v8246_v27 }
 0x35d   :  { %5063 = vmatpush1.bf16.msra.mxu0 %v8275_v47  ;;  %4531 = vmatmul.mubr.f32.gmra.mrb[32].mxu1 %v8246_v27 }
 0x35e   :  { %5207 = vmatpush1.bf16.msra.mxu1 %v8276_v11  ;;  %5065 = vmatprep.subr.bf16.mxu0 %v8277_v24  ;;  %v4708_v53 = vpop.permute.xlu0 %4707 }
 0x35f   :  { %5209 = vmatprep.subr.bf16.mxu1 %v8278_v59  ;;  %3563 = vmatprep.mubr.f32.mxu0 %v8196_v33 }
 0x360   :  { %4536 = vmatprep.mubr.f32.mxu1 %v8196_v33  ;;  %3565 = vmatmul.mubr.f32.gmra.mrb[34].mxu0 %v8247_v18 }
 0x361   :  { %5067 = vmatpush1.bf16.msra.mxu0 %v8280_v43  ;;  %4538 = vmatmul.mubr.f32.gmra.mrb[34].mxu1 %v8247_v18 }
 0x362   :  { %5211 = vmatpush1.bf16.msra.mxu1 %v8281_v31  ;;  %5069 = vmatprep.subr.bf16.mxu0 %v8282_v37 }
 0x363   :  { %5213 = vmatprep.subr.bf16.mxu1 %v8283_v6  ;;  %3661 = vmatprep.mubr.f32.mxu0 %v8196_v33 }
 0x364   :  { %4634 = vmatprep.mubr.f32.mxu1 %v8196_v33 }
 0x365   :  { %5071 = vmatpush1.bf16.msra.mxu0 %v8284_v12 }
 0x366   :  { %5215 = vmatpush1.bf16.msra.mxu1 %v8285_v38  ;;  %3620 = vmatprep.subr.mxu0 %v8286_v60 }
 0x367   :  { %4593 = vmatprep.subr.mxu1 %v8287_v9 }
 0x369   :  { %3622 = vmatpush1.msra.mxu0 %v8288_v10 }
 0x36a   :  { %4595 = vmatpush1.msra.mxu1 %v8289_v46  ;;  %3663 = vmatmul.mubr.f32.vlgmr.msra.gmra.mrb[26].mxu0 %v8183_v3 }
 0x36b   :  { %4636 = vmatmul.mubr.f32.vlgmr.msra.gmra.mrb[26].mxu1 %v8183_v3  ;;  %3668 = vmatprep.mubr.f32.mxu0 %v8196_v33  ;;  %v2686_v3 = vpop.permute.xlu1 %2685 }
 0x36c   :  { %4641 = vmatprep.mubr.f32.mxu1 %v8196_v33 }
 0x36e   :  { %3670 = vmatmul.mubr.f32.gmra.mrb[28].mxu0 %v8204_v5 }
 0x36f   :  { %4643 = vmatmul.mubr.f32.gmra.mrb[28].mxu1 %v8204_v5  ;;  %3675 = vmatprep.mubr.f32.mxu0 %v8196_v33  ;;  %v2696_v49 = vpop.permute.xlu1 %2695 }
 0x370   :  { %4648 = vmatprep.mubr.f32.mxu1 %v8196_v33 }
 0x372   :  { %3677 = vmatmul.mubr.f32.gmra.mrb[30].mxu0 %v8237_v22 }
 0x373   :  { %4650 = vmatmul.mubr.f32.gmra.mrb[30].mxu1 %v8237_v22  ;;  %3682 = vmatprep.mubr.f32.mxu0 %v8196_v33  ;;  %v2706_v4 = vpop.permute.xlu1 %2705 }
 0x374   :  { %4655 = vmatprep.mubr.f32.mxu1 %v8196_v33 }
 0x376   :  { %3684 = vmatmul.mubr.f32.gmra.mrb[32].mxu0 %v8246_v27 }
 0x377   :  { %4657 = vmatmul.mubr.f32.gmra.mrb[32].mxu1 %v8246_v27  ;;  %3689 = vmatprep.mubr.f32.mxu0 %v8196_v33  ;;  %v4703_v11 = vpop.permute.xlu1 %4702 }
 0x378   :  { %4662 = vmatprep.mubr.f32.mxu1 %v8196_v33 }
 0x37a   :  { %3691 = vmatmul.mubr.f32.gmra.mrb[34].mxu0 %v8247_v18 }
 0x37b   :  { %4664 = vmatmul.mubr.f32.gmra.mrb[34].mxu1 %v8247_v18 }
 0x43d   :  { %v3664_v57 = vpop.f32.mrb[26].mxu0 }
 0x43e   :  { %v5268_v16 = vadd.f32 %v3664_v57, %v2686_v3  ;;  %v4637_v5 = vpop.f32.mrb[26].mxu1  ;;  %v3666_v13 = vpop.f32.mrb[27].mxu0 }
 0x43f   :  { %v5278_v40 = vadd.f32 %v4637_v5, %v2686_v3  ;;  %v5269_v51 = vadd.f32 %v3666_v13, %v2686_v3  ;;  %v4639_v58 = vpop.f32.mrb[27].mxu1 }
 0x440   :  { %5797 = vtanh.f32 %v5268_v16  ;;  %v5279_v52 = vadd.f32 %v4639_v58, %v2686_v3 }
 0x441   :  { %5799 = vtanh.f32 %v5278_v40  ;;  %v3671_v34 = vpop.f32.mrb[28].mxu0 }
 0x442   :  { %5801 = vtanh.f32 %v5269_v51  ;;  %v5270_v33 = vadd.f32 %v3671_v34, %v2691_v44  ;;  %v4644_v15 = vpop.f32.mrb[28].mxu1  ;;  %v3673_v23 = vpop.f32.mrb[29].mxu0 }
 0x443   :  { %5803 = vtanh.f32 %v5279_v52  ;;  %v5280_v14 = vadd.f32 %v4644_v15, %v2691_v44  ;;  %v5271_v25 = vadd.f32 %v3673_v23, %v2691_v44  ;;  %v4646_v22 = vpop.f32.mrb[29].mxu1  ;;  %v4713_v15 = vpop.permute.xlu1 %4712 }
 0x444   :  { %5805 = vtanh.f32 %v5270_v33  ;;  %v5281_v50 = vadd.f32 %v4646_v22, %v2691_v44 }
 0x445   :  { %5807 = vtanh.f32 %v5280_v14  ;;  %v3678_v41 = vpop.f32.mrb[30].mxu0 }
 0x446   :  { %5809 = vtanh.f32 %v5271_v25  ;;  %v5272_v27 = vadd.f32 %v3678_v41, %v2696_v49  ;;  %v4651_v18 = vpop.f32.mrb[30].mxu1  ;;  %v3680_v56 = vpop.f32.mrb[31].mxu0 }
 0x447   :  { %5811 = vtanh.f32 %v5281_v50  ;;  %v5282_v28 = vadd.f32 %v4651_v18, %v2696_v49  ;;  %v5273_v55 = vadd.f32 %v3680_v56, %v2696_v49  ;;  %v4653_v20 = vpop.f32.mrb[31].mxu1 }
 0x448   :  { %5813 = vtanh.f32 %v5272_v27  ;;  %v5283_v62 = vadd.f32 %v4653_v20, %v2696_v49 }
 0x449   :  { %5815 = vtanh.f32 %v5282_v28  ;;  %v3685_v32 = vpop.f32.mrb[32].mxu0 }
 0x44a   :  { %v5798_v35 = vpop.eup %5797  ;;  %5817 = vtanh.f32 %v5273_v55  ;;  %v5274_v19 = vadd.f32 %v3685_v32, %v2701_v8  ;;  %v4658_v36 = vpop.f32.mrb[32].mxu1 }
 0x44b   :  { %v3687_v54 = vpop.f32.mrb[33].mxu0  ;;  %v5800_v30 = vpop.eup %5799  ;;  %5819 = vtanh.f32 %v5283_v62  ;;  %v5284_v0 = vadd.f32 %v4658_v36, %v2701_v8  ;;  %v4720_v43 = vmul.f32 %v5798_v35, %v4698_v48 }
 0x44c   :  { %v5275_v63 = vadd.f32 %v3687_v54, %v2701_v8  ;;  %v4660_v1 = vpop.f32.mrb[33].mxu1  ;;  %v5802_v17 = vpop.eup %5801  ;;  %5821 = vtanh.f32 %v5274_v19  ;;  %v4722_v7 = vmul.f32 %v5800_v30, %v4698_v48 }
 0x44d   :  { %v5285_v2 = vadd.f32 %v4660_v1, %v2701_v8  ;;  %v5804_v47 = vpop.eup %5803  ;;  %5823 = vtanh.f32 %v5284_v0  ;;  %v3692_v24 = vpop.f32.mrb[34].mxu0  ;;  %v4721_v61 = vmul.f32 %v5802_v17, %v4698_v48 }
 0x44e   :  { %v5806_v59 = vpop.eup %5805  ;;  %5825 = vtanh.f32 %v5275_v63  ;;  %v5276_v31 = vadd.f32 %v3692_v24, %v2706_v4  ;;  %v4665_v37 = vpop.f32.mrb[34].mxu1  ;;  %v4723_v3 = vmul.f32 %v5804_v47, %v4698_v48 }
 0x44f   :  { %v3694_v6 = vpop.f32.mrb[35].mxu0  ;;  %v5808_v12 = vpop.eup %5807  ;;  %v4724_v38 = vmul.f32 %v5806_v59, %v4703_v11  ;;  %5827 = vtanh.f32 %v5285_v2  ;;  %v5286_v60 = vadd.f32 %v4665_v37, %v2706_v4 }
 0x450   :  { %v5277_v9 = vadd.f32 %v3694_v6, %v2706_v4  ;;  %v4667_v10 = vpop.f32.mrb[35].mxu1  ;;  %v5810_v46 = vpop.eup %5809  ;;  %v4726_v26 = vmul.f32 %v5808_v12, %v4703_v11  ;;  %5829 = vtanh.f32 %v5276_v31 }
 0x451   :  { %v5287_v39 = vadd.f32 %v4667_v10, %v2706_v4  ;;  %v5812_v21 = vpop.eup %5811  ;;  %v4740_v42 = vadd.f32 %v4724_v38, %v4720_v43  ;;  %v4725_v29 = vmul.f32 %v5810_v46, %v4703_v11  ;;  %5831 = vtanh.f32 %v5286_v60  ;;  %v4718_v55 = vpop.permute.xlu0 %4717 }
 0x452   :  { %v5814_v45 = vpop.eup %5813  ;;  %v4760_v57 = vadd.f32 %v4726_v26, %v4722_v7  ;;  %v4727_v16 = vmul.f32 %v5812_v21, %v4703_v11  ;;  %5833 = vtanh.f32 %v5277_v9  ;;  %v5839_v46 = vmov 1966171168   ;;  %v4784_v26 = vpop.permute.xlu1 %4783 }
 0x453   :  { %v5816_v5 = vpop.eup %5815  ;;  %v4750_v13 = vadd.f32 %v4725_v29, %v4721_v61  ;;  %v4728_v44 = vmul.f32 %v5814_v45, %v4708_v53  ;;  %5835 = vtanh.f32 %v5287_v39  ;;  %v4801_v7 = vunpack.c.l.s4 %v5839_v46 }
 0x454   :  { %v5818_v40 = vpop.eup %5817  ;;  %v4770_v51 = vadd.f32 %v4727_v16, %v4723_v3  ;;  %v4730_v58 = vmul.f32 %v5816_v5, %v4708_v53 }
 0x455   :  { %v5820_v52 = vpop.eup %5819  ;;  %v4741_v49 = vadd.f32 %v4740_v42, %v4728_v44  ;;  %v4729_v34 = vmul.f32 %v5818_v40, %v4708_v53 }
 0x456   :  { %v5822_v33 = vpop.eup %5821  ;;  %v4761_v23 = vadd.f32 %v4760_v57, %v4730_v58  ;;  %v4731_v14 = vmul.f32 %v5820_v52, %v4708_v53  ;;  %v8299_v53 = vld [vmem:[#allocation3_spill] sm:$0xff] }
 0x457   :  { %v5824_v25 = vpop.eup %5823  ;;  %v4751_v22 = vadd.f32 %v4750_v13, %v4729_v34  ;;  %v4732_v50 = vmul.f32 %v5822_v33, %v4713_v15  ;;  %v8300_v3 = vsub.s32 0, %v8299_v53  ;;  %v4802_v13 = vunpack.c.0.s8 %v4801_v7 }
 0x458   :  { %v5826_v8 = vpop.eup %5825  ;;  %v4771_v41 = vadd.f32 %v4770_v51, %v4731_v14  ;;  %v4734_v27 = vmul.f32 %v5824_v25, %v4713_v15 }
 0x459   :  { %v5828_v18 = vpop.eup %5827  ;;  %v4742_v56 = vadd.f32 %v4741_v49, %v4732_v50  ;;  %v4733_v4 = vmul.f32 %v5826_v8, %v4713_v15  ;;  %v4789_v57 = vrot.slane %v4784_v26, %v8300_v3  ;;  %v4805_v33 = vsub.s32 %v4802_v13, %v8299_v53 }
 0x45a   :  { %v5830_v28 = vpop.eup %5829  ;;  %v4762_v20 = vadd.f32 %v4761_v23, %v4734_v27  ;;  %v4735_v62 = vmul.f32 %v5828_v18, %v4713_v15  ;;  %v8301_v8 = vlaneseq }
 0x45b   :  { %v5832_v32 = vpop.eup %5831  ;;  %v4752_v35 = vadd.f32 %v4751_v22, %v4733_v4  ;;  %v4736_v19 = vmul.f32 %v5830_v28, %v4718_v55 }
 0x45c   :  { %v5834_v36 = vpop.eup %5833  ;;  %v4772_v54 = vadd.f32 %v4771_v41, %v4735_v62  ;;  %v4738_v30 = vmul.f32 %v5832_v32, %v4718_v55  ;;  %vm4825_vm2 = vcmp.lt.s32.totalorder %v8301_v8, 512 }
 0x45d   :  { %v5836_v0 = vpop.eup %5835  ;;  %v4743_v63 = vadd.f32 %v4742_v56, %v4736_v19  ;;  %v4737_v1 = vmul.f32 %v5834_v36, %v4718_v55 }
 0x45e   :  { %v4763_v17 = vadd.f32 %v4762_v20, %v4738_v30  ;;  %v4739_v48 = vmul.f32 %v5836_v0, %v4718_v55 }
 0x45f   :  { %v4744_v2 = vrot.slane %v4743_v63, 4  ;;  %v4753_v47 = vadd.f32 %v4752_v35, %v4737_v1 }
 0x460   :  { %v4764_v11 = vrot.slane %v4763_v17, 4  ;;  %v4773_v24 = vadd.f32 %v4772_v54, %v4739_v48 }
 0x461   :  { %v4745_v59 = vadd.f32 %v4744_v2, %v4743_v63  ;;  %v4754_v43 = vrot.slane %v4753_v47, 4 }
 0x462   :  { %v4765_v31 = vadd.f32 %v4764_v11, %v4763_v17  ;;  %v4774_v37 = vrot.slane %v4773_v24, 4 }
 0x463   :  { %v4746_v6 = vrot.slane %v4745_v59, 2  ;;  %v4755_v12 = vadd.f32 %v4754_v43, %v4753_v47 }
 0x464   :  { %v4766_v38 = vrot.slane %v4765_v31, 2  ;;  %v4775_v60 = vadd.f32 %v4774_v37, %v4773_v24 }
 0x465   :  { %v4747_v9 = vadd.f32 %v4746_v6, %v4745_v59  ;;  %v4756_v10 = vrot.slane %v4755_v12, 2 }
 0x466   :  { %v4767_v39 = vadd.f32 %v4766_v38, %v4765_v31  ;;  %v4776_v21 = vrot.slane %v4775_v60, 2 }
 0x467   :  { %v4748_v61 = vrot.slane %v4747_v9, 1  ;;  %v4757_v42 = vadd.f32 %v4756_v10, %v4755_v12 }
 0x468   :  { %v4768_v29 = vrot.slane %v4767_v39, 1  ;;  %v4777_v45 = vadd.f32 %v4776_v21, %v4775_v60 }
 0x469   :  { %v4749_v16 = vadd.f32 %v4748_v61, %v4747_v9  ;;  %v4758_v5 = vrot.slane %v4757_v42, 1 }
 0x46a   :  { %v4769_v44 = vadd.f32 %v4768_v29, %v4767_v39  ;;  %v4778_v40 = vrot.slane %v4777_v45, 1 }
 0x46b   :  { %v4790_v51 = vadd.f32 %v4789_v57, %v4749_v16  ;;  %v4759_v58 = vadd.f32 %v4758_v5, %v4757_v42 }
 0x46c   :  { %v4792_v52 = vadd.f32 %v4789_v57, %v4769_v44  ;;  %v4779_v49 = vadd.f32 %v4778_v40, %v4777_v45 }
 0x46d   :  { %v4791_v34 = vadd.f32 %v4789_v57, %v4759_v58 }
 0x46e   :  { %v4793_v15 = vadd.f32 %v4789_v57, %v4779_v49 }
 0x46f   :  { %v4798_v23 = vcombine.low %v4790_v51, %v4791_v34 }
 0x470   :  { %v4799_v14 = vcombine.low %v4792_v52, %v4793_v15 }
 0x471   :  { %v4806_v25 = vrot.slane %v4798_v23, %v4805_v33 }
 0x472   :  { %v4813_v22 = vrot.slane %v4799_v14, %v4805_v33 }
 0x474   :  { %v4814_v50 = vcombine.low %v4806_v25, %v4813_v22 }
 0x476   :  { %v4821_v41 = vrot.slane %v4814_v50, %v4805_v33 }
 0x478   :  { %4827 = vst.msk [vmem:[%s7785_s9] sm:$0xf] %vm4825_vm2, %v4821_v41 }

</bundles_post_ra>
